<compile_context>
chip_gen: v7x
topology: tpu7x:2x2x1
jax: 0.10.0
libtpu: 0.0.40
codegen_flags: <defaults>
</compile_context>

<pallas_src>
import math

import jax
import jax.numpy as jnp
import numpy as np
from jax.experimental import pallas as pl
from jax.experimental.pallas import tpu as pltpu


# ----------------------------- DCT filter (buffer) -----------------------------
def _build_filter(pos, freq, POS):
    result = math.cos(math.pi * freq * (pos + 0.5) / POS) / math.sqrt(POS)
    if freq == 0:
        return result
    return result * math.sqrt(2)


def get_dct_filter(tile_size_x, tile_size_y, component_x, component_y, channel):
    assert len(component_x) == len(component_y)
    assert channel % len(component_x) == 0
    dct_filter = np.zeros((channel, tile_size_x, tile_size_y), dtype=np.float32)
    c_part = channel // len(component_x)
    for i, (u_x, v_y) in enumerate(zip(component_x, component_y)):
        for t_x in range(tile_size_x):
            for t_y in range(tile_size_y):
                dct_filter[i * c_part:(i + 1) * c_part, t_x, t_y] = (
                    _build_filter(t_x, u_x, tile_size_x)
                    * _build_filter(t_y, v_y, tile_size_y)
                )
    return dct_filter


# ------------------------------ sizing helpers ----------------------------------
def _round_up(v, m):
    return (v + m - 1) // m * m


def _vmem_capacity_bytes():
    """Reported VMEM capacity; conservative 64 MiB fallback (v7x per-core)."""
    try:
        info = pltpu.get_tpu_info()
        cap = getattr(info, "vmem_capacity_bytes", None)
        if cap:
            return int(cap)
    except Exception:
        pass
    return 64 * 1024 * 1024


def _choose_block_n(n, row_bytes, vmem_budget_bytes, n_buffers=5,
                    max_block=512, min_steps=8):
    """Batch block: multiple of 8 (sublane-aligned rows in the lane-dense
    layout), at most a few MiB, small enough for >= min_steps grid steps when
    N allows, preferring an even step count for v7x's two TensorCores."""
    if n <= 8:
        return n
    bn = max(8, vmem_budget_bytes // (n_buffers * row_bytes))
    bn = min(bn, max_block)                            # >512 rows buys <1% roofline
    bn = min(bn, _round_up(pl.cdiv(n, min_steps), 8))  # aim for >= min_steps steps
    bn = max(8, (bn // 8) * 8)                         # multiple of 8
    steps = pl.cdiv(n, bn)
    if steps > 1 and steps % 2 == 1:                   # prefer an even grid (2 TCs)
        bn_even = max(8, (pl.cdiv(n, steps + 1) // 8) * 8)
        if pl.cdiv(n, bn_even) % 2 == 0:
            bn = bn_even
    return min(bn, n)


# --------------------------- resident operand builders ---------------------------
def _block_diag_dct(dct2):
    """(C, HW) DCT filter -> (C*HW, C) block-diagonal pooling matrix so that
    (x.reshape(N, C*HW) @ D)[n, c] == sum_hw x[n, c, hw] * dct2[c, hw]."""
    c, hw = dct2.shape
    d = np.zeros((c * hw, c), dtype=np.float32)
    for ci in range(c):
        d[ci * hw:(ci + 1) * hw, ci] = dct2[ci]
    return d


def _channel_expand(c, hw):
    """(C, C*HW) 0/1 matrix: (s @ B)[n, c*HW + hw] == s[n, c]."""
    return np.kron(np.eye(c, dtype=np.float32), np.ones((1, hw), np.float32))


# ------------------------------- Pallas kernel ---------------------------------
def _make_kernel(use_highest_precision):
    prec = jax.lax.Precision.HIGHEST if use_highest_precision else None

    def branch_kernel(x_ref, d_ref, w1_ref, w2_ref, b_ref, out_ref):
        # x_ref:   (Bn, C*HW)  lane-dense batch block of the input (pipelined)
        # d_ref:   (C*HW, C)   block-diagonal DCT pooling matrix (resident)
        # w1_ref:  (C, C//r)   fc1 weight (in x out)          (resident)
        # w2_ref:  (C//r, C)   fc2 weight (in x out)          (resident)
        # b_ref:   (C, C*HW)   0/1 channel->spatial expansion (resident)

        # DCTLayer "frequency pooling" as a small MXU matmul -> (Bn, C).
        y = jnp.dot(x_ref[...], d_ref[...], precision=prec,
                    preferred_element_type=jnp.float32)

        # Channel-attention MLP: Linear -> ReLU -> Linear -> Sigmoid (bias-free).
        h = jnp.maximum(
            jnp.dot(y, w1_ref[...], precision=prec,
                    preferred_element_type=jnp.float32), 0.0)
        s = jax.nn.sigmoid(
            jnp.dot(h, w2_ref[...], precision=prec,
                    preferred_element_type=jnp.float32))         # (Bn, C)

        # Broadcast the per-channel scale into the lane-dense layout on the MXU
        # and rescale.  x_ref is re-read here so the streaming block does not
        # have to stay live across the MLP (shorter vreg live ranges).
        scale = jnp.dot(s, b_ref[...], precision=prec,
                        preferred_element_type=jnp.float32)      # (Bn, C*HW)
        out_ref[...] = x_ref[...] * scale

    return branch_kernel


# --------------------------------- wrapper --------------------------------------
def branch_layer(x, dct_weight, fc1_w, fc2_w, block_n=None, donate_x=False):
    """x: (N, C, H, W) float32; dct_weight: (C, H, W);
    fc1_w: (C//r, C) (PyTorch out,in); fc2_w: (C, C//r)."""
    n, c, h, w = x.shape
    hw = h * w
    chw = c * hw
    cr = fc1_w.shape[0]

    # Lane-dense operands.
    x2 = x.reshape(n, chw)
    d = jnp.asarray(_block_diag_dct(np.asarray(dct_weight).reshape(c, hw)))  # (CHW, C)
    b = jnp.asarray(_channel_expand(c, hw))                                  # (C, CHW)
    w1 = jnp.asarray(fc1_w).T                                                # (C, C//r)
    w2 = jnp.asarray(fc2_w).T                                                # (C//r, C)

    row_bytes = _round_up(chw, 128) * 4
    vmem_cap = min(_vmem_capacity_bytes(), 64 * 1024 * 1024)  # per-core sanity clamp
    if block_n is None:
        block_n = _choose_block_n(n, row_bytes, vmem_cap // 2)
    block_n = max(1, min(int(block_n), n))
    grid = (pl.cdiv(n, block_n),)

    # Scoped-VMEM limit: blocks (3 in-buffers + 2 out-buffers) + resident
    # operands + headroom, capped well below the 64 MiB per-core VMEM of v7x.
    resident = 4 * (_round_up(chw, 8) * _round_up(c, 128)
                    + _round_up(c, 8) * _round_up(chw, 128)
                    + _round_up(c, 8) * _round_up(cr, 128)
                    + _round_up(cr, 8) * _round_up(c, 128))
    block_bytes = _round_up(block_n, 8) * row_bytes
    required = 5 * block_bytes + resident
    vmem_limit = int(min(48 * 1024 * 1024,
                         max(16 * 1024 * 1024, required + (4 << 20))))

    cost = pl.CostEstimate(
        flops=2 * n * chw * c + 4 * n * c * cr + 2 * n * c * chw + n * chw,
        transcendentals=n * c,                       # sigmoid
        bytes_accessed=(2 * n * chw + chw * c + c * chw + 2 * c * cr) * 4,
    )

    def make_call(x_buffers, use_highest_precision):
        x_spec_kwargs = {}
        if x_buffers is not None:
            # Triple-buffer the streaming input to hide the writeback bubble.
            x_spec_kwargs = dict(pipeline_mode=pl.Buffered(x_buffers))
        return pl.pallas_call(
            _make_kernel(use_highest_precision),
            out_shape=jax.ShapeDtypeStruct((n, chw), jnp.float32),
            grid_spec=pltpu.PrefetchScalarGridSpec(
                num_scalar_prefetch=0,
                grid=grid,
                in_specs=[
                    pl.BlockSpec((block_n, chw), lambda i: (i, 0),
                                 **x_spec_kwargs),                 # x (pipelined)
                    pl.BlockSpec((chw, c), lambda i: (0, 0)),      # D (resident)
                    pl.BlockSpec((c, cr), lambda i: (0, 0)),       # W1 (resident)
                    pl.BlockSpec((cr, c), lambda i: (0, 0)),       # W2 (resident)
                    pl.BlockSpec((c, chw), lambda i: (0, 0)),      # B (resident)
                ],
                out_specs=pl.BlockSpec((block_n, chw), lambda i: (i, 0)),
            ),
            compiler_params=pltpu.CompilerParams(
                dimension_semantics=("parallel",),   # shard grid across v7x's 2 TCs
                vmem_limit_bytes=vmem_limit,
            ),
            cost_estimate=cost,
            input_output_aliases=({0: 0} if donate_x else {}),
        )

    # Preferred config first; degrade gracefully if this JAX build rejects
    # Buffered(3) or HIGHEST-precision matmuls in the Mosaic lowering.
    attempts = ((3, True), (None, True), (None, False))
    last_err = None
    for x_buffers, hi in attempts:
        try:
            out2 = make_call(x_buffers, hi)(x2, d, w1, w2, b)
            break
        except Exception as e:   # noqa: BLE001 - fall back to next config
            last_err = e
    else:
        raise last_err

    return out2.reshape(n, c, h, w)


# ---------------------------------- main ---------------------------------------
if __name__ == "__main__":
    # BranchLayer config: channel=16, dct_h=dct_w=7, component_x=[0,1],
    # component_y=[1,0], reduction=4.  N=20 gives an auto block_n of 8 and a
    # multi-step grid with a partial last block (exercises edge masking).
    N, C, H, W = 20, 16, 7, 7
    reduction = 4
    component_x = [item * (H // 7) for item in [0, 1]]
    component_y = [item * (W // 7) for item in [1, 0]]

    dct_weight = jnp.asarray(get_dct_filter(H, W, component_x, component_y, C))
    key = jax.random.PRNGKey(0)
    k_x, k_w1, k_w2 = jax.random.split(key, 3)
    fc1_w = jax.random.normal(k_w1, (C // reduction, C), dtype=jnp.float32) * 0.1
    fc2_w = jax.random.normal(k_w2, (C, C // reduction), dtype=jnp.float32) * 0.1
    x = jax.random.normal(k_x, (N, C, H, W), dtype=jnp.float32)

    out = branch_layer(x, dct_weight, fc1_w, fc2_w)   # auto block_n
    out = jax.block_until_ready(out)

    # Pure-JAX reference (exact f32 pooling, HIGHEST-precision matmuls).
    hp = jax.lax.Precision.HIGHEST
    y_ref = jnp.sum(x * dct_weight[None], axis=(2, 3))
    y_ref = jax.nn.sigmoid(
        jnp.dot(jnp.maximum(jnp.dot(y_ref, fc1_w.T, precision=hp), 0.0),
                fc2_w.T, precision=hp))
    ref = x * y_ref[:, :, None, None]

    assert out.shape == (N, C, H, W)
    np.testing.assert_allclose(np.asarray(out), np.asarray(ref),
                               rtol=1e-4, atol=1e-5)
    print("KERNEL_OK")
</pallas_src>

<mosaic_0001>
module attributes {stable_mosaic.version = 11 : i64} {
  func.func @branch_kernel(%arg0: i32, %arg1: memref<8x784xf32, #tpu.memory_space<vmem>>, %arg2: memref<784x16xf32, #tpu.memory_space<vmem>>, %arg3: memref<16x4xf32, #tpu.memory_space<vmem>>, %arg4: memref<4x16xf32, #tpu.memory_space<vmem>>, %arg5: memref<16x784xf32, #tpu.memory_space<vmem>>, %arg6: memref<8x784xf32, #tpu.memory_space<vmem>>) attributes {dimension_semantics = [#tpu.dimension_semantics<parallel>], iteration_bounds = array<i64: 3>, scalar_prefetch = 0 : i64, scratch_operands = 0 : i64, tpu.core_type = #tpu.core_type<tc>, window_params = [{transform_indices = @transform_0, window_bounds = array<i64: 8, 784>}, {pipeline_mode = #tpu.pipeline_mode<synchronous>, transform_indices = @transform_1, window_bounds = array<i64: 784, 16>}, {pipeline_mode = #tpu.pipeline_mode<synchronous>, transform_indices = @transform_2, window_bounds = array<i64: 16, 4>}, {pipeline_mode = #tpu.pipeline_mode<synchronous>, transform_indices = @transform_3, window_bounds = array<i64: 4, 16>}, {pipeline_mode = #tpu.pipeline_mode<synchronous>, transform_indices = @transform_4, window_bounds = array<i64: 16, 784>}, {transform_indices = @transform_5, window_bounds = array<i64: 8, 784>}]} {
    %c0 = arith.constant 0 : index
    %c0_0 = arith.constant 0 : index
    %0 = vector.load %arg1[%c0, %c0_0] : memref<8x784xf32, #tpu.memory_space<vmem>>, vector<8x784xf32>
    %c0_1 = arith.constant 0 : index
    %c0_2 = arith.constant 0 : index
    %1 = vector.load %arg2[%c0_1, %c0_2] : memref<784x16xf32, #tpu.memory_space<vmem>>, vector<784x16xf32>
    %cst = arith.constant dense<0.000000e+00> : vector<8x16xf32>
    %2 = tpu.matmul %0, %1, %cst {dimension_numbers = #tpu.dot_dimension_numbers<[1], [0], [0], [1], [0, 0, 1, 1], [], []>, precision = #tpu.contract_precision<fp32>} : vector<8x784xf32>, vector<784x16xf32>, vector<8x16xf32> -> vector<8x16xf32>
    %c0_3 = arith.constant 0 : index
    %c0_4 = arith.constant 0 : index
    %3 = vector.load %arg3[%c0_3, %c0_4] : memref<16x4xf32, #tpu.memory_space<vmem>>, vector<16x4xf32>
    %cst_5 = arith.constant dense<0.000000e+00> : vector<8x4xf32>
    %4 = tpu.matmul %2, %3, %cst_5 {dimension_numbers = #tpu.dot_dimension_numbers<[1], [0], [0], [1], [0, 0, 1, 1], [], []>, precision = #tpu.contract_precision<fp32>} : vector<8x16xf32>, vector<16x4xf32>, vector<8x4xf32> -> vector<8x4xf32>
    %cst_6 = arith.constant 0.000000e+00 : f32
    %5 = vector.broadcast %cst_6 : f32 to vector<8x4xf32>
    %6 = arith.maximumf %4, %5 : vector<8x4xf32>
    %c0_7 = arith.constant 0 : index
    %c0_8 = arith.constant 0 : index
    %7 = vector.load %arg4[%c0_7, %c0_8] : memref<4x16xf32, #tpu.memory_space<vmem>>, vector<4x16xf32>
    %cst_9 = arith.constant dense<0.000000e+00> : vector<8x16xf32>
    %8 = tpu.matmul %6, %7, %cst_9 {dimension_numbers = #tpu.dot_dimension_numbers<[1], [0], [0], [1], [0, 0, 1, 1], [], []>, precision = #tpu.contract_precision<fp32>} : vector<8x4xf32>, vector<4x16xf32>, vector<8x16xf32> -> vector<8x16xf32>
    %9 = arith.negf %8 : vector<8x16xf32>
    %10 = math.exp %9 : vector<8x16xf32>
    %cst_10 = arith.constant 1.000000e+00 : f32
    %11 = vector.broadcast %cst_10 : f32 to vector<8x16xf32>
    %12 = arith.addf %11, %10 : vector<8x16xf32>
    %13 = arith.divf %11, %12 : vector<8x16xf32>
    %c0_11 = arith.constant 0 : index
    %c0_12 = arith.constant 0 : index
    %14 = vector.load %arg5[%c0_11, %c0_12] : memref<16x784xf32, #tpu.memory_space<vmem>>, vector<16x784xf32>
    %cst_13 = arith.constant dense<0.000000e+00> : vector<8x784xf32>
    %15 = tpu.matmul %13, %14, %cst_13 {dimension_numbers = #tpu.dot_dimension_numbers<[1], [0], [0], [1], [0, 0, 1, 1], [], []>, precision = #tpu.contract_precision<fp32>} : vector<8x16xf32>, vector<16x784xf32>, vector<8x784xf32> -> vector<8x784xf32>
    %c0_14 = arith.constant 0 : index
    %c0_15 = arith.constant 0 : index
    %16 = vector.load %arg1[%c0_14, %c0_15] : memref<8x784xf32, #tpu.memory_space<vmem>>, vector<8x784xf32>
    %17 = arith.mulf %16, %15 : vector<8x784xf32>
    %c0_16 = arith.constant 0 : index
    %c0_17 = arith.constant 0 : index
    %18 = vector.load %arg6[%c0_16, %c0_17] : memref<8x784xf32, #tpu.memory_space<vmem>>, vector<8x784xf32>
    tpu.vector_store %arg6[%c0_16, %c0_17], %17 {strides = array<i32>} : memref<8x784xf32, #tpu.memory_space<vmem>>, vector<8x784xf32>,
    return
  }
  func.func @transform_0(%arg0: i32) -> (i32, i32) {
    %c0_i32 = arith.constant 0 : i32
    %c0_i32_0 = arith.constant 0 : i32
    return %arg0, %c0_i32 : i32, i32
  }
  func.func @transform_1(%arg0: i32) -> (i32, i32) {
    %c0_i32 = arith.constant 0 : i32
    %c0_i32_0 = arith.constant 0 : i32
    %c0_i32_1 = arith.constant 0 : i32
    return %c0_i32, %c0_i32_0 : i32, i32
  }
  func.func @transform_2(%arg0: i32) -> (i32, i32) {
    %c0_i32 = arith.constant 0 : i32
    %c0_i32_0 = arith.constant 0 : i32
    %c0_i32_1 = arith.constant 0 : i32
    return %c0_i32, %c0_i32_0 : i32, i32
  }
  func.func @transform_3(%arg0: i32) -> (i32, i32) {
    %c0_i32 = arith.constant 0 : i32
    %c0_i32_0 = arith.constant 0 : i32
    %c0_i32_1 = arith.constant 0 : i32
    return %c0_i32, %c0_i32_0 : i32, i32
  }
  func.func @transform_4(%arg0: i32) -> (i32, i32) {
    %c0_i32 = arith.constant 0 : i32
    %c0_i32_0 = arith.constant 0 : i32
    %c0_i32_1 = arith.constant 0 : i32
    return %c0_i32, %c0_i32_0 : i32, i32
  }
  func.func @transform_5(%arg0: i32) -> (i32, i32) {
    %c0_i32 = arith.constant 0 : i32
    %c0_i32_0 = arith.constant 0 : i32
    return %arg0, %c0_i32 : i32, i32
  }
}

module attributes {stable_mosaic.version = 11 : i64} {
  func.func @branch_kernel(%arg0: i32, %arg1: memref<8x784xf32, #tpu.memory_space<vmem>>, %arg2: memref<784x16xf32, #tpu.memory_space<vmem>>, %arg3: memref<16x4xf32, #tpu.memory_space<vmem>>, %arg4: memref<4x16xf32, #tpu.memory_space<vmem>>, %arg5: memref<16x784xf32, #tpu.memory_space<vmem>>, %arg6: memref<8x784xf32, #tpu.memory_space<vmem>>) attributes {dimension_semantics = [#tpu.dimension_semantics<parallel>], iteration_bounds = array<i64: 3>, scalar_prefetch = 0 : i64, scratch_operands = 0 : i64, tpu.core_type = #tpu.core_type<tc>, window_params = [{transform_indices = @transform_0, window_bounds = array<i64: 8, 784>}, {pipeline_mode = #tpu.pipeline_mode<synchronous>, transform_indices = @transform_1, window_bounds = array<i64: 784, 16>}, {pipeline_mode = #tpu.pipeline_mode<synchronous>, transform_indices = @transform_2, window_bounds = array<i64: 16, 4>}, {pipeline_mode = #tpu.pipeline_mode<synchronous>, transform_indices = @transform_3, window_bounds = array<i64: 4, 16>}, {pipeline_mode = #tpu.pipeline_mode<synchronous>, transform_indices = @transform_4, window_bounds = array<i64: 16, 784>}, {transform_indices = @transform_5, window_bounds = array<i64: 8, 784>}]} {
    %c0 = arith.constant 0 : index
    %c0_0 = arith.constant 0 : index
    %0 = vector.load %arg1[%c0, %c0_0] : memref<8x784xf32, #tpu.memory_space<vmem>>, vector<8x784xf32>
    %c0_1 = arith.constant 0 : index
    %c0_2 = arith.constant 0 : index
    %1 = vector.load %arg2[%c0_1, %c0_2] : memref<784x16xf32, #tpu.memory_space<vmem>>, vector<784x16xf32>
    %cst = arith.constant dense<0.000000e+00> : vector<8x16xf32>
    %2 = tpu.matmul %0, %1, %cst {dimension_numbers = #tpu.dot_dimension_numbers<[1], [0], [0], [1], [0, 0, 1, 1], [], []>} : vector<8x784xf32>, vector<784x16xf32>, vector<8x16xf32> -> vector<8x16xf32>
    %c0_3 = arith.constant 0 : index
    %c0_4 = arith.constant 0 : index
    %3 = vector.load %arg3[%c0_3, %c0_4] : memref<16x4xf32, #tpu.memory_space<vmem>>, vector<16x4xf32>
    %cst_5 = arith.constant dense<0.000000e+00> : vector<8x4xf32>
    %4 = tpu.matmul %2, %3, %cst_5 {dimension_numbers = #tpu.dot_dimension_numbers<[1], [0], [0], [1], [0, 0, 1, 1], [], []>} : vector<8x16xf32>, vector<16x4xf32>, vector<8x4xf32> -> vector<8x4xf32>
    %cst_6 = arith.constant 0.000000e+00 : f32
    %5 = vector.broadcast %cst_6 : f32 to vector<8x4xf32>
    %6 = arith.maximumf %4, %5 : vector<8x4xf32>
    %c0_7 = arith.constant 0 : index
    %c0_8 = arith.constant 0 : index
    %7 = vector.load %arg4[%c0_7, %c0_8] : memref<4x16xf32, #tpu.memory_space<vmem>>, vector<4x16xf32>
    %cst_9 = arith.constant dense<0.000000e+00> : vector<8x16xf32>
    %8 = tpu.matmul %6, %7, %cst_9 {dimension_numbers = #tpu.dot_dimension_numbers<[1], [0], [0], [1], [0, 0, 1, 1], [], []>} : vector<8x4xf32>, vector<4x16xf32>, vector<8x16xf32> -> vector<8x16xf32>
    %9 = arith.negf %8 : vector<8x16xf32>
    %10 = math.exp %9 : vector<8x16xf32>
    %cst_10 = arith.constant 1.000000e+00 : f32
    %11 = vector.broadcast %cst_10 : f32 to vector<8x16xf32>
    %12 = arith.addf %11, %10 : vector<8x16xf32>
    %13 = arith.divf %11, %12 : vector<8x16xf32>
    %c0_11 = arith.constant 0 : index
    %c0_12 = arith.constant 0 : index
    %14 = vector.load %arg5[%c0_11, %c0_12] : memref<16x784xf32, #tpu.memory_space<vmem>>, vector<16x784xf32>
    %cst_13 = arith.constant dense<0.000000e+00> : vector<8x784xf32>
    %15 = tpu.matmul %13, %14, %cst_13 {dimension_numbers = #tpu.dot_dimension_numbers<[1], [0], [0], [1], [0, 0, 1, 1], [], []>} : vector<8x16xf32>, vector<16x784xf32>, vector<8x784xf32> -> vector<8x784xf32>
    %c0_14 = arith.constant 0 : index
    %c0_15 = arith.constant 0 : index
    %16 = vector.load %arg1[%c0_14, %c0_15] : memref<8x784xf32, #tpu.memory_space<vmem>>, vector<8x784xf32>
    %17 = arith.mulf %16, %15 : vector<8x784xf32>
    %c0_16 = arith.constant 0 : index
    %c0_17 = arith.constant 0 : index
    %18 = vector.load %arg6[%c0_16, %c0_17] : memref<8x784xf32, #tpu.memory_space<vmem>>, vector<8x784xf32>
    tpu.vector_store %arg6[%c0_16, %c0_17], %17 {strides = array<i32>} : memref<8x784xf32, #tpu.memory_space<vmem>>, vector<8x784xf32>,
    return
  }
  func.func @transform_0(%arg0: i32) -> (i32, i32) {
    %c0_i32 = arith.constant 0 : i32
    %c0_i32_0 = arith.constant 0 : i32
    return %arg0, %c0_i32 : i32, i32
  }
  func.func @transform_1(%arg0: i32) -> (i32, i32) {
    %c0_i32 = arith.constant 0 : i32
    %c0_i32_0 = arith.constant 0 : i32
    %c0_i32_1 = arith.constant 0 : i32
    return %c0_i32, %c0_i32_0 : i32, i32
  }
  func.func @transform_2(%arg0: i32) -> (i32, i32) {
    %c0_i32 = arith.constant 0 : i32
    %c0_i32_0 = arith.constant 0 : i32
    %c0_i32_1 = arith.constant 0 : i32
    return %c0_i32, %c0_i32_0 : i32, i32
  }
  func.func @transform_3(%arg0: i32) -> (i32, i32) {
    %c0_i32 = arith.constant 0 : i32
    %c0_i32_0 = arith.constant 0 : i32
    %c0_i32_1 = arith.constant 0 : i32
    return %c0_i32, %c0_i32_0 : i32, i32
  }
  func.func @transform_4(%arg0: i32) -> (i32, i32) {
    %c0_i32 = arith.constant 0 : i32
    %c0_i32_0 = arith.constant 0 : i32
    %c0_i32_1 = arith.constant 0 : i32
    return %c0_i32, %c0_i32_0 : i32, i32
  }
  func.func @transform_5(%arg0: i32) -> (i32, i32) {
    %c0_i32 = arith.constant 0 : i32
    %c0_i32_0 = arith.constant 0 : i32
    return %arg0, %c0_i32 : i32, i32
  }
}

</mosaic_0001>

<bundles_post_ra>
// kernel: tpu_custom_call.1
= control target key start
LH: loop header
LB: loop body
LE: loop exit
PB: predicated region body
PF: predicated region fallthrough
CT: control target
= control target key end

     0   :  { %10 = vsyncpa [#allocation3], 0  ;;  %s10159_s0 = inlined_call_operand.vmem [shape: f32[20,784], index: 0, kind: input, shape index: {}]   ;;  %s10160_s1 = inlined_call_operand.vmem [shape: f32[784,16], index: 1, kind: input, shape index: {}]   ;;  %s10161_s2 = inlined_call_operand.vmem [shape: f32[16,4], index: 2, kind: input, shape index: {}]   ;;  %s10162_s3 = inlined_call_operand.vmem [shape: f32[4,16], index: 3, kind: input, shape index: {}]   ;;  %s10163_s4 = inlined_call_operand.vmem [shape: f32[16,784], index: 4, kind: input, shape index: {}]   ;;  %s10164_s5 = inlined_call_operand.hbm [shape: f32[20,784], index: 5, kind: output, shape index: {}]  }
   0x1   :  { %12 = vsyncpa [#allocation3 + $0x1], 0  ;;  %s8126_s18 = smov 0   ;;  %s8128_s19 = smov 0  }
   0x2   :  { %s8130_s20 = smov 0   ;;  %s8132_s21 = smov 0  }
   0x3 LB: > { %s8147_s22 = sadd.s32 4294967295, %s8090_s21   ;;  %s6340_s23 = sadd.s32 4294967294, %s8090_s21   ;;  %s8090_s21 = sphi %s8132_s21, %s10484_s21   ;;  %s8086_s20 = sphi %s8130_s20, %s10483_s20   ;;  %s8082_s19 = sphi %s8128_s19, %s10482_s19   ;;  %s8078_s18 = sphi %s8126_s18, %s10481_s18  }
   0x4   : > { %s8151_s24 = sadd.s32 1, %s8090_s21   ;;  %s135_s25 = sadd.s32 1, %s8086_s20 }
   0x5   : > { %s132_s26 = ssub.s32 %s8090_s21, %s8151_s24  ;;  %p145_p0 = scmp.ne.s32.totalorder %s8086_s20, %s8082_s19 }
   0x6   : > { %p133_p1 = scmp.eq.s32.totalorder %s132_s26, 0  ;;  %p146_p2 = scmp.eq.s32.totalorder %s8147_s22, 2 }
   0x7   : > { %p151_p3 = scmp.ne.s32.totalorder %s8082_s19, %s8078_s18  ;;  %p152_p4 = scmp.eq.s32.totalorder %s6340_s23, 2 }
   0x8   : > { %s8162_s27 = scalar_select %p133_p1, %s8086_s20, %s135_s25  }
   0x9   : > { %p8164_p5 = por %p146_p2, %p145_p0  ;;  %p8168_p6 = por %p152_p4, %p151_p3 }
   0xa   : > { %p6343_p7 = scmp.ge.s32.totalorder %s8090_s21, 1  ;;  %p190_p8 = scmp.lt.s32.totalorder %s8090_s21, 4 }
   0xc   : > { %p191_p9 = pnand %p6343_p7, %p190_p8 }
   0xe   : > { %194 = sbr.rel (%p191_p9) target bundleno = 1452 (0x5ac), region = 40 }
  0x15   : > { %v246_v0 = vld [vmem:[%s10160_s1 + $0x80] sm:$0xff]  ;;  %v247_v1 = vld [vmem:[%s10160_s1 + $0x88] sm:$0xff]  ;;  %v248_v7 = vld [vmem:[%s10160_s1 + $0x90] sm:$0xff]  ;;  %p218_p10 = scmp.lt.s32.totalorder %s8147_s22, 2  ;;  %vm328_vm0 = vcmask 130048   ;;  %vm8093_vm1 = vmmov 0  }
  0x16   : > { %v230_v2 = vld [vmem:[%s10160_s1] sm:$0xff]  ;;  %v381_v3 = vand.u32 4294901760, %v246_v0  ;;  %v384_v4 = vand.u32 4294901760, %v247_v1  ;;  %v231_v5 = vld [vmem:[%s10160_s1 + $0x8] sm:$0xff]  ;;  %v249_v8 = vld [vmem:[%s10160_s1 + $0x98] sm:$0xff]  ;;  %v387_v10 = vand.u32 4294901760, %v248_v7 }
  0x17   : > { %v333_v6 = vand.u32 4294901760, %v230_v2  ;;  %v336_v9 = vand.u32 4294901760, %v231_v5  ;;  %v390_v11 = vand.u32 4294901760, %v249_v8  ;;  %v232_v12 = vld [vmem:[%s10160_s1 + $0x10] sm:$0xff]  ;;  %v233_v13 = vld [vmem:[%s10160_s1 + $0x18] sm:$0xff]  ;;  %v250_v18 = vld [vmem:[%s10160_s1 + $0xa0] sm:$0xff] }
  0x18   : > { %v8198_v14 = vpack.c.bf16 %v384_v4, %v381_v3  ;;  %v339_v16 = vand.u32 4294901760, %v232_v12  ;;  %v342_v17 = vand.u32 4294901760, %v233_v13  ;;  %v251_v19 = vld [vmem:[%s10160_s1 + $0xa8] sm:$0xff]  ;;  %v234_v23 = vld [vmem:[%s10160_s1 + $0x20] sm:$0xff]  ;;  %v8221_v25 = vsub.f32 %v248_v7, %v387_v10  ;;  %v252_v37 = vld [vmem:[%s10160_s1 + $0xb0] sm:$0xff]  ;;  %s8394_s11 = scalar_select %p218_p10, %s8147_s22, 2 }
  0x19   : > { %v8200_v15 = vsub.f32 %v230_v2, %v333_v6  ;;  %v8208_v20 = vpack.c.bf16 %v336_v9, %v333_v6  ;;  %v8210_v21 = vsub.f32 %v231_v5, %v336_v9  ;;  %v8212_v22 = vpack.c.bf16 %v390_v11, %v387_v10  ;;  %v235_v24 = vld [vmem:[%s10160_s1 + $0x28] sm:$0xff]  ;;  %v253_v42 = vld [vmem:[%s10160_s1 + $0xb8] sm:$0xff]  ;;  %v236_v55 = vld [vmem:[%s10160_s1 + $0x30] sm:$0xff] }
  0x1a   : > { %7202 = vmatprep.subr.bf16.mxu0 %v8198_v14  ;;  %v8223_v26 = vsub.f32 %v249_v8, %v390_v11  ;;  %v8225_v27 = vpack.c.bf16 %v342_v17, %v339_v16  ;;  %v8227_v28 = vsub.f32 %v232_v12, %v339_v16  ;;  %v393_v29 = vand.u32 4294901760, %v250_v18  ;;  %v237_v56 = vld [vmem:[%s10160_s1 + $0x38] sm:$0xff]  ;;  %v254_v5 = vld [vmem:[%s10160_s1 + $0xc0] sm:$0xff]  ;;  %v255_v6 = vld [vmem:[%s10160_s1 + $0xc8] sm:$0xff]  ;;  %s7974_s14 = smul.u32 56, %s8394_s11  ;;  %s215_s11 = sand.u32 1, %s8082_s19  }
  0x1b   : > { %7204 = vmatpush3.bf16.msra.mxu0 %v8208_v20  ;;  %v396_v30 = vand.u32 4294901760, %v251_v19  ;;  %v8230_v31 = vsub.f32 %v246_v0, %v381_v3  ;;  %v8232_v32 = vsub.f32 %v247_v1, %v384_v4  ;;  %v345_v33 = vand.u32 4294901760, %v234_v23  ;;  %v238_v11 = vld [vmem:[%s10160_s1 + $0x40] sm:$0xff]  ;;  %s7973_s12 = smul.u32 56, %s215_s11 }
  0x1c   : > { %7206 = vmatprep.subr.bf16.mxu0 %v8212_v22  ;;  %v348_v34 = vand.u32 4294901760, %v235_v24  ;;  %v10182_v35 = vand.u32 4294901760, %v8200_v15  ;;  %v10181_v36 = vand.u32 4294901760, %v8210_v21  ;;  %v8240_v38 = vsub.f32 %v233_v13, %v342_v17  ;;  %s8455_s9 = scalar_lea.vmem %s10159_s0, %s7974_s14  ;;  %s7975_s14 = smul.u32 896, %s8147_s22 }
  0x1d   : > { %v8242_v39 = vpack.c.bf16 %v396_v30, %v393_v29  ;;  %v8244_v40 = vsub.f32 %v250_v18, %v393_v29  ;;  %v10184_v41 = vand.u32 4294901760, %v8230_v31  ;;  %v8250_v43 = vsub.f32 %v251_v19, %v396_v30  ;;  %v239_v29 = vld [vmem:[%s10160_s1 + $0x48] sm:$0xff]  ;;  %s217_s13 = scalar_lea.vmem [#allocation2], %s7973_s12  ;;  %s6267_s22 = scalar_lea.sflag [#allocation3], %s215_s11 }
  0x1e   : > { %v10183_v44 = vand.u32 4294901760, %v8232_v32  ;;  %v8253_v45 = vpack.c.bf16 %v348_v34, %v345_v33  ;;  %v8255_v46 = vsub.f32 %v234_v23, %v345_v33  ;;  %v448_v48 = vsub.f32 %v8200_v15, %v10182_v35  ;;  %s6281_s15 = sshll.u32 %s217_s13, 4  ;;  %s10114_s23 = scalar_lea.hbm %s10164_s5, %s7975_s14  ;;  %s10116_s15 = int_to_ptr.vmem [resolvable:$true] %s6281_s15 }
  0x1f   : > { %7208 = vmatpush3.bf16.msra.mxu0 %v8225_v27  ;;  %v560_v47 = vsub.f32 %v8230_v31, %v10184_v41  ;;  %v455_v49 = vsub.f32 %v8210_v21, %v10181_v36  ;;  %v399_v50 = vand.u32 4294901760, %v252_v37  ;;  %v402_v52 = vand.u32 4294901760, %v253_v42  ;;  %v224_v41 = vld [vmem:[%s8455_s9 + $0x8] sm:$0xff]  ;;  %s8028_s25 = scalar_lea.vmem %s10116_s15, 896 }
  0x20   : > { %7210 = vmatprep.subr.bf16.mxu0 %v8242_v39  ;;  %v567_v51 = vsub.f32 %v8232_v32, %v10183_v44  ;;  %v10180_v53 = vand.u32 4294901760, %v8221_v25  ;;  %v10177_v54 = vand.u32 4294901760, %v8223_v26  ;;  %v8279_v58 = vsub.f32 %v235_v24, %v348_v34  ;;  %p8029_p11 = scmp.ne.s32.totalorder %s10116_s15, %s8028_s25 }
  0x21   : > { %v561_v57 = vand.u32 4294901760, %v560_v47  ;;  %v449_v59 = vand.u32 4294901760, %v448_v48  ;;  %v456_v60 = vand.u32 4294901760, %v455_v49  ;;  %v8281_v62 = vpack.c.bf16 %v402_v52, %v399_v50 }
  0x22   : > { %v568_v61 = vand.u32 4294901760, %v567_v51  ;;  %v8283_v63 = vsub.f32 %v252_v37, %v399_v50  ;;  %v574_v0 = vsub.f32 %v8221_v25, %v10180_v53  ;;  %v581_v2 = vsub.f32 %v8223_v26, %v10177_v54  ;;  %p8030_p12 = pnand %p8029_p11, %p8164_p5 }
  0x23   : > { %7212 = vmatpush3.bf16.msra.mxu0 %v8253_v45  ;;  %v7235_v1 = vpack.c.bf16 %v456_v60, %v449_v59  ;;  %v351_v3 = vand.u32 4294901760, %v236_v55  ;;  %v354_v4 = vand.u32 4294901760, %v237_v56  ;;  %v10176_v9 = vand.u32 4294901760, %v8227_v28 }
  0x24   : > { %v7233_v7 = vpack.c.bf16 %v568_v61, %v561_v57  ;;  %7214 = vmatprep.subr.bf16.mxu0 %v8281_v62  ;;  %v575_v8 = vand.u32 4294901760, %v574_v0  ;;  %v10173_v10 = vand.u32 4294901760, %v8240_v38  ;;  %v8304_v12 = vsub.f32 %v253_v42, %v402_v52  ;;  %v257_v57 = vld [vmem:[%s10160_s1 + $0xd8] sm:$0xff]  ;;  %p8031_p13 = pneg %p8030_p12 }
  0x25   : > { %v582_v13 = vand.u32 4294901760, %v581_v2  ;;  %v8306_v16 = vpack.c.bf16 %v354_v4, %v351_v3  ;;  %v8308_v17 = vsub.f32 %v236_v55, %v351_v3  ;;  %v462_v18 = vsub.f32 %v8227_v28, %v10176_v9 }
  0x26   : > { %7234 = vmatprep.subr.bf16.mxu1 %v7233_v7  ;;  %v469_v19 = vsub.f32 %v8240_v38, %v10173_v10  ;;  %v405_v23 = vand.u32 4294901760, %v254_v5  ;;  %v408_v24 = vand.u32 4294901760, %v255_v6  ;;  %v10171_v33 = vand.u32 4294901760, %v8244_v40 }
  0x27   : > { %7236 = vmatpush3.bf16.msra.mxu1 %v7235_v1  ;;  %v7237_v30 = vpack.c.bf16 %v582_v13, %v575_v8  ;;  %7216 = vmatpush3.bf16.msra.mxu0 %v8306_v16  ;;  %v10170_v34 = vand.u32 4294901760, %v8250_v43  ;;  %v357_v37 = vand.u32 4294901760, %v238_v11  ;;  %v8322_v42 = vsub.f32 %v237_v56, %v354_v4  ;;  %v256_v56 = vld [vmem:[%s10160_s1 + $0xd0] sm:$0xff] }
  0x28   : > { %v463_v47 = vand.u32 4294901760, %v462_v18  ;;  %v470_v48 = vand.u32 4294901760, %v469_v19  ;;  %v8324_v49 = vpack.c.bf16 %v408_v24, %v405_v23  ;;  %v8326_v50 = vsub.f32 %v254_v5, %v405_v23  ;;  %v240_v1 = vld [vmem:[%s10160_s1 + $0x50] sm:$0xff]  ;;  %v241_v18 = vld [vmem:[%s10160_s1 + $0x58] sm:$0xff] }
  0x29   : > { %7238 = vmatprep.subr.bf16.mxu1 %v7237_v30  ;;  %v588_v51 = vsub.f32 %v8244_v40, %v10171_v33  ;;  %v595_v52 = vsub.f32 %v8250_v43, %v10170_v34  ;;  %v360_v55 = vand.u32 4294901760, %v239_v29  ;;  %v8341_v60 = vsub.f32 %v255_v6, %v408_v24 }
  0x2a   : > { %v7239_v59 = vpack.c.bf16 %v470_v48, %v463_v47  ;;  %7218 = vmatprep.subr.bf16.mxu0 %v8324_v49  ;;  %v10168_v61 = vand.u32 4294901760, %v8255_v46  ;;  %v10167_v0 = vand.u32 4294901760, %v8279_v58  ;;  %v8350_v5 = vsub.f32 %v238_v11, %v357_v37 }
  0x2b   : > { %v589_v2 = vand.u32 4294901760, %v588_v51  ;;  %v596_v3 = vand.u32 4294901760, %v595_v52  ;;  %v8348_v4 = vpack.c.bf16 %v360_v55, %v357_v37  ;;  %v411_v8 = vand.u32 4294901760, %v256_v56 }
  0x2c   : > { %7240 = vmatpush3.bf16.msra.mxu1 %v7239_v59  ;;  %v476_v6 = vsub.f32 %v8255_v46, %v10168_v61  ;;  %v483_v7 = vsub.f32 %v8279_v58, %v10167_v0  ;;  %v414_v13 = vand.u32 4294901760, %v257_v57  ;;  %v10166_v11 = vand.u32 4294901760, %v8283_v63 }
  0x2d   : > { %v7241_v19 = vpack.c.bf16 %v596_v3, %v589_v2  ;;  %7220 = vmatpush3.bf16.msra.mxu0 %v8348_v4  ;;  %v10165_v23 = vand.u32 4294901760, %v8304_v12  ;;  %v363_v24 = vand.u32 4294901760, %v240_v1  ;;  %v8365_v30 = vsub.f32 %v239_v29, %v360_v55  ;;  %v258_v29 = vld [vmem:[%s10160_s1 + $0xe0] sm:$0xff]  ;;  %v259_v55 = vld [vmem:[%s10160_s1 + $0xe8] sm:$0xff] }
  0x2e   : > { %v477_v37 = vand.u32 4294901760, %v476_v6  ;;  %v484_v47 = vand.u32 4294901760, %v483_v7  ;;  %v8367_v48 = vpack.c.bf16 %v414_v13, %v411_v8  ;;  %v8369_v51 = vsub.f32 %v256_v56, %v411_v8  ;;  %v242_v8 = vld [vmem:[%s10160_s1 + $0x60] sm:$0xff] }
  0x2f   : > { %7242 = vmatprep.subr.bf16.mxu1 %v7241_v19  ;;  %v602_v52 = vsub.f32 %v8283_v63, %v10166_v11  ;;  %v609_v59 = vsub.f32 %v8304_v12, %v10165_v23  ;;  %v366_v2 = vand.u32 4294901760, %v241_v18  ;;  %v8384_v56 = vsub.f32 %v257_v57, %v414_v13 }
  0x30   : > { %v7243_v3 = vpack.c.bf16 %v484_v47, %v477_v37  ;;  %7222 = vmatprep.subr.bf16.mxu0 %v8367_v48  ;;  %v10169_v6 = vand.u32 4294901760, %v8308_v17  ;;  %v10172_v7 = vand.u32 4294901760, %v8322_v42  ;;  %v8398_v37 = vsub.f32 %v240_v1, %v363_v24 }
  0x31   : > { %v603_v19 = vand.u32 4294901760, %v602_v52  ;;  %v610_v23 = vand.u32 4294901760, %v609_v59  ;;  %v8396_v11 = vpack.c.bf16 %v366_v2, %v363_v24  ;;  %v417_v47 = vand.u32 4294901760, %v258_v29  ;;  %v243_v52 = vld [vmem:[%s10160_s1 + $0x68] sm:$0xff] }
  0x32   : > { %7244 = vmatpush3.bf16.msra.mxu1 %v7243_v3  ;;  %v490_v57 = vsub.f32 %v8308_v17, %v10169_v6  ;;  %v497_v13 = vsub.f32 %v8322_v42, %v10172_v7  ;;  %v420_v0 = vand.u32 4294901760, %v259_v55  ;;  %v10175_v1 = vand.u32 4294901760, %v8326_v50 }
  0x33   : > { %10299 = vst [vmem:[#allocation5_spill] sm:$0xff] %v8396_v11  ;;  %v7245_v59 = vpack.c.bf16 %v610_v23, %v603_v19  ;;  %7224 = vmatpush3.bf16.msra.mxu0 %v8396_v11  ;;  %v10174_v24 = vand.u32 4294901760, %v8341_v60  ;;  %v369_v3 = vand.u32 4294901760, %v242_v8  ;;  %v8412_v61 = vsub.f32 %v241_v18, %v366_v2  ;;  %v260_v18 = vld [vmem:[%s10160_s1 + $0xf0] sm:$0xff]  ;;  %v261_v2 = vld [vmem:[%s10160_s1 + $0xf8] sm:$0xff] }
  0x34   : > { %v491_v6 = vand.u32 4294901760, %v490_v57  ;;  %v498_v34 = vand.u32 4294901760, %v497_v13  ;;  %v8414_v33 = vpack.c.bf16 %v420_v0, %v417_v47  ;;  %v8417_v7 = vsub.f32 %v258_v29, %v417_v47 }
  0x35   : > { %7246 = vmatprep.subr.bf16.mxu1 %v7245_v59  ;;  %v616_v23 = vsub.f32 %v8326_v50, %v10175_v1  ;;  %v623_v19 = vsub.f32 %v8341_v60, %v10174_v24  ;;  %v372_v10 = vand.u32 4294901760, %v243_v52  ;;  %v8432_v29 = vsub.f32 %v259_v55, %v420_v0  ;;  %v244_v59 = vld [vmem:[%s10160_s1 + $0x70] sm:$0xff] }
  0x36   : > { %10300 = vst [vmem:[#allocation6_spill] sm:$0xff] %v8414_v33  ;;  %v7247_v57 = vpack.c.bf16 %v498_v34, %v491_v6  ;;  %7226 = vmatprep.subr.bf16.mxu0 %v8414_v33  ;;  %v10179_v13 = vand.u32 4294901760, %v8350_v5  ;;  %v10178_v47 = vand.u32 4294901760, %v8365_v30  ;;  %v8441_v54 = vsub.f32 %v242_v8, %v369_v3 }
  0x37   : > { %v617_v24 = vand.u32 4294901760, %v616_v23  ;;  %v624_v1 = vand.u32 4294901760, %v623_v19  ;;  %v8439_v9 = vpack.c.bf16 %v372_v10, %v369_v3  ;;  %v423_v55 = vand.u32 4294901760, %v260_v18  ;;  %v245_v23 = vld [vmem:[%s10160_s1 + $0x78] sm:$0xff] }
  0x38   : > { %7248 = vmatpush3.bf16.msra.mxu1 %v7247_v57  ;;  %v504_v34 = vsub.f32 %v8350_v5, %v10179_v13  ;;  %v511_v0 = vsub.f32 %v8365_v30, %v10178_v47  ;;  %v426_v6 = vand.u32 4294901760, %v261_v2  ;;  %v10187_v3 = vand.u32 4294901760, %v8369_v51 }
  0x39   : > { %10301 = vst [vmem:[#allocation7_spill] sm:$0xff] %v8439_v9  ;;  %v7249_v8 = vpack.c.bf16 %v624_v1, %v617_v24  ;;  %7228 = vmatpush3.bf16.msra.mxu0 %v8439_v9  ;;  %v10188_v19 = vand.u32 4294901760, %v8384_v56  ;;  %v375_v57 = vand.u32 4294901760, %v244_v59  ;;  %v8460_v47 = vsub.f32 %v243_v52, %v372_v10 }
  0x3a   : > { %v505_v13 = vand.u32 4294901760, %v504_v34  ;;  %v512_v53 = vand.u32 4294901760, %v511_v0  ;;  %v8462_v36 = vpack.c.bf16 %v426_v6, %v423_v55  ;;  %v8464_v35 = vsub.f32 %v260_v18, %v423_v55  ;;  %v223_v34 = vld [vmem:[%s8455_s9] sm:$0xff] }
  0x3b   : > { %7250 = vmatprep.subr.bf16.mxu1 %v7249_v8  ;;  %v630_v1 = vsub.f32 %v8369_v51, %v10187_v3  ;;  %v637_v24 = vsub.f32 %v8384_v56, %v10188_v19  ;;  %v378_v44 = vand.u32 4294901760, %v245_v23  ;;  %v8474_v10 = vsub.f32 %v261_v2, %v426_v6 }
  0x3c   : > { %10302 = vst [vmem:[#allocation8_spill] sm:$0xff] %v8462_v36  ;;  %v7251_v9 = vpack.c.bf16 %v512_v53, %v505_v13  ;;  %7230 = vmatprep.subr.bf16.mxu0 %v8462_v36  ;;  %v10189_v52 = vand.u32 4294901760, %v8398_v37  ;;  %v10190_v18 = vand.u32 4294901760, %v8412_v61  ;;  %v8481_v3 = vsub.f32 %v244_v59, %v375_v57 }
  0x3d   : > { %v631_v0 = vand.u32 4294901760, %v630_v1  ;;  %v638_v55 = vand.u32 4294901760, %v637_v24  ;;  %v8479_v8 = vpack.c.bf16 %v378_v44, %v375_v57  ;;  %v8489_v13 = vand.u32 4294901760, %v224_v41 }
  0x3e   : > { %7252 = vmatpush3.bf16.msra.mxu1 %v7251_v9  ;;  %v518_v53 = vsub.f32 %v8398_v37, %v10189_v52  ;;  %v525_v2 = vsub.f32 %v8412_v61, %v10190_v18  ;;  %v10193_v6 = vand.u32 4294901760, %v8417_v7  ;;  %v10199_v1 = vand.u32 4294901760, %v8432_v29 }
  0x3f   : > { %10303 = vst [vmem:[#allocation9_spill] sm:$0xff] %v8479_v8  ;;  %10304 = vst [vmem:[#allocation10_spill] sm:$0xff] %v8489_v13  ;;  %v7253_v19 = vpack.c.bf16 %v638_v55, %v631_v0  ;;  %7232 = vmatpush3.bf16.msra.mxu0 %v8479_v8  ;;  %v7265_v9 = vpack.c.bf16 %v8232_v32, %v8230_v31  ;;  %v8496_v59 = vand.u32 4294901760, %v223_v34  ;;  %669 = vmatprep.mubr.f32.mxu1 %v8489_v13  ;;  %vm3847_vm2 = vcmask 1043456  }
  0x40   : > { %v519_v57 = vand.u32 4294901760, %v518_v53  ;;  %v526_v24 = vand.u32 4294901760, %v525_v2  ;;  %v8499_v52 = vsub.f32 %v224_v41, %v8489_v13  ;;  %v644_v18 = vsub.f32 %v8417_v7, %v10193_v6 }
  0x41   : > { %7254 = vmatprep.subr.bf16.mxu1 %v7253_v19  ;;  %v651_v0 = vsub.f32 %v8432_v29, %v10199_v1  ;;  %7266 = vmatprep.subr.bf16.mxu0 %v7265_v9  ;;  %v8509_v55 = vsub.f32 %v223_v34, %v8496_v59  ;;  %v10198_v53 = vand.u32 4294901760, %v8441_v54  ;;  %v10200_v41 = vand.u32 4294901760, %v8460_v47 }
  0x42   : > { %v8513_v2 = vsub.f32 %v245_v23, %v378_v44  ;;  %v7255_v8 = vpack.c.bf16 %v526_v24, %v519_v57  ;;  %v10201_v6 = vand.u32 4294901760, %v8499_v52  ;;  %v645_v36 = vand.u32 4294901760, %v644_v18 }
  0x43   : > { %v652_v13 = vand.u32 4294901760, %v651_v0  ;;  %v436_v19 = vand.u32 4294901760, %v8509_v55  ;;  %v532_v9 = vsub.f32 %v8441_v54, %v10198_v53  ;;  %v539_v34 = vsub.f32 %v8460_v47, %v10200_v41 }
  0x44   : > { %7256 = vmatpush3.bf16.msra.mxu1 %v7255_v8  ;;  %v431_v44 = vsub.f32 %v8499_v52, %v10201_v6  ;;  %v7267_v23 = vpack.c.bf16 %v8210_v21, %v8200_v15  ;;  %v10206_v18 = vand.u32 4294901760, %v8464_v35  ;;  %v10209_v57 = vand.u32 4294901760, %v8474_v10 }
  0x45   : > { %v7257_v24 = vpack.c.bf16 %v652_v13, %v645_v36  ;;  %v437_v0 = vsub.f32 %v8509_v55, %v436_v19  ;;  %v533_v53 = vand.u32 4294901760, %v532_v9  ;;  %v540_v1 = vand.u32 4294901760, %v539_v34 }
  0x46   : > { %v432_v41 = vand.u32 4294901760, %v431_v44  ;;  %v658_v8 = vsub.f32 %v8464_v35, %v10206_v18  ;;  %v665_v6 = vsub.f32 %v8474_v10, %v10209_v57  ;;  %v10208_v33 = vand.u32 4294901760, %v8481_v3 }
  0x47   : > { %7258 = vmatprep.subr.bf16.mxu1 %v7257_v24  ;;  %v438_v11 = vand.u32 4294901760, %v437_v0  ;;  %v7259_v36 = vpack.c.bf16 %v540_v1, %v533_v53  ;;  %v7269_v13 = vpack.c.bf16 %v8223_v26, %v8221_v25  ;;  %v10207_v9 = vand.u32 4294901760, %v8513_v2 }
  0x48   : > { %433 = vmatprep.mubr.f32.mxu0 %v432_v41  ;;  %v659_v34 = vand.u32 4294901760, %v658_v8  ;;  %v666_v44 = vand.u32 4294901760, %v665_v6  ;;  %v546_v18 = vsub.f32 %v8481_v3, %v10208_v33  ;;  %v7271_v0 = vpack.c.bf16 %v8240_v38, %v8227_v28 }
  0x49   : > { %439 = vmatmul.mubr.f32.vlgmr.msra.gmra.mrb[0].mxu0 %v438_v11  ;;  %7260 = vmatpush3.bf16.msra.mxu1 %v7259_v36  ;;  %v553_v24 = vsub.f32 %v8513_v2, %v10207_v9  ;;  %v7273_v41 = vpack.c.bf16 %v8250_v43, %v8244_v40  ;;  %v7275_v11 = vpack.c.bf16 %v8279_v58, %v8255_v46  ;;  %v10306_v36 = vand.u32 4294901760, %v8232_v32 }
  0x4a   : > { %7268 = vmatpush3.bf16.msra.mxu0 %v7267_v23  ;;  %v7261_v1 = vpack.c.bf16 %v666_v44, %v659_v34  ;;  %v547_v53 = vand.u32 4294901760, %v546_v18  ;;  %806 = vmatprep.mubr.f32.mxu0 %v8499_v52  ;;  %v7277_v8 = vpack.c.bf16 %v8304_v12, %v8283_v63  ;;  %v10305_v18 = vand.u32 4294901760, %v8230_v31 }
  0x4b   : > { %7270 = vmatprep.subr.bf16.mxu0 %v7269_v13  ;;  %v554_v6 = vand.u32 4294901760, %v553_v24  ;;  %v10307_v44 = vand.u32 4294901760, %v8200_v15  ;;  %v10308_v13 = vand.u32 4294901760, %v8210_v21  ;;  %v10309_v9 = vand.u32 4294901760, %v8221_v25 }
  0x4c   : > { %7262 = vmatprep.subr.bf16.mxu1 %v7261_v1  ;;  %v7329_v34 = vpack.c.bf16 %v10306_v36, %v10305_v18  ;;  %v10310_v1 = vand.u32 4294901760, %v8223_v26  ;;  %v10311_v57 = vand.u32 4294901760, %v8227_v28  ;;  %v10313_v31 = vand.u32 4294901760, %v8244_v40 }
  0x4d   : > { %v7263_v23 = vpack.c.bf16 %v554_v6, %v547_v53  ;;  %v7331_v24 = vpack.c.bf16 %v10308_v13, %v10307_v44  ;;  %v10312_v53 = vand.u32 4294901760, %v8240_v38  ;;  %v10314_v32 = vand.u32 4294901760, %v8250_v43  ;;  %v10328_v13 = vld [vmem:[#allocation10_spill] sm:$0xff] }
  0x4e   : > { %v7333_v33 = vpack.c.bf16 %v10310_v1, %v10309_v9  ;;  %7272 = vmatpush3.bf16.msra.mxu0 %v7271_v0  ;;  %v10315_v15 = vand.u32 4294901760, %v8255_v46  ;;  %v10316_v21 = vand.u32 4294901760, %v8279_v58  ;;  %v10317_v25 = vand.u32 4294901760, %v8283_v63  ;;  %v279_v1 = vld [vmem:[%s10160_s1 + $0x188] sm:$0xff] }
  0x4f   : > { %v7335_v6 = vpack.c.bf16 %v10312_v53, %v10311_v57  ;;  %v7337_v18 = vpack.c.bf16 %v10314_v32, %v10313_v31  ;;  %v10318_v26 = vand.u32 4294901760, %v8304_v12  ;;  %7264 = vmatpush3.bf16.msra.mxu1 %v7263_v23  ;;  %7274 = vmatprep.subr.bf16.mxu0 %v7273_v41  ;;  %v10319_v28 = vand.u32 4294901760, %v8308_v17  ;;  %v262_v53 = vld [vmem:[%s10160_s1 + $0x100] sm:$0xff]  ;;  %v10330_v32 = vld [vmem:[#allocation8_spill] sm:$0xff] }
  0x50   : > { %v8582_v36 = vpack.c.bf16 %v10316_v21, %v10315_v15  ;;  %v10320_v38 = vand.u32 4294901760, %v8322_v42  ;;  %v10321_v43 = vand.u32 4294901760, %v8326_v50  ;;  %v10322_v46 = vand.u32 4294901760, %v8341_v60  ;;  %7298 = vmatprep.subr.bf16.mxu1 %v8198_v14  ;;  %v10329_v31 = vld [vmem:[#allocation7_spill] sm:$0xff] }
  0x51   : > { %v8588_v9 = vpack.c.bf16 %v10318_v26, %v10317_v25  ;;  %v10323_v63 = vand.u32 4294901760, %v8350_v5  ;;  %v10324_v12 = vand.u32 4294901760, %v8365_v30  ;;  %v7279_v0 = vpack.c.bf16 %v8322_v42, %v8308_v17  ;;  %v10331_v26 = vld [vmem:[#allocation9_spill] sm:$0xff] }
  0x52   : > { %v8594_v40 = vpack.c.bf16 %v10320_v38, %v10319_v28  ;;  %v8600_v58 = vpack.c.bf16 %v10322_v46, %v10321_v43  ;;  %671 = vmatmul.mubr.f32.vlgmr.msra.gmra.mrb[0].mxu1 %v8496_v59  ;;  %7276 = vmatpush3.bf16.msra.mxu0 %v7275_v11  ;;  %v7281_v41 = vpack.c.bf16 %v8341_v60, %v8326_v50  ;;  %v10325_v23 = vand.u32 4294901760, %v8499_v52  ;;  %v10326_v52 = vld [vmem:[#allocation5_spill] sm:$0xff]  ;;  %v10327_v11 = vld [vmem:[#allocation6_spill] sm:$0xff] }
  0x53   : > { %v8606_v57 = vpack.c.bf16 %v10324_v12, %v10323_v63  ;;  %7300 = vmatpush3.bf16.msra.mxu1 %v8208_v20  ;;  %7278 = vmatprep.subr.bf16.mxu0 %v7277_v8  ;;  %v7283_v44 = vpack.c.bf16 %v8365_v30, %v8350_v5  ;;  %v7285_v17 = vpack.c.bf16 %v8384_v56, %v8369_v51  ;;  %v278_v8 = vld [vmem:[%s10160_s1 + $0x180] sm:$0xff]  ;;  %v1246_v15 = vand.u32 4294901760, %v279_v1  ;;  %v280_v28 = vld [vmem:[%s10160_s1 + $0x190] sm:$0xff]  ;;  %v281_v38 = vld [vmem:[%s10160_s1 + $0x198] sm:$0xff] }
  0x54   : > { %7302 = vmatprep.subr.bf16.mxu1 %v8212_v22  ;;  %913 = vmatprep.mubr.f32.mxu1 %v10325_v23  ;;  %v7287_v42 = vpack.c.bf16 %v8412_v61, %v8398_v37  ;;  %v7289_v50 = vpack.c.bf16 %v8432_v29, %v8417_v7  ;;  %v7291_v60 = vpack.c.bf16 %v8460_v47, %v8441_v54  ;;  %v1195_v21 = vand.u32 4294901760, %v262_v53  ;;  %v264_v43 = vld [vmem:[%s10160_s1 + $0x110] sm:$0xff] }
  0x55   : > { %v7293_v5 = vpack.c.bf16 %v8474_v10, %v8464_v35  ;;  %v7295_v30 = vpack.c.bf16 %v8513_v2, %v8481_v3  ;;  %v10333_v12 = vand.u32 4294901760, %v8384_v56  ;;  %v1252_v23 = vand.u32 4294901760, %v281_v38 }
  0x56   : > { %7280 = vmatpush3.bf16.msra.mxu0 %v7279_v0  ;;  %v8676_v46 = vsub.f32 %v262_v53, %v1195_v21  ;;  %v1201_v56 = vand.u32 4294901760, %v264_v43  ;;  %vm3843_vm3 = vcmask 31744  }
  0x57   : > { %7304 = vmatpush3.bf16.msra.mxu1 %v8225_v27  ;;  %7282 = vmatprep.subr.bf16.mxu0 %v7281_v41  ;;  %v1249_v41 = vand.u32 4294901760, %v280_v28 }
  0x58   : > { %7306 = vmatprep.subr.bf16.mxu1 %v8242_v39 }
  0x59   : > { %v8741_v53 = vpack.c.bf16 %v1252_v23, %v1249_v41 }
  0x5a   : > { %7284 = vmatpush3.bf16.msra.mxu0 %v7283_v44  ;;  %v10334_v44 = vand.u32 4294901760, %v8398_v37 }
  0x5b   : > { %7308 = vmatpush3.bf16.msra.mxu1 %v8253_v45  ;;  %7286 = vmatprep.subr.bf16.mxu0 %v7285_v17  ;;  %v10335_v17 = vand.u32 4294901760, %v8412_v61  ;;  %v10338_v61 = vand.u32 4294901760, %v8441_v54  ;;  %v226_v54 = vld [vmem:[%s8455_s9 + $0x18] sm:$0xff]  ;;  %10344 = vst [vmem:[#allocation5_spill] sm:$0xff] %v8741_v53 }
  0x5c   : > { %7310 = vmatprep.subr.bf16.mxu1 %v8281_v62 }
  0x5e   : > { %7288 = vmatpush3.bf16.msra.mxu0 %v7287_v42 }
  0x5f   : > { %7312 = vmatpush3.bf16.msra.mxu1 %v8306_v16  ;;  %7290 = vmatprep.subr.bf16.mxu0 %v7289_v50  ;;  %v282_v50 = vld [vmem:[%s10160_s1 + $0x1a0] sm:$0xff] }
  0x60   : > { %7314 = vmatprep.subr.bf16.mxu1 %v8324_v49 }
  0x62   : > { %7292 = vmatpush3.bf16.msra.mxu0 %v7291_v60 }
  0x63   : > { %7316 = vmatpush3.bf16.msra.mxu1 %v8348_v4  ;;  %7294 = vmatprep.subr.bf16.mxu0 %v7293_v5  ;;  %v10342_v5 = vand.u32 4294901760, %v8481_v3  ;;  %v267_v3 = vld [vmem:[%s10160_s1 + $0x128] sm:$0xff] }
  0x64   : > { %7318 = vmatprep.subr.bf16.mxu1 %v8367_v48 }
  0x66   : > { %7296 = vmatpush3.bf16.msra.mxu0 %v7295_v30  ;;  %v10343_v30 = vand.u32 4294901760, %v8513_v2 }
  0x67   : > { %7320 = vmatpush3.bf16.msra.mxu1 %v10326_v52  ;;  %7330 = vmatprep.subr.bf16.mxu0 %v7329_v34  ;;  %v263_v34 = vld [vmem:[%s10160_s1 + $0x108] sm:$0xff] }
  0x68   : > { %7322 = vmatprep.subr.bf16.mxu1 %v10327_v11  ;;  %v1198_v25 = vand.u32 4294901760, %v263_v34 }
  0x69   : > { %809 = vmatmul.mubr.f32.vlgmr.msra.gmra.mrb[2].mxu0 %v8509_v55  ;;  %v7351_v55 = vpack.c.bf16 %v10335_v17, %v10334_v44  ;;  %v8751_v44 = vand.u32 4294901760, %v226_v54 }
  0x6a   : > { %7332 = vmatpush3.bf16.msra.mxu0 %v7331_v24  ;;  %1083 = vmatprep.mubr.f32.mxu0 %v10328_v13  ;;  %v1243_v24 = vand.u32 4294901760, %v278_v8  ;;  %v8678_v63 = vsub.f32 %v263_v34, %v1198_v25  ;;  %v1255_v34 = vand.u32 4294901760, %v282_v50 }
  0x6b   : > { %7324 = vmatpush3.bf16.msra.mxu1 %v10329_v31  ;;  %7334 = vmatprep.subr.bf16.mxu0 %v7333_v33  ;;  %10346 = vst [vmem:[#allocation10_spill] sm:$0xff] %v8751_v44 }
  0x6c   : > { %7326 = vmatprep.subr.bf16.mxu1 %v10330_v32  ;;  %v8666_v33 = vsub.f32 %v278_v8, %v1243_v24  ;;  %v8722_v8 = vpack.c.bf16 %v10343_v30, %v10342_v5  ;;  %v10217_v2 = vand.u32 4294901760, %v8678_v63  ;;  %v8779_v17 = vsub.f32 %v282_v50, %v1255_v34  ;;  %v269_v50 = vld [vmem:[%s10160_s1 + $0x138] sm:$0xff] }
  0x6e   : > { %7336 = vmatpush3.bf16.msra.mxu0 %v7335_v6  ;;  %v265_v6 = vld [vmem:[%s10160_s1 + $0x118] sm:$0xff] }
  0x6f   : > { %7328 = vmatpush3.bf16.msra.mxu1 %v10331_v26  ;;  %7338 = vmatprep.subr.bf16.mxu0 %v7337_v18  ;;  %v8674_v18 = vsub.f32 %v279_v1, %v1246_v15  ;;  %v1204_v42 = vand.u32 4294901760, %v265_v6 }
  0x70   : > { %7362 = vmatprep.subr.bf16.mxu1 %v8198_v14  ;;  %v10332_v14 = vand.u32 4294901760, %v8369_v51 }
  0x71   : > { %v10219_v1 = vand.u32 4294901760, %v8674_v18 }
  0x72   : > { %917 = vmatmul.mubr.f32.vlgmr.msra.gmra.mrb[2].mxu1 %v436_v19  ;;  %7340 = vmatpush3.bf16.msra.mxu0 %v8582_v36  ;;  %v7349_v0 = vpack.c.bf16 %v10333_v12, %v10332_v14  ;;  %v10336_v19 = vand.u32 4294901760, %v8417_v7  ;;  %v10337_v36 = vand.u32 4294901760, %v8432_v29  ;;  %v10339_v7 = vand.u32 4294901760, %v8460_v47 }
  0x73   : > { %7364 = vmatpush3.bf16.msra.mxu1 %v8208_v20  ;;  %7342 = vmatprep.subr.bf16.mxu0 %v8588_v9  ;;  %v283_v20 = vld [vmem:[%s10160_s1 + $0x1a8] sm:$0xff]  ;;  %v10340_v29 = vand.u32 4294901760, %v8464_v35  ;;  %v10341_v9 = vand.u32 4294901760, %v8474_v10  ;;  %v8727_v47 = vpack.c.bf16 %v1246_v15, %v1243_v24  ;;  %v266_v35 = vld [vmem:[%s10160_s1 + $0x120] sm:$0xff]  ;;  %v10218_v10 = vand.u32 4294901760, %v8676_v46 }
  0x74   : > { %v8697_v51 = vpack.c.bf16 %v10337_v36, %v10336_v19  ;;  %7366 = vmatprep.subr.bf16.mxu1 %v8212_v22  ;;  %v8710_v37 = vpack.c.bf16 %v10339_v7, %v10338_v61  ;;  %1187 = vmatprep.mubr.f32.mxu1 %v10328_v13  ;;  %v10222_v22 = vand.u32 4294901760, %v8666_v33  ;;  %v8739_v13 = vpack.c.bf16 %v1198_v25, %v1195_v21 }
  0x75   : > { %v8716_v60 = vpack.c.bf16 %v10341_v9, %v10340_v29  ;;  %v1258_v24 = vand.u32 4294901760, %v283_v20  ;;  %v8745_v15 = vsub.f32 %v280_v28, %v1249_v41  ;;  %v8747_v14 = vsub.f32 %v281_v38, %v1252_v23  ;;  %v285_v28 = vld [vmem:[%s10160_s1 + $0x1b8] sm:$0xff] }
  0x76   : > { %7344 = vmatpush3.bf16.msra.mxu0 %v8594_v40  ;;  %v8749_v12 = vpack.c.bf16 %v1204_v42, %v1201_v56  ;;  %v8754_v40 = vsub.f32 %v264_v43, %v1201_v56  ;;  %v1422_v21 = vsub.f32 %v8666_v33, %v10222_v22  ;;  %v1207_v25 = vand.u32 4294901760, %v266_v35 }
  0x77   : > { %7368 = vmatpush3.bf16.msra.mxu1 %v8225_v27  ;;  %7346 = vmatprep.subr.bf16.mxu0 %v8600_v58  ;;  %v1210_v27 = vand.u32 4294901760, %v267_v3  ;;  %v284_v58 = vld [vmem:[%s10160_s1 + $0x1b0] sm:$0xff]  ;;  %v8765_v38 = vsub.f32 %v265_v6, %v1204_v42  ;;  %v1310_v43 = vsub.f32 %v8676_v46, %v10218_v10  ;;  %v1317_v41 = vsub.f32 %v8678_v63, %v10217_v2 }
  0x78   : > { %10345 = vst [vmem:[#allocation6_spill] sm:$0xff] %v8749_v12  ;;  %7370 = vmatprep.subr.bf16.mxu1 %v8242_v39  ;;  %v1429_v39 = vsub.f32 %v8674_v18, %v10219_v1  ;;  %v8777_v23 = vpack.c.bf16 %v1258_v24, %v1255_v34  ;;  %v8781_v6 = vsub.f32 %v283_v20, %v1258_v24  ;;  %v1261_v36 = vand.u32 4294901760, %v284_v58 }
  0x79   : > { %v8784_v19 = vsub.f32 %v226_v54, %v8751_v44  ;;  %v1264_v56 = vand.u32 4294901760, %v285_v28  ;;  %v10213_v42 = vand.u32 4294901760, %v8745_v15  ;;  %v10212_v61 = vand.u32 4294901760, %v8747_v14 }
  0x7a   : > { %7348 = vmatpush3.bf16.msra.mxu0 %v8606_v57  ;;  %10347 = vst [vmem:[#allocation7_spill] sm:$0xff] %v8777_v23  ;;  %v268_v57 = vld [vmem:[%s10160_s1 + $0x130] sm:$0xff]  ;;  %v1423_v20 = vand.u32 4294901760, %v1422_v21  ;;  %v8796_v7 = vpack.c.bf16 %v1210_v27, %v1207_v25  ;;  %v1430_v29 = vand.u32 4294901760, %v1429_v39  ;;  %v1311_v9 = vand.u32 4294901760, %v1310_v43 }
  0x7b   : > { %7372 = vmatpush3.bf16.msra.mxu1 %v8253_v45  ;;  %7350 = vmatprep.subr.bf16.mxu0 %v7349_v0  ;;  %v8798_v45 = vsub.f32 %v266_v35, %v1207_v25  ;;  %v8800_v0 = vsub.f32 %v267_v3, %v1210_v27  ;;  %v1318_v5 = vand.u32 4294901760, %v1317_v41  ;;  %v10210_v30 = vand.u32 4294901760, %v8754_v40 }
  0x7c   : > { %7374 = vmatprep.subr.bf16.mxu1 %v8281_v62  ;;  %10348 = vst [vmem:[#allocation8_spill] sm:$0xff] %v8796_v7  ;;  %v1213_v54 = vand.u32 4294901760, %v268_v57  ;;  %v1216_v34 = vand.u32 4294901760, %v269_v50  ;;  %v10211_v24 = vand.u32 4294901760, %v8765_v38  ;;  %v286_v62 = vld [vmem:[%s10160_s1 + $0x1c0] sm:$0xff]  ;;  %v10223_v21 = vand.u32 4294901760, %v8784_v19 }
  0x7d   : > { %v8810_v35 = vpack.c.bf16 %v1264_v56, %v1261_v36  ;;  %v1443_v3 = vsub.f32 %v8747_v14, %v10212_v61  ;;  %v8819_v25 = vsub.f32 %v284_v58, %v1261_v36  ;;  %v8821_v27 = vsub.f32 %v285_v28, %v1264_v56 }
  0x7e   : > { %7352 = vmatpush3.bf16.msra.mxu0 %v7351_v55  ;;  %v1436_v55 = vsub.f32 %v8745_v15, %v10213_v42  ;;  %v10214_v39 = vand.u32 4294901760, %v8781_v6  ;;  %v8828_v43 = vpack.c.bf16 %v1430_v29, %v1423_v20  ;;  %v8830_v41 = vpack.c.bf16 %v1318_v5, %v1311_v9  ;;  %v271_v42 = vld [vmem:[%s10160_s1 + $0x148] sm:$0xff] }
  0x7f   : > { %7376 = vmatpush3.bf16.msra.mxu1 %v8306_v16  ;;  %7354 = vmatprep.subr.bf16.mxu0 %v8697_v51  ;;  %10349 = vst [vmem:[#allocation9_spill] sm:$0xff] %v8810_v35  ;;  %v287_v16 = vld [vmem:[%s10160_s1 + $0x1c8] sm:$0xff]  ;;  %v10216_v51 = vand.u32 4294901760, %v8779_v17  ;;  %v1267_v58 = vand.u32 4294901760, %v286_v62  ;;  %v8836_v28 = vpack.c.bf16 %v1216_v34, %v1213_v54  ;;  %v1331_v36 = vsub.f32 %v8765_v38, %v10211_v24 }
  0x80   : > { %7378 = vmatprep.subr.bf16.mxu1 %v8324_v49  ;;  %v1324_v49 = vsub.f32 %v8754_v40, %v10210_v30  ;;  %v10215_v56 = vand.u32 4294901760, %v8798_v45  ;;  %v1293_v20 = vsub.f32 %v8784_v19, %v10223_v21  ;;  %v1437_v29 = vand.u32 4294901760, %v1436_v55 }
  0x81   : > { %10350 = vst [vmem:[#allocation11_spill] sm:$0xff] %v8836_v28  ;;  %v1444_v9 = vand.u32 4294901760, %v1443_v3  ;;  %v1270_v5 = vand.u32 4294901760, %v287_v16  ;;  %v10220_v30 = vand.u32 4294901760, %v8800_v0  ;;  %v8852_v24 = vsub.f32 %v268_v57, %v1213_v54 }
  0x82   : > { %7356 = vmatpush3.bf16.msra.mxu0 %v8710_v37  ;;  %v270_v37 = vld [vmem:[%s10160_s1 + $0x140] sm:$0xff]  ;;  %v8854_v61 = vsub.f32 %v269_v50, %v1216_v34  ;;  %v1325_v55 = vand.u32 4294901760, %v1324_v49  ;;  %v8862_v3 = vsub.f32 %v286_v62, %v1267_v58  ;;  %v10224_v57 = vand.u32 4294901760, %v8821_v27  ;;  %v288_v62 = vld [vmem:[%s10160_s1 + $0x1d0] sm:$0xff]  ;;  %v289_v49 = vld [vmem:[%s10160_s1 + $0x1d8] sm:$0xff] }
  0x83   : > { %7380 = vmatpush3.bf16.msra.mxu1 %v8348_v4  ;;  %7358 = vmatprep.subr.bf16.mxu0 %v8716_v60  ;;  %v1450_v4 = vsub.f32 %v8779_v17, %v10216_v51  ;;  %v1457_v60 = vsub.f32 %v8781_v6, %v10214_v39  ;;  %v1332_v50 = vand.u32 4294901760, %v1331_v36  ;;  %v1219_v54 = vand.u32 4294901760, %v270_v37 }
  0x84   : > { %7382 = vmatprep.subr.bf16.mxu1 %v8367_v48  ;;  %v10221_v48 = vand.u32 4294901760, %v8819_v25  ;;  %v1338_v34 = vsub.f32 %v8798_v45, %v10215_v56  ;;  %v1294_v39 = vand.u32 4294901760, %v1293_v20  ;;  %v8883_v36 = vpack.c.bf16 %v1270_v5, %v1267_v58  ;;  %v273_v58 = vld [vmem:[%s10160_s1 + $0x158] sm:$0xff] }
  0x85   : > { %v1345_v56 = vsub.f32 %v8800_v0, %v10220_v30  ;;  %v8889_v51 = vsub.f32 %v287_v16, %v1270_v5  ;;  %v1451_v2 = vand.u32 4294901760, %v1450_v4  ;;  %v1458_v10 = vand.u32 4294901760, %v1457_v60 }
  0x86   : > { %7360 = vmatpush3.bf16.msra.mxu0 %v8722_v8  ;;  %v8881_v8 = vpack.c.bf16 %v1444_v9, %v1437_v29  ;;  %10351 = vst [vmem:[#allocation12_spill] sm:$0xff] %v8883_v36  ;;  %v1222_v1 = vand.u32 4294901760, %v271_v42  ;;  %v1273_v20 = vand.u32 4294901760, %v288_v62  ;;  %v1276_v29 = vand.u32 4294901760, %v289_v49 }
  0x87   : > { %7384 = vmatpush3.bf16.msra.mxu1 %v10326_v52  ;;  %7394 = vmatprep.subr.bf16.mxu0 %v8727_v47  ;;  %v272_v52 = vld [vmem:[%s10160_s1 + $0x150] sm:$0xff]  ;;  %v1471_v16 = vsub.f32 %v8821_v27, %v10224_v57  ;;  %v8905_v9 = vpack.c.bf16 %v1332_v50, %v1325_v55  ;;  %v8907_v5 = vsub.f32 %v270_v37, %v1219_v54  ;;  %v1339_v4 = vand.u32 4294901760, %v1338_v34  ;;  %v290_v55 = vld [vmem:[%s10160_s1 + $0x1e0] sm:$0xff] }
  0x88   : > { %7386 = vmatprep.subr.bf16.mxu1 %v10327_v11  ;;  %v1464_v11 = vsub.f32 %v8819_v25, %v10221_v48  ;;  %v1346_v30 = vand.u32 4294901760, %v1345_v56  ;;  %v1225_v48 = vand.u32 4294901760, %v272_v52  ;;  %v1228_v22 = vand.u32 4294901760, %v273_v58 }
  0x89   : > { %1085 = vmatmul.mubr.f32.vlgmr.msra.gmra.mrb[4].mxu0 %v8496_v59  ;;  %v8917_v37 = vpack.c.bf16 %v1458_v10, %v1451_v2  ;;  %v8919_v50 = vpack.c.bf16 %v1222_v1, %v1219_v54  ;;  %v10225_v56 = vand.u32 4294901760, %v8862_v3  ;;  %v8927_v34 = vpack.c.bf16 %v1276_v29, %v1273_v20 }
  0x8a   : > { %7396 = vmatpush3.bf16.msra.mxu0 %v8739_v13  ;;  %1295 = vmatprep.mubr.f32.mxu0 %v1294_v39  ;;  %v8921_v39 = vsub.f32 %v271_v42, %v1222_v1  ;;  %v1465_v57 = vand.u32 4294901760, %v1464_v11  ;;  %v1472_v21 = vand.u32 4294901760, %v1471_v16  ;;  %v8936_v1 = vsub.f32 %v288_v62, %v1273_v20 }
  0x8b   : > { %7388 = vmatpush3.bf16.msra.mxu1 %v10329_v31  ;;  %7398 = vmatprep.subr.bf16.mxu0 %v8741_v53  ;;  %v291_v31 = vld [vmem:[%s10160_s1 + $0x1e8] sm:$0xff]  ;;  %10353 = vst [vmem:[#allocation14_spill] sm:$0xff] %v8927_v34  ;;  %v8938_v10 = vsub.f32 %v289_v49, %v1276_v29  ;;  %v10356_v2 = vand.u32 4294901760, %v8852_v24  ;;  %v1279_v54 = vand.u32 4294901760, %v290_v55  ;;  %v8945_v11 = vpack.c.bf16 %v1346_v30, %v1339_v4 }
  0x8c   : > { %7390 = vmatprep.subr.bf16.mxu1 %v10330_v32  ;;  %10352 = vst [vmem:[#allocation13_spill] sm:$0xff] %v8921_v39  ;;  %v8933_v32 = vld [vmem:[%s10160_s1 + $0x160] sm:$0xff]  ;;  %10354 = vst [vmem:[#allocation15_spill] sm:$0xff] %v8936_v1  ;;  %v8947_v16 = vpack.c.bf16 %v1228_v22, %v1225_v48  ;;  %v10357_v60 = vand.u32 4294901760, %v8854_v61  ;;  %v1282_v20 = vand.u32 4294901760, %v291_v31  ;;  %v8953_v49 = vsub.f32 %v272_v52, %v1225_v48  ;;  %v8963_v30 = vld [vmem:[%s10160_s1 + $0x168] sm:$0xff] }
  0x8d   : > { %10355 = vst [vmem:[#allocation16_spill] sm:$0xff] %v8938_v10  ;;  %v1352_v42 = vsub.f32 %v8852_v24, %v10356_v2  ;;  %v8955_v29 = vsub.f32 %v273_v58, %v1228_v22  ;;  %v10358_v2 = vand.u32 4294901760, %v8889_v51  ;;  %v8974_v52 = vld [vmem:[%s10160_s1 + $0x1f0] sm:$0xff]  ;;  %v8979_v58 = vld [vmem:[%s10160_s1 + $0x1f8] sm:$0xff]  ;;  %v10363_v53 = vand.u32 4294901760, %v8938_v10 }
  0x8e   : > { %7400 = vmatpush3.bf16.msra.mxu0 %v8749_v12  ;;  %v1359_v62 = vsub.f32 %v8854_v61, %v10357_v60  ;;  %v7437_v60 = vpack.c.bf16 %v1472_v21, %v1465_v57  ;;  %v8983_v57 = vsub.f32 %v290_v55, %v1279_v54  ;;  %v225_v48 = vld [vmem:[%s8455_s9 + $0x10] sm:$0xff]  ;;  %v8990_v4 = vpack.c.bf16 %v1282_v20, %v1279_v54 }
  0x8f   : > { %7392 = vmatpush3.bf16.msra.mxu1 %v10331_v26  ;;  %7402 = vmatprep.subr.bf16.mxu0 %v8777_v23  ;;  %v1478_v26 = vsub.f32 %v8862_v3, %v10225_v56  ;;  %v1353_v21 = vand.u32 4294901760, %v1352_v42  ;;  %v8992_v23 = vsub.f32 %v291_v31, %v1282_v20  ;;  %v10359_v42 = vand.u32 4294901760, %v8933_v32  ;;  %v9006_v54 = vld [vmem:[%s10160_s1 + $0x170] sm:$0xff]  ;;  %v9011_v31 = vld [vmem:[%s10160_s1 + $0x178] sm:$0xff] }
  0x90   : > { %7426 = vmatprep.subr.bf16.mxu1 %v8828_v43  ;;  %v1485_v43 = vsub.f32 %v8889_v51, %v10358_v2  ;;  %v1360_v22 = vand.u32 4294901760, %v1359_v62  ;;  %v1285_v56 = vand.u32 4294901760, %v8974_v52  ;;  %v10360_v62 = vand.u32 4294901760, %v8907_v5 }
  0x91   : > { %v1479_v55 = vand.u32 4294901760, %v1478_v26  ;;  %v8999_v2 = vsub.f32 %v8933_v32, %v10359_v42  ;;  %v10361_v26 = vand.u32 4294901760, %v8921_v39 }
  0x92   : > { %1189 = vmatmul.mubr.f32.vlgmr.msra.gmra.mrb[4].mxu1 %v8496_v59  ;;  %7404 = vmatpush3.bf16.msra.mxu0 %v8796_v7  ;;  %v1234_v59 = vand.u32 4294901760, %v8963_v30  ;;  %v1366_v20 = vsub.f32 %v8907_v5, %v10360_v62  ;;  %v10362_v7 = vand.u32 4294901760, %v8936_v1  ;;  %v10250_v62 = vand.u32 4294901760, %v8992_v23 }
  0x93   : > { %7428 = vmatpush3.bf16.msra.mxu1 %v8830_v41  ;;  %7406 = vmatprep.subr.bf16.mxu0 %v8810_v35  ;;  %v1288_v41 = vand.u32 4294901760, %v8979_v58  ;;  %v1373_v42 = vsub.f32 %v8921_v39, %v10361_v26  ;;  %v9020_v35 = vand.u32 4294901760, %v225_v48  ;;  %v7439_v26 = vpack.c.bf16 %v1360_v22, %v1353_v21 }
  0x94   : > { %7430 = vmatprep.subr.bf16.mxu1 %v8881_v8  ;;  %1531 = vmatprep.mubr.f32.mxu1 %v8751_v44  ;;  %v1486_v8 = vand.u32 4294901760, %v1485_v43  ;;  %v1492_v12 = vsub.f32 %v8936_v1, %v10362_v7  ;;  %v1499_v43 = vsub.f32 %v8938_v10, %v10363_v53  ;;  %v9034_v39 = vsub.f32 %v8963_v30, %v1234_v59 }
  0x95   : > { %v1240_v7 = vand.u32 4294901760, %v9011_v31  ;;  %v9040_v53 = vsub.f32 %v8974_v52, %v1285_v56  ;;  %v9043_v44 = vsub.f32 %v8979_v58, %v1288_v41  ;;  %v1367_v21 = vand.u32 4294901760, %v1366_v20 }
  0x96   : > { %7408 = vmatpush3.bf16.msra.mxu0 %v8836_v28  ;;  %v1237_v28 = vand.u32 4294901760, %v9006_v54  ;;  %v7441_v22 = vpack.c.bf16 %v1486_v8, %v1479_v55  ;;  %v1374_v30 = vand.u32 4294901760, %v1373_v42  ;;  %v1493_v10 = vand.u32 4294901760, %v1492_v12 }
  0x97   : > { %7432 = vmatpush3.bf16.msra.mxu1 %v8905_v9  ;;  %7410 = vmatprep.subr.bf16.mxu0 %v8883_v36  ;;  %v9048_v36 = vsub.f32 %v225_v48, %v9020_v35  ;;  %v10364_v52 = vand.u32 4294901760, %v8953_v49  ;;  %v10365_v58 = vand.u32 4294901760, %v8955_v29  ;;  %v9063_v48 = vsub.f32 %v9011_v31, %v1240_v7 }
  0x98   : > { %7434 = vmatprep.subr.bf16.mxu1 %v8917_v37  ;;  %v1500_v37 = vand.u32 4294901760, %v1499_v43  ;;  %v9060_v55 = vsub.f32 %v9006_v54, %v1237_v28  ;;  %v10366_v20 = vand.u32 4294901760, %v8983_v57  ;;  %v1519_v43 = vand.u32 4294901760, %v9040_v53 }
  0x99   : > { %v1380_v1 = vsub.f32 %v8953_v49, %v10364_v52  ;;  %v1387_v9 = vsub.f32 %v8955_v29, %v10365_v58  ;;  %v10367_v31 = vand.u32 4294901760, %v8933_v32  ;;  %v9079_v58 = vpack.c.bf16 %v1288_v41, %v1285_v56 }
  0x9a   : > { %7412 = vmatpush3.bf16.msra.mxu0 %v8919_v50  ;;  %v1506_v42 = vsub.f32 %v8983_v57, %v10366_v20  ;;  %v7443_v8 = vpack.c.bf16 %v1374_v30, %v1367_v21  ;;  %v7445_v20 = vpack.c.bf16 %v1500_v37, %v1493_v10  ;;  %v10369_v32 = vand.u32 4294901760, %v9034_v39 }
  0x9b   : > { %7436 = vmatpush3.bf16.msra.mxu1 %v8945_v11  ;;  %7414 = vmatprep.subr.bf16.mxu0 %v8927_v34  ;;  %v1513_v11 = vsub.f32 %v8992_v23, %v10250_v62  ;;  %v9077_v52 = vpack.c.bf16 %v1234_v59, %v10367_v31  ;;  %v1381_v12 = vand.u32 4294901760, %v1380_v1  ;;  %v1388_v34 = vand.u32 4294901760, %v1387_v9 }
  0x9c   : > { %7438 = vmatprep.subr.bf16.mxu1 %v7437_v60  ;;  %v1298_v60 = vand.u32 4294901760, %v9048_v36  ;;  %v10368_v62 = vand.u32 4294901760, %v8999_v2  ;;  %v1401_v56 = vsub.f32 %v9034_v39, %v10369_v32  ;;  %v10251_v59 = vand.u32 4294901760, %v9060_v55 }
  0x9d   : > { %v10252_v41 = vand.u32 4294901760, %v9063_v48  ;;  %v1507_v21 = vand.u32 4294901760, %v1506_v42  ;;  %v1514_v10 = vand.u32 4294901760, %v1513_v11  ;;  %v1520_v1 = vsub.f32 %v9040_v53, %v1519_v43 }
  0x9e   : > { %7416 = vmatpush3.bf16.msra.mxu0 %v8947_v16  ;;  %v1394_v54 = vsub.f32 %v8999_v2, %v10368_v62  ;;  %v1299_v62 = vsub.f32 %v9048_v36, %v1298_v60  ;;  %v9102_v30 = vpack.c.bf16 %v1240_v7, %v1237_v28  ;;  %v7447_v37 = vpack.c.bf16 %v1388_v34, %v1381_v12 }
  0x9f   : > { %7440 = vmatpush3.bf16.msra.mxu1 %v7439_v26  ;;  %7418 = vmatprep.subr.bf16.mxu0 %v8990_v4  ;;  %v10370_v26 = vand.u32 4294901760, %v9043_v44  ;;  %v1402_v11 = vand.u32 4294901760, %v1401_v56  ;;  %v1408_v31 = vsub.f32 %v9060_v55, %v10251_v59  ;;  %v1415_v32 = vsub.f32 %v9063_v48, %v10252_v41 }
  0xa0   : > { %7442 = vmatprep.subr.bf16.mxu1 %v7441_v22  ;;  %v7457_v22 = vpack.c.bf16 %v8674_v18, %v8666_v33  ;;  %v1395_v42 = vand.u32 4294901760, %v1394_v54  ;;  %v7449_v28 = vpack.c.bf16 %v1514_v10, %v1507_v21  ;;  %v1521_v7 = vand.u32 4294901760, %v1520_v1 }
  0xa1   : > { %v1527_v9 = vsub.f32 %v9043_v44, %v10370_v26  ;;  %v1300_v12 = vand.u32 4294901760, %v1299_v62  ;;  %v7461_v56 = vpack.c.bf16 %v8747_v14, %v8745_v15  ;;  %v1409_v26 = vand.u32 4294901760, %v1408_v31  ;;  %v10371_v62 = vld [vmem:[#allocation5_spill] sm:$0xff]  ;;  %v10375_v31 = vld [vmem:[#allocation15_spill] sm:$0xff] }
  0xa2   : > { %7420 = vmatpush3.bf16.msra.mxu0 %v9077_v52  ;;  %v7451_v54 = vpack.c.bf16 %v1402_v11, %v1395_v42  ;;  %v1416_v59 = vand.u32 4294901760, %v1415_v32  ;;  %v7465_v10 = vpack.c.bf16 %v8781_v6, %v8779_v17  ;;  %v7467_v1 = vpack.c.bf16 %v8800_v0, %v8798_v45  ;;  %v10374_v11 = vld [vmem:[#allocation6_spill] sm:$0xff]  ;;  %v10376_v32 = vld [vmem:[#allocation16_spill] sm:$0xff] }
  0xa3   : > { %7444 = vmatpush3.bf16.msra.mxu1 %v7443_v8  ;;  %7422 = vmatprep.subr.bf16.mxu0 %v9079_v58  ;;  %v1528_v34 = vand.u32 4294901760, %v1527_v9  ;;  %v7459_v8 = vpack.c.bf16 %v8678_v63, %v8676_v46  ;;  %v7469_v9 = vpack.c.bf16 %v8821_v27, %v8819_v25 }
  0xa4   : > { %7446 = vmatprep.subr.bf16.mxu1 %v7445_v20  ;;  %v7463_v20 = vpack.c.bf16 %v8765_v38, %v8754_v40  ;;  %v7455_v21 = vpack.c.bf16 %v1416_v59, %v1409_v26  ;;  %v7471_v59 = vpack.c.bf16 %v8854_v61, %v8852_v24  ;;  %v7485_v26 = vpack.c.bf16 %v9043_v44, %v9040_v53 }
  0xa5   : > { %v7453_v41 = vpack.c.bf16 %v1528_v34, %v1521_v7  ;;  %v10377_v7 = vld [vmem:[#allocation7_spill] sm:$0xff]  ;;  %v7479_v34 = vpack.c.bf16 %v8955_v29, %v8953_v49 }
  0xa6   : > { %7424 = vmatpush3.bf16.msra.mxu0 %v9102_v30 }
  0xa7   : > { %7448 = vmatpush3.bf16.msra.mxu1 %v7447_v37  ;;  %7458 = vmatprep.subr.bf16.mxu0 %v7457_v22  ;;  %v10372_v37 = vand.u32 4294901760, %v8784_v19  ;;  %v10373_v22 = vld [vmem:[#allocation13_spill] sm:$0xff] }
  0xa8   : > { %7450 = vmatprep.subr.bf16.mxu1 %v7449_v28  ;;  %v7475_v42 = vpack.c.bf16 %v10373_v22, %v8907_v5  ;;  %v7477_v28 = vpack.c.bf16 %v10376_v32, %v10375_v31 }
  0xa9   : > { %1301 = vmatmul.mubr.f32.vlgmr.msra.gmra.mrb[6].mxu0 %v1300_v12  ;;  %v10378_v12 = vld [vmem:[#allocation8_spill] sm:$0xff] }
  0xaa   : > { %7460 = vmatpush3.bf16.msra.mxu0 %v7459_v8  ;;  %1668 = vmatprep.mubr.f32.mxu0 %v8784_v19  ;;  %v7481_v19 = vpack.c.bf16 %v8992_v23, %v8983_v57  ;;  %v10379_v8 = vld [vmem:[#allocation9_spill] sm:$0xff] }
  0xab   : > { %7452 = vmatpush3.bf16.msra.mxu1 %v7451_v54  ;;  %7462 = vmatprep.subr.bf16.mxu0 %v7461_v56  ;;  %v7483_v54 = vpack.c.bf16 %v9034_v39, %v8999_v2  ;;  %v10380_v56 = vld [vmem:[#allocation11_spill] sm:$0xff] }
  0xac   : > { %7454 = vmatprep.subr.bf16.mxu1 %v7453_v41  ;;  %v7473_v41 = vpack.c.bf16 %v8889_v51, %v8862_v3 }
  0xae   : > { %7464 = vmatpush3.bf16.msra.mxu0 %v7463_v20  ;;  %v10381_v20 = vld [vmem:[#allocation12_spill] sm:$0xff] }
  0xaf   : > { %7456 = vmatpush3.bf16.msra.mxu1 %v7455_v21  ;;  %7466 = vmatprep.subr.bf16.mxu0 %v7465_v10  ;;  %v7487_v21 = vpack.c.bf16 %v9063_v48, %v9060_v55  ;;  %v10382_v10 = vand.u32 4294901760, %v8666_v33  ;;  %v310_v33 = vld [vmem:[%s10160_s1 + $0x280] sm:$0xff] }
  0xb0   : > { %7490 = vmatprep.subr.bf16.mxu1 %v8727_v47 }
  0xb2   : > { %1533 = vmatmul.mubr.f32.vlgmr.msra.gmra.mrb[6].mxu1 %v9020_v35  ;;  %7468 = vmatpush3.bf16.msra.mxu0 %v7467_v1  ;;  %v10383_v1 = vand.u32 4294901760, %v8674_v18  ;;  %v10389_v18 = vand.u32 4294901760, %v8754_v40  ;;  %v2105_v40 = vand.u32 4294901760, %v310_v33 }
  0xb3   : > { %7492 = vmatpush3.bf16.msra.mxu1 %v8739_v13  ;;  %7470 = vmatprep.subr.bf16.mxu0 %v7469_v9 }
  0xb4   : > { %7494 = vmatprep.subr.bf16.mxu1 %v10371_v62  ;;  %1775 = vmatprep.mubr.f32.mxu1 %v10372_v37  ;;  %v7521_v9 = vpack.c.bf16 %v10383_v1, %v10382_v10  ;;  %v10386_v37 = vand.u32 4294901760, %v8678_v63  ;;  %v295_v10 = vld [vmem:[%s10160_s1 + $0x208] sm:$0xff] }
  0xb6   : > { %7472 = vmatpush3.bf16.msra.mxu0 %v7471_v59  ;;  %v10384_v59 = vld [vmem:[#allocation14_spill] sm:$0xff] }
  0xb7   : > { %7496 = vmatpush3.bf16.msra.mxu1 %v10374_v11  ;;  %7474 = vmatprep.subr.bf16.mxu0 %v7473_v41  ;;  %v10385_v41 = vand.u32 4294901760, %v8676_v46  ;;  %v10390_v46 = vand.u32 4294901760, %v8765_v38  ;;  %v294_v38 = vld [vmem:[%s10160_s1 + $0x200] sm:$0xff] }
  0xb8   : > { %7498 = vmatprep.subr.bf16.mxu1 %v10377_v7 }
  0xb9   : > { %v7527_v63 = vpack.c.bf16 %v10390_v46, %v10389_v18  ;;  %v10399_v18 = vand.u32 4294901760, %v8854_v61  ;;  %v10403_v61 = vand.u32 4294901760, %v10373_v22  ;;  %v10407_v22 = vand.u32 4294901760, %v8955_v29  ;;  %v228_v29 = vld [vmem:[%s8455_s9 + $0x28] sm:$0xff] }
  0xba   : > { %7476 = vmatpush3.bf16.msra.mxu0 %v7475_v42  ;;  %v7523_v42 = vpack.c.bf16 %v10386_v37, %v10385_v41  ;;  %v312_v41 = vld [vmem:[%s10160_s1 + $0x290] sm:$0xff]  ;;  %v313_v37 = vld [vmem:[%s10160_s1 + $0x298] sm:$0xff] }
  0xbb   : > { %7500 = vmatpush3.bf16.msra.mxu1 %v10378_v12  ;;  %7478 = vmatprep.subr.bf16.mxu0 %v7477_v28  ;;  %v10387_v28 = vand.u32 4294901760, %v8745_v15  ;;  %v10392_v15 = vand.u32 4294901760, %v8779_v17  ;;  %v10394_v17 = vand.u32 4294901760, %v8798_v45 }
  0xbc   : > { %7502 = vmatprep.subr.bf16.mxu1 %v10379_v8 }
  0xbe   : > { %7480 = vmatpush3.bf16.msra.mxu0 %v7479_v34  ;;  %v10388_v34 = vand.u32 4294901760, %v8747_v14  ;;  %v10393_v14 = vand.u32 4294901760, %v8781_v6  ;;  %v10395_v6 = vand.u32 4294901760, %v8800_v0  ;;  %v2060_v0 = vand.u32 4294901760, %v295_v10 }
  0xbf   : > { %7504 = vmatpush3.bf16.msra.mxu1 %v10380_v56  ;;  %7482 = vmatprep.subr.bf16.mxu0 %v7481_v19 }
  0xc0   : > { %7506 = vmatprep.subr.bf16.mxu1 %v10381_v20  ;;  %v7525_v19 = vpack.c.bf16 %v10388_v34, %v10387_v28  ;;  %v7531_v1 = vpack.c.bf16 %v10395_v6, %v10394_v17  ;;  %v10397_v28 = vand.u32 4294901760, %v8821_v27  ;;  %v2057_v34 = vand.u32 4294901760, %v294_v38 }
  0xc1   : > { %v2114_v6 = vand.u32 4294901760, %v313_v37 }
  0xc2   : > { %7484 = vmatpush3.bf16.msra.mxu0 %v7483_v54  ;;  %v10391_v54 = vld [vmem:[#allocation10_spill] sm:$0xff] }
  0xc3   : > { %7508 = vmatpush3.bf16.msra.mxu1 %v8919_v50  ;;  %7486 = vmatprep.subr.bf16.mxu0 %v7485_v26  ;;  %v7529_v26 = vpack.c.bf16 %v10393_v14, %v10392_v15  ;;  %v10401_v15 = vand.u32 4294901760, %v8889_v51  ;;  %v10405_v51 = vand.u32 4294901760, %v10376_v32  ;;  %v10408_v32 = vand.u32 4294901760, %v8983_v57 }
  0xc4   : > { %7510 = vmatprep.subr.bf16.mxu1 %v10384_v59  ;;  %v10410_v57 = vand.u32 4294901760, %v8999_v2  ;;  %v10414_v2 = vand.u32 4294901760, %v9063_v48  ;;  %v9301_v48 = vand.u32 4294901760, %v228_v29 }
  0xc6   : > { %7488 = vmatpush3.bf16.msra.mxu0 %v7487_v21  ;;  %v311_v21 = vld [vmem:[%s10160_s1 + $0x288] sm:$0xff]  ;;  %10416 = vst [vmem:[#allocation13_spill] sm:$0xff] %v9301_v48 }
  0xc7   : > { %7512 = vmatpush3.bf16.msra.mxu1 %v8947_v16  ;;  %7522 = vmatprep.subr.bf16.mxu0 %v7521_v9  ;;  %v2108_v9 = vand.u32 4294901760, %v311_v21 }
  0xc8   : > { %7514 = vmatprep.subr.bf16.mxu1 %v8990_v4 }
  0xc9   : > { %1671 = vmatmul.mubr.f32.vlgmr.msra.gmra.mrb[8].mxu0 %v9048_v36  ;;  %v9260_v36 = vsub.f32 %v294_v38, %v2057_v34 }
  0xca   : > { %7524 = vmatpush3.bf16.msra.mxu0 %v7523_v42  ;;  %1945 = vmatprep.mubr.f32.mxu0 %v10391_v54  ;;  %v10396_v42 = vand.u32 4294901760, %v8819_v25  ;;  %v296_v25 = vld [vmem:[%s10160_s1 + $0x210] sm:$0xff] }
  0xcb   : > { %7516 = vmatpush3.bf16.msra.mxu1 %v9077_v52  ;;  %7526 = vmatprep.subr.bf16.mxu0 %v7525_v19  ;;  %v10398_v19 = vand.u32 4294901760, %v8852_v24  ;;  %v10402_v24 = vand.u32 4294901760, %v8907_v5  ;;  %v10406_v5 = vand.u32 4294901760, %v8953_v49  ;;  %v2063_v49 = vand.u32 4294901760, %v296_v25 }
  0xcc   : > { %7518 = vmatprep.subr.bf16.mxu1 %v9079_v58  ;;  %v7533_v45 = vpack.c.bf16 %v10397_v28, %v10396_v42  ;;  %v314_v42 = vld [vmem:[%s10160_s1 + $0x2a0] sm:$0xff]  ;;  %v315_v28 = vld [vmem:[%s10160_s1 + $0x2a8] sm:$0xff] }
  0xcd   : > { %v7535_v46 = vpack.c.bf16 %v10399_v18, %v10398_v19  ;;  %v7539_v27 = vpack.c.bf16 %v10403_v61, %v10402_v24  ;;  %v10409_v19 = vand.u32 4294901760, %v8992_v23  ;;  %v10411_v23 = vand.u32 4294901760, %v9034_v39 }
  0xce   : > { %7528 = vmatpush3.bf16.msra.mxu0 %v7527_v63  ;;  %v10400_v63 = vand.u32 4294901760, %v8862_v3  ;;  %v10404_v3 = vand.u32 4294901760, %v10375_v31  ;;  %v9249_v31 = vpack.c.bf16 %v10407_v22, %v10406_v5  ;;  %v9288_v61 = vsub.f32 %v313_v37, %v2114_v6  ;;  %v316_v37 = vld [vmem:[%s10160_s1 + $0x2b0] sm:$0xff] }
  0xcf   : > { %7520 = vmatpush3.bf16.msra.mxu1 %v9102_v30  ;;  %7530 = vmatprep.subr.bf16.mxu0 %v7529_v26  ;;  %v9221_v26 = vsub.f32 %v310_v33, %v2105_v40  ;;  %v2111_v33 = vand.u32 4294901760, %v312_v41  ;;  %v9255_v18 = vpack.c.bf16 %v10409_v19, %v10408_v32  ;;  %v9332_v22 = vsub.f32 %v228_v29, %v9301_v48 }
  0xd0   : > { %7554 = vmatprep.subr.bf16.mxu1 %v8727_v47  ;;  %v7537_v14 = vpack.c.bf16 %v10401_v15, %v10400_v63  ;;  %v297_v47 = vld [vmem:[%s10160_s1 + $0x218] sm:$0xff]  ;;  %v7541_v17 = vpack.c.bf16 %v10405_v51, %v10404_v3  ;;  %v9257_v63 = vsub.f32 %v311_v21, %v2108_v9  ;;  %v9270_v15 = vpack.c.bf16 %v10411_v23, %v10410_v57 }
  0xd1   : > { %v2117_v21 = vand.u32 4294901760, %v314_v42  ;;  %v10264_v38 = vand.u32 4294901760, %v9221_v26  ;;  %v9286_v39 = vsub.f32 %v312_v41, %v2111_v33  ;;  %v9292_v3 = vpack.c.bf16 %v2060_v0, %v2057_v34  ;;  %v317_v34 = vld [vmem:[%s10160_s1 + $0x2b8] sm:$0xff] }
  0xd2   : > { %1779 = vmatmul.mubr.f32.vlgmr.msra.gmra.mrb[8].mxu1 %v1298_v60  ;;  %7532 = vmatpush3.bf16.msra.mxu0 %v7531_v1  ;;  %v9262_v60 = vsub.f32 %v295_v10, %v2060_v0  ;;  %v2066_v1 = vand.u32 4294901760, %v297_v47  ;;  %v10412_v10 = vand.u32 4294901760, %v9043_v44  ;;  %v10262_v53 = vand.u32 4294901760, %v9257_v63  ;;  %v298_v44 = vld [vmem:[%s10160_s1 + $0x220] sm:$0xff] }
  0xd3   : > { %7556 = vmatpush3.bf16.msra.mxu1 %v8739_v13  ;;  %7534 = vmatprep.subr.bf16.mxu0 %v7533_v45  ;;  %v2120_v13 = vand.u32 4294901760, %v315_v28  ;;  %10415 = vst [vmem:[#allocation5_spill] sm:$0xff] %v9292_v3  ;;  %v2069_v51 = vand.u32 4294901760, %v298_v44  ;;  %v10255_v5 = vand.u32 4294901760, %v9288_v61  ;;  %v9335_v32 = vsub.f32 %v314_v42, %v2117_v21 }
  0xd4   : > { %7558 = vmatprep.subr.bf16.mxu1 %v10371_v62  ;;  %2049 = vmatprep.mubr.f32.mxu1 %v10391_v54  ;;  %v9278_v45 = vpack.c.bf16 %v10412_v10, %v1519_v43  ;;  %v10413_v62 = vand.u32 4294901760, %v9060_v55  ;;  %v9290_v54 = vpack.c.bf16 %v2108_v9, %v2105_v40  ;;  %v299_v55 = vld [vmem:[%s10160_s1 + $0x228] sm:$0xff]  ;;  %v9304_v43 = vpack.c.bf16 %v2114_v6, %v2111_v33 }
  0xd5   : > { %v9306_v40 = vpack.c.bf16 %v2066_v1, %v2063_v49  ;;  %v10261_v9 = vand.u32 4294901760, %v9260_v36  ;;  %v10257_v41 = vand.u32 4294901760, %v9262_v60  ;;  %v9319_v0 = vsub.f32 %v297_v47, %v2066_v1 }
  0xd6   : > { %v9284_v24 = vpack.c.bf16 %v10414_v2, %v10413_v62  ;;  %7536 = vmatpush3.bf16.msra.mxu0 %v7535_v46  ;;  %10417 = vst [vmem:[#allocation6_spill] sm:$0xff] %v9304_v43  ;;  %v9321_v46 = vpack.c.bf16 %v2120_v13, %v2117_v21  ;;  %v2072_v33 = vand.u32 4294901760, %v299_v55  ;;  %v10256_v6 = vand.u32 4294901760, %v9286_v39 }
  0xd7   : > { %7560 = vmatpush3.bf16.msra.mxu1 %v10374_v11  ;;  %7538 = vmatprep.subr.bf16.mxu0 %v7537_v14  ;;  %10418 = vst [vmem:[#allocation15_spill] sm:$0xff] %v9306_v40  ;;  %v9317_v11 = vsub.f32 %v296_v25, %v2063_v49  ;;  %v2284_v14 = vsub.f32 %v9221_v26, %v10264_v38  ;;  %v2123_v25 = vand.u32 4294901760, %v316_v37  ;;  %v2126_v47 = vand.u32 4294901760, %v317_v34 }
  0xd8   : > { %7562 = vmatprep.subr.bf16.mxu1 %v10377_v7  ;;  %10419 = vst [vmem:[#allocation16_spill] sm:$0xff] %v9321_v46  ;;  %v2291_v7 = vsub.f32 %v9257_v63, %v10262_v53  ;;  %v2172_v19 = vsub.f32 %v9260_v36, %v10261_v9  ;;  %v9344_v49 = vsub.f32 %v315_v28, %v2120_v13  ;;  %v10254_v42 = vand.u32 4294901760, %v9319_v0  ;;  %v301_v28 = vld [vmem:[%s10160_s1 + $0x238] sm:$0xff] }
  0xd9   : > { %v2285_v1 = vand.u32 4294901760, %v2284_v14  ;;  %v9351_v29 = vpack.c.bf16 %v2072_v33, %v2069_v51  ;;  %v9353_v57 = vsub.f32 %v298_v44, %v2069_v51  ;;  %v2298_v23 = vsub.f32 %v9286_v39, %v10256_v6 }
  0xda   : > { %7540 = vmatpush3.bf16.msra.mxu0 %v7539_v27  ;;  %v2179_v27 = vsub.f32 %v9262_v60, %v10257_v41  ;;  %v2292_v21 = vand.u32 4294901760, %v2291_v7  ;;  %v9365_v13 = vsub.f32 %v299_v55, %v2072_v33  ;;  %v9367_v10 = vpack.c.bf16 %v2126_v47, %v2123_v25  ;;  %v319_v55 = vld [vmem:[%s10160_s1 + $0x2c8] sm:$0xff] }
  0xdb   : > { %7564 = vmatpush3.bf16.msra.mxu1 %v10378_v12  ;;  %7542 = vmatprep.subr.bf16.mxu0 %v7541_v17  ;;  %v300_v12 = vld [vmem:[%s10160_s1 + $0x230] sm:$0xff]  ;;  %v10253_v17 = vand.u32 4294901760, %v9317_v11  ;;  %10420 = vst [vmem:[#allocation7_spill] sm:$0xff] %v9351_v29  ;;  %v10269_v62 = vand.u32 4294901760, %v9332_v22  ;;  %v2173_v2 = vand.u32 4294901760, %v2172_v19  ;;  %v9372_v14 = vsub.f32 %v316_v37, %v2123_v25 }
  0xdc   : > { %7566 = vmatprep.subr.bf16.mxu1 %v10379_v8  ;;  %v2305_v8 = vsub.f32 %v9288_v61, %v10255_v5  ;;  %10421 = vst [vmem:[#allocation8_spill] sm:$0xff] %v9367_v10  ;;  %v2180_v44 = vand.u32 4294901760, %v2179_v27  ;;  %v2075_v51 = vand.u32 4294901760, %v300_v12  ;;  %v9381_v33 = vsub.f32 %v317_v34, %v2126_v47 }
  0xdd   : > { %v2193_v37 = vsub.f32 %v9319_v0, %v10254_v42  ;;  %v2299_v7 = vand.u32 4294901760, %v2298_v23  ;;  %v10259_v19 = vand.u32 4294901760, %v9335_v32  ;;  %v10258_v27 = vand.u32 4294901760, %v9344_v49 }
  0xde   : > { %7544 = vmatpush3.bf16.msra.mxu0 %v9249_v31  ;;  %v318_v31 = vld [vmem:[%s10160_s1 + $0x2c0] sm:$0xff]  ;;  %v2306_v25 = vand.u32 4294901760, %v2305_v8  ;;  %v2132_v47 = vand.u32 4294901760, %v319_v55  ;;  %v2155_v42 = vsub.f32 %v9332_v22, %v10269_v62  ;;  %v9402_v23 = vpack.c.bf16 %v2180_v44, %v2173_v2  ;;  %v320_v44 = vld [vmem:[%s10160_s1 + $0x2d0] sm:$0xff] }
  0xdf   : > { %7568 = vmatpush3.bf16.msra.mxu1 %v10380_v56  ;;  %7546 = vmatprep.subr.bf16.mxu0 %v9255_v18  ;;  %v2078_v56 = vand.u32 4294901760, %v301_v28  ;;  %v2186_v18 = vsub.f32 %v9317_v11, %v10253_v17  ;;  %v2129_v34 = vand.u32 4294901760, %v318_v31  ;;  %v302_v17 = vld [vmem:[%s10160_s1 + $0x240] sm:$0xff]  ;;  %v9404_v8 = vsub.f32 %v300_v12, %v2075_v51 }
  0xe0   : > { %7570 = vmatprep.subr.bf16.mxu1 %v10381_v20  ;;  %v9392_v20 = vpack.c.bf16 %v2292_v21, %v2285_v1  ;;  %v10263_v1 = vand.u32 4294901760, %v9365_v13  ;;  %v2194_v41 = vand.u32 4294901760, %v2193_v37  ;;  %v2312_v12 = vsub.f32 %v9335_v32, %v10259_v19 }
  0xe1   : > { %v9409_v21 = vpack.c.bf16 %v2078_v56, %v2075_v51  ;;  %v9411_v5 = vsub.f32 %v301_v28, %v2078_v56  ;;  %v2187_v6 = vand.u32 4294901760, %v2186_v18  ;;  %v2081_v2 = vand.u32 4294901760, %v302_v17  ;;  %v321_v51 = vld [vmem:[%s10160_s1 + $0x2d8] sm:$0xff] }
  0xe2   : > { %7548 = vmatpush3.bf16.msra.mxu0 %v9270_v15  ;;  %v10260_v15 = vand.u32 4294901760, %v9353_v57  ;;  %v9425_v28 = vpack.c.bf16 %v2132_v47, %v2129_v34  ;;  %v10265_v56 = vand.u32 4294901760, %v9372_v14  ;;  %v10266_v18 = vand.u32 4294901760, %v9381_v33 }
  0xe3   : > { %7572 = vmatpush3.bf16.msra.mxu1 %v8919_v50  ;;  %7550 = vmatprep.subr.bf16.mxu0 %v9278_v45  ;;  %10422 = vst [vmem:[#allocation9_spill] sm:$0xff] %v9409_v21  ;;  %v303_v50 = vld [vmem:[%s10160_s1 + $0x248] sm:$0xff]  ;;  %v9416_v45 = vpack.c.bf16 %v2306_v25, %v2299_v7  ;;  %v2156_v37 = vand.u32 4294901760, %v2155_v42  ;;  %v9446_v19 = vpack.c.bf16 %v2194_v41, %v2187_v6  ;;  %v2135_v53 = vand.u32 4294901760, %v320_v44 }
  0xe4   : > { %7574 = vmatprep.subr.bf16.mxu1 %v10384_v59  ;;  %v2319_v59 = vsub.f32 %v9344_v49, %v10258_v27  ;;  %10423 = vst [vmem:[#allocation11_spill] sm:$0xff] %v9425_v28  ;;  %v2084_v7 = vand.u32 4294901760, %v303_v50  ;;  %v2200_v25 = vsub.f32 %v9353_v57, %v10260_v15  ;;  %v2207_v27 = vsub.f32 %v9365_v13, %v10263_v1 }
  0xe5   : > { %v9448_v42 = vsub.f32 %v319_v55, %v2132_v47  ;;  %v2313_v15 = vand.u32 4294901760, %v2312_v12  ;;  %v2138_v1 = vand.u32 4294901760, %v321_v51  ;;  %v9460_v41 = vsub.f32 %v302_v17, %v2081_v2 }
  0xe6   : > { %7552 = vmatpush3.bf16.msra.mxu0 %v9284_v24  ;;  %v9437_v24 = vsub.f32 %v318_v31, %v2129_v34  ;;  %v10267_v31 = vand.u32 4294901760, %v9404_v8  ;;  %v10268_v34 = vand.u32 4294901760, %v9411_v5  ;;  %v2320_v9 = vand.u32 4294901760, %v2319_v59 }
  0xe7   : > { %7576 = vmatpush3.bf16.msra.mxu1 %v8947_v16  ;;  %7586 = vmatprep.subr.bf16.mxu0 %v9290_v54  ;;  %v304_v16 = vld [vmem:[%s10160_s1 + $0x250] sm:$0xff]  ;;  %v2326_v6 = vsub.f32 %v9372_v14, %v10265_v56  ;;  %v2333_v55 = vsub.f32 %v9381_v33, %v10266_v18  ;;  %v9470_v47 = vpack.c.bf16 %v2084_v7, %v2081_v2  ;;  %v2201_v12 = vand.u32 4294901760, %v2200_v25 }
  0xe8   : > { %7578 = vmatprep.subr.bf16.mxu1 %v8990_v4  ;;  %v305_v4 = vld [vmem:[%s10160_s1 + $0x258] sm:$0xff]  ;;  %v2208_v59 = vand.u32 4294901760, %v2207_v27  ;;  %v2087_v38 = vand.u32 4294901760, %v304_v16  ;;  %v2214_v56 = vsub.f32 %v9404_v8, %v10267_v31  ;;  %v323_v27 = vld [vmem:[%s10160_s1 + $0x2e8] sm:$0xff]  ;;  %v10274_v2 = vand.u32 4294901760, %v9437_v24  ;;  %v9507_v31 = vld [vmem:[%s10160_s1 + $0x260] sm:$0xff] }
  0xe9   : > { %1947 = vmatmul.mubr.f32.vlgmr.msra.gmra.mrb[10].mxu0 %v9020_v35  ;;  %v2090_v17 = vand.u32 4294901760, %v305_v4  ;;  %v9488_v25 = vsub.f32 %v303_v50, %v2084_v7  ;;  %v9490_v18 = vpack.c.bf16 %v2138_v1, %v2135_v53  ;;  %v9496_v62 = vsub.f32 %v321_v51, %v2138_v1  ;;  %v9518_v51 = vld [vmem:[%s10160_s1 + $0x268] sm:$0xff] }
  0xea   : > { %7588 = vmatpush3.bf16.msra.mxu0 %v9292_v3  ;;  %2157 = vmatprep.mubr.f32.mxu0 %v2156_v37  ;;  %v2221_v37 = vsub.f32 %v9411_v5, %v10268_v34  ;;  %v9494_v34 = vsub.f32 %v320_v44, %v2135_v53  ;;  %v2334_v3 = vand.u32 4294901760, %v2333_v55  ;;  %v2144_v7 = vand.u32 4294901760, %v323_v27  ;;  %v9530_v55 = vld [vmem:[%s10160_s1 + $0x2f0] sm:$0xff] }
  0xeb   : > { %7580 = vmatpush3.bf16.msra.mxu1 %v9077_v52  ;;  %7590 = vmatprep.subr.bf16.mxu0 %v9304_v43  ;;  %v322_v52 = vld [vmem:[%s10160_s1 + $0x2e0] sm:$0xff]  ;;  %10425 = vst [vmem:[#allocation14_spill] sm:$0xff] %v9496_v62  ;;  %v2327_v43 = vand.u32 4294901760, %v2326_v6  ;;  %v9510_v53 = vpack.c.bf16 %v2090_v17, %v2087_v38  ;;  %v2215_v1 = vand.u32 4294901760, %v2214_v56  ;;  %v2340_v44 = vsub.f32 %v9437_v24, %v10274_v2 }
  0xec   : > { %7582 = vmatprep.subr.bf16.mxu1 %v9079_v58  ;;  %v9486_v58 = vpack.c.bf16 %v2320_v9, %v2313_v15  ;;  %10424 = vst [vmem:[#allocation12_spill] sm:$0xff] %v9494_v34  ;;  %v9500_v9 = vpack.c.bf16 %v2208_v59, %v2201_v12  ;;  %v9502_v15 = vsub.f32 %v304_v16, %v2087_v38  ;;  %v2141_v50 = vand.u32 4294901760, %v322_v52  ;;  %v9535_v12 = vld [vmem:[%s10160_s1 + $0x2f8] sm:$0xff] }
  0xed   : > { %v9520_v16 = vsub.f32 %v305_v4, %v2090_v17  ;;  %v10426_v6 = vand.u32 4294901760, %v9448_v42  ;;  %v7629_v4 = vpack.c.bf16 %v2334_v3, %v2327_v43  ;;  %v2093_v59 = vand.u32 4294901760, %v9507_v31 }
  0xee   : > { %7592 = vmatpush3.bf16.msra.mxu0 %v9306_v40  ;;  %v9545_v2 = vpack.c.bf16 %v2144_v7, %v2141_v50  ;;  %v9547_v56 = vsub.f32 %v322_v52, %v2141_v50  ;;  %v9549_v38 = vsub.f32 %v323_v27, %v2144_v7  ;;  %v2341_v43 = vand.u32 4294901760, %v2340_v44  ;;  %v9563_v52 = vld [vmem:[%s10160_s1 + $0x278] sm:$0xff] }
  0xef   : > { %7584 = vmatpush3.bf16.msra.mxu1 %v9102_v30  ;;  %7594 = vmatprep.subr.bf16.mxu0 %v9321_v46  ;;  %v2222_v30 = vand.u32 4294901760, %v2221_v37  ;;  %v2147_v17 = vand.u32 4294901760, %v9530_v55  ;;  %v2150_v37 = vand.u32 4294901760, %v9535_v12  ;;  %v10428_v7 = vand.u32 4294901760, %v9488_v25 }
  0xf0   : > { %7618 = vmatprep.subr.bf16.mxu1 %v9392_v20  ;;  %v2347_v20 = vsub.f32 %v9448_v42, %v10426_v6  ;;  %v227_v6 = vld [vmem:[%s8455_s9 + $0x20] sm:$0xff]  ;;  %v10429_v44 = vand.u32 4294901760, %v9494_v34  ;;  %v2102_v46 = vand.u32 4294901760, %v9563_v52 }
  0xf1   : > { %v7631_v3 = vpack.c.bf16 %v2222_v30, %v2215_v1  ;;  %v2235_v1 = vsub.f32 %v9488_v25, %v10428_v7  ;;  %v9572_v30 = vand.u32 4294901760, %v227_v6  ;;  %v9586_v7 = vsub.f32 %v9507_v31, %v2093_v59 }
  0xf2   : > { %2051 = vmatmul.mubr.f32.vlgmr.msra.gmra.mrb[10].mxu1 %v9020_v35  ;;  %7596 = vmatpush3.bf16.msra.mxu0 %v9351_v29  ;;  %v2096_v35 = vand.u32 4294901760, %v9518_v51  ;;  %v2348_v27 = vand.u32 4294901760, %v2347_v20  ;;  %v10430_v29 = vand.u32 4294901760, %v9496_v62  ;;  %v10293_v31 = vand.u32 4294901760, %v9549_v38 }
  0xf3   : > { %7620 = vmatpush3.bf16.msra.mxu1 %v9402_v23  ;;  %7598 = vmatprep.subr.bf16.mxu0 %v9367_v10  ;;  %v9558_v23 = vld [vmem:[%s10160_s1 + $0x270] sm:$0xff]  ;;  %v2354_v10 = vsub.f32 %v9494_v34, %v10429_v44 }
  0xf4   : > { %7622 = vmatprep.subr.bf16.mxu1 %v9416_v45  ;;  %2393 = vmatprep.mubr.f32.mxu1 %v9301_v48  ;;  %v10427_v45 = vand.u32 4294901760, %v9460_v41  ;;  %v2361_v20 = vsub.f32 %v9496_v62, %v10430_v29  ;;  %v2099_v44 = vand.u32 4294901760, %v9558_v23  ;;  %v9595_v29 = vsub.f32 %v9530_v55, %v2147_v17 }
  0xf5   : > { %v7633_v48 = vpack.c.bf16 %v2348_v27, %v2341_v43  ;;  %v9603_v62 = vsub.f32 %v227_v6, %v9572_v30  ;;  %v2355_v34 = vand.u32 4294901760, %v2354_v10  ;;  %v10431_v55 = vand.u32 4294901760, %v9502_v15 }
  0xf6   : > { %v2228_v50 = vsub.f32 %v9460_v41, %v10427_v45  ;;  %7600 = vmatpush3.bf16.msra.mxu0 %v9409_v21  ;;  %v9589_v21 = vsub.f32 %v9518_v51, %v2096_v35  ;;  %v9598_v45 = vsub.f32 %v9535_v12, %v2150_v37  ;;  %v2236_v51 = vand.u32 4294901760, %v2235_v1 }
  0xf7   : > { %7624 = vmatpush3.bf16.msra.mxu1 %v9446_v19  ;;  %7602 = vmatprep.subr.bf16.mxu0 %v9425_v28  ;;  %v2242_v40 = vsub.f32 %v9502_v15, %v10431_v55  ;;  %v10432_v12 = vand.u32 4294901760, %v9520_v16  ;;  %v9615_v43 = vsub.f32 %v9558_v23, %v2099_v44  ;;  %v9618_v6 = vsub.f32 %v9563_v52, %v2102_v46 }
  0xf8   : > { %7626 = vmatprep.subr.bf16.mxu1 %v9486_v58  ;;  %v2229_v28 = vand.u32 4294901760, %v2228_v50  ;;  %v2362_v58 = vand.u32 4294901760, %v2361_v20  ;;  %v10433_v50 = vand.u32 4294901760, %v9547_v56  ;;  %v10295_v23 = vand.u32 4294901760, %v9598_v45 }
  0xf9   : > { %v2249_v19 = vsub.f32 %v9520_v16, %v10432_v12  ;;  %v9630_v55 = vpack.c.bf16 %v2096_v35, %v2093_v59  ;;  %v9632_v52 = vpack.c.bf16 %v2150_v37, %v2147_v17  ;;  %v2160_v12 = vand.u32 4294901760, %v9603_v62 }
  0xfa   : > { %7604 = vmatpush3.bf16.msra.mxu0 %v9470_v47  ;;  %v2368_v1 = vsub.f32 %v9547_v56, %v10433_v50  ;;  %v7637_v27 = vpack.c.bf16 %v2362_v58, %v2355_v34  ;;  %v2243_v10 = vand.u32 4294901760, %v2242_v40  ;;  %v10435_v59 = vand.u32 4294901760, %v9589_v21 }
  0xfb   : > { %7628 = vmatpush3.bf16.msra.mxu1 %v9500_v9  ;;  %7606 = vmatprep.subr.bf16.mxu0 %v9490_v18  ;;  %v2375_v9 = vsub.f32 %v9549_v38, %v10293_v31  ;;  %v2250_v50 = vand.u32 4294901760, %v2249_v19  ;;  %v10434_v31 = vand.u32 4294901760, %v9586_v7  ;;  %v10294_v37 = vand.u32 4294901760, %v9615_v43 }
  0xfc   : > { %7630 = vmatprep.subr.bf16.mxu1 %v7629_v4  ;;  %v7635_v4 = vpack.c.bf16 %v2236_v51, %v2229_v28  ;;  %v2263_v17 = vsub.f32 %v9589_v21, %v10435_v59  ;;  %v10296_v35 = vand.u32 4294901760, %v9618_v6  ;;  %v2369_v28 = vand.u32 4294901760, %v2368_v1 }
  0xfd   : > { %v2256_v20 = vsub.f32 %v9586_v7, %v10434_v31  ;;  %v2376_v34 = vand.u32 4294901760, %v2375_v9  ;;  %v10436_v40 = vand.u32 4294901760, %v9595_v29  ;;  %v2389_v19 = vsub.f32 %v9598_v45, %v10295_v23 }
  0xfe   : > { %7608 = vmatpush3.bf16.msra.mxu0 %v9510_v53  ;;  %v2161_v31 = vsub.f32 %v9603_v62, %v2160_v12  ;;  %v9655_v51 = vpack.c.bf16 %v2102_v46, %v2099_v44  ;;  %v7639_v58 = vpack.c.bf16 %v2250_v50, %v2243_v10  ;;  %v2264_v9 = vand.u32 4294901760, %v2263_v17 }
  0xff   : > { %7632 = vmatpush3.bf16.msra.mxu1 %v7631_v3  ;;  %7610 = vmatprep.subr.bf16.mxu0 %v9545_v2  ;;  %v2382_v3 = vsub.f32 %v9595_v29, %v10436_v40  ;;  %v2257_v1 = vand.u32 4294901760, %v2256_v20  ;;  %v2270_v59 = vsub.f32 %v9615_v43, %v10294_v37  ;;  %v2277_v40 = vsub.f32 %v9618_v6, %v10296_v35 }
 0x100   : > { %7634 = vmatprep.subr.bf16.mxu1 %v7633_v48  ;;  %v7649_v48 = vpack.c.bf16 %v9257_v63, %v9221_v26  ;;  %v7641_v46 = vpack.c.bf16 %v2376_v34, %v2369_v28  ;;  %v2390_v10 = vand.u32 4294901760, %v2389_v19  ;;  %v2162_v50 = vand.u32 4294901760, %v2161_v31  ;;  %v10438_v31 = vld [vmem:[#allocation6_spill] sm:$0xff] }
 0x101   : > { %v2383_v44 = vand.u32 4294901760, %v2382_v3  ;;  %v7643_v20 = vpack.c.bf16 %v2264_v9, %v2257_v1  ;;  %v7653_v17 = vpack.c.bf16 %v9288_v61, %v9286_v39  ;;  %v2271_v37 = vand.u32 4294901760, %v2270_v59  ;;  %v10440_v1 = vld [vmem:[#allocation15_spill] sm:$0xff]  ;;  %v10441_v9 = vld [vmem:[#allocation12_spill] sm:$0xff]  ;;  %v10442_v59 = vld [vmem:[#allocation14_spill] sm:$0xff] }
 0x102   : > { %7612 = vmatpush3.bf16.msra.mxu0 %v9630_v55  ;;  %v2278_v23 = vand.u32 4294901760, %v2277_v40  ;;  %v7657_v34 = vpack.c.bf16 %v9344_v49, %v9335_v32  ;;  %v7659_v3 = vpack.c.bf16 %v9365_v13, %v9353_v57  ;;  %v7661_v19 = vpack.c.bf16 %v9381_v33, %v9372_v14 }
 0x103   : > { %7636 = vmatpush3.bf16.msra.mxu1 %v7635_v4  ;;  %7614 = vmatprep.subr.bf16.mxu0 %v9632_v52  ;;  %v7651_v4 = vpack.c.bf16 %v9262_v60, %v9260_v36  ;;  %v7645_v35 = vpack.c.bf16 %v2390_v10, %v2383_v44  ;;  %v7669_v40 = vpack.c.bf16 %v10442_v59, %v10441_v9  ;;  %v10444_v10 = vld [vmem:[#allocation7_spill] sm:$0xff] }
 0x104   : > { %7638 = vmatprep.subr.bf16.mxu1 %v7637_v27  ;;  %v7655_v27 = vpack.c.bf16 %v9319_v0, %v9317_v11  ;;  %v7647_v28 = vpack.c.bf16 %v2278_v23, %v2271_v37  ;;  %v7663_v23 = vpack.c.bf16 %v9411_v5, %v9404_v8  ;;  %v10437_v37 = vld [vmem:[#allocation5_spill] sm:$0xff]  ;;  %v7671_v44 = vpack.c.bf16 %v9520_v16, %v9502_v15 }
 0x106   : > { %7616 = vmatpush3.bf16.msra.mxu0 %v9655_v51 }
 0x107   : > { %7640 = vmatpush3.bf16.msra.mxu1 %v7639_v58  ;;  %7650 = vmatprep.subr.bf16.mxu0 %v7649_v48  ;;  %v10439_v58 = vand.u32 4294901760, %v9332_v22  ;;  %v7667_v48 = vpack.c.bf16 %v9488_v25, %v9460_v41 }
 0x108   : > { %7642 = vmatprep.subr.bf16.mxu1 %v7641_v46  ;;  %v10443_v46 = vld [vmem:[#allocation16_spill] sm:$0xff] }
 0x109   : > { %2163 = vmatmul.mubr.f32.vlgmr.msra.gmra.mrb[12].mxu0 %v2162_v50  ;;  %v10445_v50 = vld [vmem:[#allocation8_spill] sm:$0xff] }
 0x10a   : > { %7652 = vmatpush3.bf16.msra.mxu0 %v7651_v4  ;;  %2530 = vmatprep.mubr.f32.mxu0 %v9332_v22  ;;  %v7673_v22 = vpack.c.bf16 %v9549_v38, %v9547_v56 }
 0x10b   : > { %7644 = vmatpush3.bf16.msra.mxu1 %v7643_v20  ;;  %7654 = vmatprep.subr.bf16.mxu0 %v7653_v17  ;;  %v7675_v17 = vpack.c.bf16 %v9589_v21, %v9586_v7 }
 0x10c   : > { %7646 = vmatprep.subr.bf16.mxu1 %v7645_v35  ;;  %v7665_v35 = vpack.c.bf16 %v9448_v42, %v9437_v24 }
 0x10e   : > { %7656 = vmatpush3.bf16.msra.mxu0 %v7655_v27 }
 0x10f   : > { %7648 = vmatpush3.bf16.msra.mxu1 %v7647_v28  ;;  %7658 = vmatprep.subr.bf16.mxu0 %v7657_v34  ;;  %v10446_v28 = vld [vmem:[#allocation9_spill] sm:$0xff]  ;;  %v7677_v34 = vpack.c.bf16 %v9598_v45, %v9595_v29 }
 0x110   : > { %7682 = vmatprep.subr.bf16.mxu1 %v9290_v54 }
 0x112   : > { %2395 = vmatmul.mubr.f32.vlgmr.msra.gmra.mrb[12].mxu1 %v9572_v30  ;;  %7660 = vmatpush3.bf16.msra.mxu0 %v7659_v3  ;;  %v10447_v3 = vld [vmem:[#allocation11_spill] sm:$0xff] }
 0x113   : > { %7684 = vmatpush3.bf16.msra.mxu1 %v10437_v37  ;;  %7662 = vmatprep.subr.bf16.mxu0 %v7661_v19  ;;  %v7679_v19 = vpack.c.bf16 %v9618_v6, %v9615_v43 }
 0x114   : > { %7686 = vmatprep.subr.bf16.mxu1 %v10438_v31  ;;  %2637 = vmatprep.mubr.f32.mxu1 %v10439_v58 }
 0x116   : > { %7664 = vmatpush3.bf16.msra.mxu0 %v7663_v23  ;;  %v10448_v23 = vand.u32 4294901760, %v9221_v26  ;;  %v10453_v26 = vand.u32 4294901760, %v9288_v61  ;;  %v10458_v61 = vand.u32 4294901760, %v9344_v49  ;;  %v10464_v49 = vand.u32 4294901760, %v9411_v5 }
 0x117   : > { %7688 = vmatpush3.bf16.msra.mxu1 %v10440_v1  ;;  %7666 = vmatprep.subr.bf16.mxu0 %v7665_v35  ;;  %v10449_v35 = vand.u32 4294901760, %v9257_v63 }
 0x118   : > { %7690 = vmatprep.subr.bf16.mxu1 %v10443_v46 }
 0x119   : > { %v7713_v58 = vpack.c.bf16 %v10449_v35, %v10448_v23  ;;  %v10456_v23 = vld [vmem:[#allocation13_spill] sm:$0xff] }
 0x11a   : > { %7668 = vmatpush3.bf16.msra.mxu0 %v7667_v48 }
 0x11b   : > { %7692 = vmatpush3.bf16.msra.mxu1 %v10444_v10  ;;  %7670 = vmatprep.subr.bf16.mxu0 %v7669_v40 }
 0x11c   : > { %7694 = vmatprep.subr.bf16.mxu1 %v10445_v50  ;;  %v6381_v4 = vpop.f32.mrb[0].mxu0 }
 0x11d   : > { %v6382_v20 = vpop.f32.mrb[1].mxu0 }
 0x11e   : > { %7672 = vmatpush3.bf16.msra.mxu0 %v7671_v44  ;;  %v6383_v27 = vadd.f32 %v6382_v20, %v6381_v4  ;;  %v10450_v44 = vand.u32 4294901760, %v9260_v36  ;;  %v10454_v36 = vand.u32 4294901760, %v9317_v11  ;;  %v10460_v11 = vand.u32 4294901760, %v9365_v13 }
 0x11f   : > { %7696 = vmatpush3.bf16.msra.mxu1 %v10446_v28  ;;  %7674 = vmatprep.subr.bf16.mxu0 %v7673_v22  ;;  %v10451_v22 = vand.u32 4294901760, %v9262_v60  ;;  %v10455_v60 = vand.u32 4294901760, %v9319_v0  ;;  %v10461_v0 = vand.u32 4294901760, %v9372_v14  ;;  %v10465_v13 = vand.u32 4294901760, %v9437_v24 }
 0x120   : > { %7698 = vmatprep.subr.bf16.mxu1 %v10447_v3  ;;  %v10466_v14 = vand.u32 4294901760, %v9448_v42  ;;  %v10470_v24 = vand.u32 4294901760, %v10442_v59  ;;  %v10471_v42 = vand.u32 4294901760, %v9502_v15  ;;  %v326_v15 = vld [vmem:[%s10160_s1 + $0x300] sm:$0xff] }
 0x121   : > { %v7715_v4 = vpack.c.bf16 %v10451_v22, %v10450_v44 }
 0x122   : > { %7676 = vmatpush3.bf16.msra.mxu0 %v7675_v17  ;;  %v10452_v17 = vand.u32 4294901760, %v9286_v39  ;;  %v10457_v39 = vand.u32 4294901760, %v9335_v32  ;;  %v10463_v32 = vand.u32 4294901760, %v9404_v8  ;;  %v10469_v8 = vand.u32 4294901760, %v10441_v9  ;;  %v9781_v9 = vld [vmem:[%s8455_s9 + $0x30] sm:$0xff] }
 0x123   : > { %7700 = vmatpush3.bf16.msra.mxu1 %v9470_v47  ;;  %7678 = vmatprep.subr.bf16.mxu0 %v7677_v34  ;;  %v330_v22 = vsel %vm328_vm0, %v9781_v9, 0 }
 0x124   : > { %7702 = vmatprep.subr.bf16.mxu1 %v9490_v18  ;;  %v7717_v63 = vpack.c.bf16 %v10453_v26, %v10452_v17  ;;  %v7721_v35 = vpack.c.bf16 %v10458_v61, %v10457_v39  ;;  %v2919_v26 = vand.u32 4294901760, %v326_v15 }
 0x125   : > { %v6416_v48 = vpop.f32.mrb[0].mxu1 }
 0x126   : > { %v6417_v40 = vpop.f32.mrb[1].mxu1  ;;  %7680 = vmatpush3.bf16.msra.mxu0 %v7679_v19  ;;  %v7719_v19 = vpack.c.bf16 %v10455_v60, %v10454_v36  ;;  %v10480_v36 = vand.u32 4294901760, %v9618_v6 }
 0x127   : > { %v6418_v20 = vadd.f32 %v6417_v40, %v6416_v48  ;;  %7704 = vmatpush3.bf16.msra.mxu1 %v9510_v53  ;;  %7714 = vmatprep.subr.bf16.mxu0 %v7713_v58  ;;  %v10462_v48 = vand.u32 4294901760, %v9381_v33  ;;  %v7729_v33 = vpack.c.bf16 %v10466_v14, %v10465_v13 }
 0x128   : > { %7706 = vmatprep.subr.bf16.mxu1 %v9545_v2 }
 0x129   : > { %v673_v34 = vadd.f32 %v6418_v20, %v6383_v27  ;;  %2533 = vmatmul.mubr.f32.vlgmr.msra.gmra.mrb[14].mxu0 %v9603_v62  ;;  %v10459_v27 = vand.u32 4294901760, %v9353_v57  ;;  %v7725_v40 = vpack.c.bf16 %v10462_v48, %v10461_v0  ;;  %v7727_v57 = vpack.c.bf16 %v10464_v49, %v10463_v32 }
 0x12a   : > { %7716 = vmatpush3.bf16.msra.mxu0 %v7715_v4  ;;  %2807 = vmatprep.mubr.f32.mxu0 %v10456_v23  ;;  %v10468_v62 = vand.u32 4294901760, %v9488_v25  ;;  %v10474_v25 = vand.u32 4294901760, %v9549_v38  ;;  %v10475_v38 = vand.u32 4294901760, %v9586_v7  ;;  %v10478_v4 = vand.u32 4294901760, %v9598_v45 }
 0x12b   : > { %7708 = vmatpush3.bf16.msra.mxu1 %v9630_v55  ;;  %7718 = vmatprep.subr.bf16.mxu0 %v7717_v63  ;;  %v7723_v58 = vpack.c.bf16 %v10460_v11, %v10459_v27  ;;  %v2985_v7 = vand.u32 4294901760, %v330_v22 }
 0x12c   : > { %7710 = vmatprep.subr.bf16.mxu1 %v9632_v52 }
 0x12e   : > { %7720 = vmatpush3.bf16.msra.mxu0 %v7719_v19  ;;  %v2997_v19 = vsub.f32 %v326_v15, %v2919_v26 }
 0x12f   : > { %7712 = vmatpush3.bf16.msra.mxu1 %v9655_v51  ;;  %7722 = vmatprep.subr.bf16.mxu0 %v7721_v35 }
 0x130   : > { %7746 = vmatprep.subr.bf16.mxu1 %v9290_v54  ;;  %v10467_v54 = vand.u32 4294901760, %v9460_v41  ;;  %v10473_v41 = vand.u32 4294901760, %v9547_v56  ;;  %v10476_v56 = vand.u32 4294901760, %v9589_v21  ;;  %v10479_v21 = vand.u32 4294901760, %v9615_v43 }
 0x131   : > { %v8092_v43 = vmov 0.0|0.0  }
 0x132   : > { %2641 = vmatmul.mubr.f32.vlgmr.msra.gmra.mrb[14].mxu1 %v2160_v12  ;;  %7724 = vmatpush3.bf16.msra.mxu0 %v7723_v58  ;;  %v7731_v5 = vpack.c.bf16 %v10468_v62, %v10467_v54  ;;  %v7733_v12 = vpack.c.bf16 %v10470_v24, %v10469_v8  ;;  %v7739_v44 = vpack.c.bf16 %v10476_v56, %v10475_v38  ;;  %v3377_v56 = vld [vmem:[%s10161_s2] sm:$0xff] }
 0x133   : > { %7748 = vmatpush3.bf16.msra.mxu1 %v10437_v37  ;;  %7726 = vmatprep.subr.bf16.mxu0 %v7725_v40  ;;  %v10472_v37 = vand.u32 4294901760, %v9520_v16  ;;  %v327_v16 = vld [vmem:[%s10160_s1 + $0x308] sm:$0xff]  ;;  %v7743_v60 = vpack.c.bf16 %v10480_v36, %v10479_v21 }
 0x134   : > { %7750 = vmatprep.subr.bf16.mxu1 %v10438_v31  ;;  %2911 = vmatprep.mubr.f32.mxu1 %v10456_v23  ;;  %v2922_v63 = vand.u32 4294901760, %v327_v16  ;;  %v2998_v23 = vand.u32 4294901760, %v2997_v19 }
 0x135   : > { %v7735_v31 = vpack.c.bf16 %v10472_v37, %v10471_v42 }
 0x136   : > { %7728 = vmatpush3.bf16.msra.mxu0 %v7727_v57 }
 0x137   : > { %7752 = vmatpush3.bf16.msra.mxu1 %v10440_v1  ;;  %7730 = vmatprep.subr.bf16.mxu0 %v7729_v33  ;;  %v7737_v1 = vpack.c.bf16 %v10474_v25, %v10473_v41 }
 0x138   : > { %7754 = vmatprep.subr.bf16.mxu1 %v10443_v46 }
 0x13a   : > { %7732 = vmatpush3.bf16.msra.mxu0 %v7731_v5 }
 0x13b   : > { %7756 = vmatpush3.bf16.msra.mxu1 %v10444_v10  ;;  %7734 = vmatprep.subr.bf16.mxu0 %v7733_v12 }
 0x13c   : > { %v6451_v59 = vpop.f32.mrb[2].mxu0  ;;  %7758 = vmatprep.subr.bf16.mxu1 %v10445_v50  ;;  %v10477_v50 = vand.u32 4294901760, %v9595_v29  ;;  %v2986_v29 = vsub.f32 %v330_v22, %v2985_v7  ;;  %v3383_v22 = vand.u32 4294901760, %v3377_v56 }
 0x13d   : > { %v6452_v46 = vpop.f32.mrb[3].mxu0 }
 0x13e   : > { %v6453_v10 = vadd.f32 %v6452_v46, %v6451_v59  ;;  %7736 = vmatpush3.bf16.msra.mxu0 %v7735_v31  ;;  %v7741_v20 = vpack.c.bf16 %v10478_v4, %v10477_v50 }
 0x13f   : > { %7760 = vmatpush3.bf16.msra.mxu1 %v10446_v28  ;;  %7738 = vmatprep.subr.bf16.mxu0 %v7737_v1  ;;  %v3004_v28 = vsub.f32 %v327_v16, %v2922_v63 }
 0x140   : > { %v811_v17 = vadd.f32 %v6453_v10, %v673_v34  ;;  %7762 = vmatprep.subr.bf16.mxu1 %v10447_v3  ;;  %v7778_v3 = vpack.c.bf16 %v2922_v63, %v2919_v26 }
 0x141   : > { %v3005_v39 = vand.u32 4294901760, %v3004_v28 }
 0x142   : > { %7740 = vmatpush3.bf16.msra.mxu0 %v7739_v44  ;;  %v3378_v44 = vld [vmem:[%s10161_s2 + $0x8] sm:$0xff] }
 0x143   : > { %7764 = vmatpush3.bf16.msra.mxu1 %v9470_v47  ;;  %7742 = vmatprep.subr.bf16.mxu0 %v7741_v20  ;;  %v2987_v47 = vand.u32 4294901760, %v2986_v29  ;;  %v7790_v35 = vpack.c.bf16 %v3005_v39, %v2998_v23  ;;  %v3006_v27 = vsub.f32 %v3004_v28, %v3005_v39  ;;  %v3386_v50 = vand.u32 4294901760, %v3378_v44 }
 0x144   : > { %7766 = vmatprep.subr.bf16.mxu1 %v9490_v18  ;;  %v8094_v18 = vmov 0.0   ;;  %v3461_v20 = vsub.f32 %v3377_v56, %v3383_v22 }
 0x145   : > { %v6486_v45 = vpop.f32.mrb[2].mxu1  ;;  %v3007_v58 = vand.u32 4294901760, %v3006_v27  ;;  %v9845_v4 = vpack.c.bf16 %v3386_v50, %v3383_v22 }
 0x146   : > { %v6487_v34 = vpop.f32.mrb[3].mxu1  ;;  %7744 = vmatpush3.bf16.msra.mxu0 %v7743_v60 }
 0x147   : > { %v6488_v61 = vadd.f32 %v6487_v34, %v6486_v45  ;;  %7768 = vmatpush3.bf16.msra.mxu1 %v9510_v53  ;;  %7786 = vmatprep.subr.bf16.mxu0 %v8092_v43  ;;  %v2999_v53 = vsub.f32 %v2997_v19, %v2998_v23 }
 0x148   : > { %7770 = vmatprep.subr.bf16.mxu1 %v9545_v2  ;;  %v2988_v2 = vsub.f32 %v2986_v29, %v2987_v47 }
 0x149   : > { %v919_v6 = vadd.f32 %v6488_v61, %v811_v17  ;;  %2809 = vmatmul.mubr.f32.vlgmr.msra.gmra.mrb[16].mxu0 %v9572_v30  ;;  %v3000_v11 = vand.u32 4294901760, %v2999_v53  ;;  %v3468_v17 = vsub.f32 %v3378_v44, %v3386_v50 }
 0x14a   : > { %7788 = vmatpush3.bf16.msra.mxu0 %v7778_v3  ;;  %7070 = vmatprep.mubr.msk.f32.mxu0 %vm8093_vm1, %v8094_v18 }
 0x14b   : > { %7772 = vmatpush3.bf16.msra.mxu1 %v9630_v55  ;;  %7789 = vmatprep.subr.bf16.mxu0 %v8092_v43  ;;  %v2989_v55 = vand.u32 4294901760, %v2988_v2  ;;  %v3469_v21 = vand.u32 4294901760, %v3468_v17 }
 0x14c   : > { %7774 = vmatprep.subr.bf16.mxu1 %v9632_v52  ;;  %v7781_v52 = vpack.c.bf16 %v3007_v58, %v3000_v11 }
 0x14d   : > { %7071 = vmatmul.mubr.f32.vlgmr.msra.gmra.mrb[18].mxu0 %v2987_v47 }
 0x14e   : > { %7791 = vmatpush3.bf16.msra.mxu0 %v7790_v35  ;;  %7077 = vmatprep.mubr.msk.f32.mxu0 %vm8093_vm1, %v8094_v18 }
 0x14f   : > { %7776 = vmatpush3.bf16.msra.mxu1 %v9655_v51  ;;  %7792 = vmatprep.subr.bf16.mxu0 %v8092_v43 }
 0x150   : > { %7777 = vmatprep.subr.bf16.mxu1 %v8092_v43 }
 0x152   : > { %2913 = vmatmul.mubr.f32.vlgmr.msra.gmra.mrb[16].mxu1 %v9572_v30  ;;  %v7784_v30 = vpack.c.bf16 %v3004_v28, %v2997_v19  ;;  %v3470_v19 = vsub.f32 %v3468_v17, %v3469_v21 }
 0x153   : > { %7779 = vmatpush3.bf16.msra.mxu1 %v7778_v3  ;;  %7049 = vmatprep.mubr.msk.f32.mxu1 %vm8093_vm1, %v8094_v18 }
 0x154   : > { %7780 = vmatprep.subr.bf16.mxu1 %v8092_v43 }
 0x155   : > { %7078 = vmatmul.mubr.f32.vlgmr.msra.gmra.mrb[18].mxu0 %v2985_v7 }
 0x156   : > { %7050 = vmatmul.mubr.f32.vlgmr.msra.gmra.mrb[18].mxu1 %v2989_v55  ;;  %7794 = vmatpush3.bf16.msra.mxu0 %v7778_v3  ;;  %v7802_v3 = vpack.c.bf16 %v3468_v17, %v3461_v20 }
 0x157   : > { %7782 = vmatpush3.bf16.msra.mxu1 %v7781_v52  ;;  %7056 = vmatprep.mubr.msk.f32.mxu1 %vm8093_vm1, %v8094_v18 }
 0x158   : > { %7084 = vmatprep.mubr.msk.f32.mxu0 %vm8093_vm1, %v8094_v18  ;;  %7783 = vmatprep.subr.bf16.mxu1 %v8092_v43 }
 0x159   : > { %7129 = vmatprep.subr.mxu0 %v8094_v18 }
 0x15c   : > { %v6521_v51 = vpop.f32.mrb[4].mxu0 }
 0x15d   : > { %v6522_v0 = vpop.f32.mrb[5].mxu0  ;;  %7085 = vmatmul.mubr.f32.vlgmr.msra.gmra.mrb[18].mxu0 %v2985_v7 }
 0x15e   : > { %v6523_v48 = vadd.f32 %v6522_v0, %v6521_v51  ;;  %7057 = vmatmul.mubr.f32.vlgmr.msra.gmra.mrb[18].mxu1 %v2985_v7  ;;  %7131 = vmatprep.mubr.msk.f32.mxu0 %vm8093_vm1, %v8094_v18  ;;  %v3462_v7 = vand.u32 4294901760, %v3461_v20 }
 0x15f   : > { %7785 = vmatpush3.bf16.msra.mxu1 %v7784_v30  ;;  %7063 = vmatprep.mubr.msk.f32.mxu1 %vm8093_vm1, %v8094_v18 }
 0x160   : > { %v1087_v40 = vadd.f32 %v6523_v48, %v919_v6  ;;  %7795 = vmatprep.subr.bf16.mxu1 %v8092_v43  ;;  %v3463_v60 = vsub.f32 %v3461_v20, %v3462_v7  ;;  %v7808_v47 = vpack.c.bf16 %v3469_v21, %v3462_v7 }
 0x162   : > { %v3464_v45 = vand.u32 4294901760, %v3463_v60  ;;  %v4311_v60 = vld [vmem:[%s10163_s4 + $0x40] sm:$0xff] }
 0x165   : > { %v6556_v32 = vpop.f32.mrb[4].mxu1 }
 0x166   : > { %v6557_v49 = vpop.f32.mrb[5].mxu1  ;;  %7064 = vmatmul.mubr.f32.vlgmr.msra.gmra.mrb[18].mxu1 %v2986_v29  ;;  %v3471_v29 = vand.u32 4294901760, %v3470_v19  ;;  %v4306_v19 = vld [vmem:[%s10163_s4 + $0x18] sm:$0xff] }
 0x167   : > { %v6558_v57 = vadd.f32 %v6557_v49, %v6556_v32  ;;  %7091 = vmatprep.mubr.msk.f32.mxu1 %vm8093_vm1, %v8094_v18  ;;  %7797 = vmatpush3.bf16.msra.mxu1 %v9845_v4 }
 0x168   : > { %7798 = vmatprep.subr.bf16.mxu1 %v8092_v43  ;;  %v7799_v34 = vpack.c.bf16 %v3471_v29, %v3464_v45  ;;  %v4324_v45 = vand.u32 4294901760, %v4311_v60  ;;  %v4313_v29 = vld [vmem:[%s10163_s4 + $0x50] sm:$0xff] }
 0x169   : > { %v1191_v13 = vadd.f32 %v6558_v57, %v1087_v40 }
 0x17c   : > { %v6591_v14 = vpop.f32.mrb[6].mxu0 }
 0x17d   : > { %v6592_v33 = vpop.f32.mrb[7].mxu0 }
 0x17e   : > { %v6593_v54 = vadd.f32 %v6592_v33, %v6591_v14 }
 0x180   : > { %v1303_v62 = vadd.f32 %v6593_v54, %v1191_v13 }
 0x185   : > { %v6626_v5 = vpop.f32.mrb[6].mxu1 }
 0x186   : > { %v6627_v8 = vpop.f32.mrb[7].mxu1 }
 0x187   : > { %v6628_v24 = vadd.f32 %v6627_v8, %v6626_v5 }
 0x189   : > { %v1535_v12 = vadd.f32 %v6628_v24, %v1303_v62 }
 0x19c   : > { %v6661_v42 = vpop.f32.mrb[8].mxu0 }
 0x19d   : > { %v6662_v37 = vpop.f32.mrb[9].mxu0 }
 0x19e   : > { %v6663_v31 = vadd.f32 %v6662_v37, %v6661_v42 }
 0x1a0   : > { %v1673_v41 = vadd.f32 %v6663_v31, %v1535_v12 }
 0x1a5   : > { %v6696_v25 = vpop.f32.mrb[8].mxu1 }
 0x1a6   : > { %v6697_v1 = vpop.f32.mrb[9].mxu1 }
 0x1a7   : > { %v6698_v59 = vadd.f32 %v6697_v1, %v6696_v25 }
 0x1a9   : > { %v1781_v46 = vadd.f32 %v6698_v59, %v1673_v41 }
 0x1bc   : > { %v6731_v15 = vpop.f32.mrb[10].mxu0 }
 0x1bd   : > { %v6732_v16 = vpop.f32.mrb[11].mxu0 }
 0x1be   : > { %v6733_v10 = vadd.f32 %v6732_v16, %v6731_v15 }
 0x1c0   : > { %v1949_v38 = vadd.f32 %v6733_v10, %v1781_v46  ;;  %v3842_v46 = vld [vmem:[%s10162_s3] sm:$0xf] }
 0x1c1   : > { %v3849_v15 = vsel %vm3847_vm2, %v3842_v46, 0 }
 0x1c2   : > { %v3852_v16 = vand.u32 4294901760, %v3849_v15 }
 0x1c4   : > { %7130 = vmatpush3.msra.mxu0 %v3852_v16  ;;  %v3929_v10 = vsub.f32 %v3849_v15, %v3852_v16 }
 0x1c5   : > { %v6766_v26 = vpop.f32.mrb[10].mxu1  ;;  %7134 = vmatprep.subr.mxu0 %v8094_v18 }
 0x1c6   : > { %v6767_v63 = vpop.f32.mrb[11].mxu1  ;;  %v3930_v50 = vand.u32 4294901760, %v3929_v10 }
 0x1c7   : > { %v6768_v36 = vadd.f32 %v6767_v63, %v6766_v26 }
 0x1c8   : > { %v3931_v17 = vsub.f32 %v3929_v10, %v3930_v50 }
 0x1c9   : > { %v2053_v28 = vadd.f32 %v6768_v36, %v1949_v38  ;;  %v4304_v36 = vld [vmem:[%s10163_s4 + $0x8] sm:$0xff] }
 0x1ca   : > { %v3932_v7 = vand.u32 4294901760, %v3931_v17 }
 0x1dc   : > { %v6801_v23 = vpop.f32.mrb[12].mxu0 }
 0x1dd   : > { %v6802_v39 = vpop.f32.mrb[13].mxu0 }
 0x1de   : > { %v6803_v61 = vadd.f32 %v6802_v39, %v6801_v23  ;;  %v4310_v23 = vld [vmem:[%s10163_s4 + $0x38] sm:$0xff]  ;;  %v4815_v39 = vand.u32 4294901760, %v4313_v29 }
 0x1e0   : > { %v2165_v6 = vadd.f32 %v6803_v61, %v2053_v28  ;;  %v4320_v28 = vand.u32 4294901760, %v4304_v36 }
 0x1e5   : > { %v6836_v35 = vpop.f32.mrb[12].mxu1 }
 0x1e6   : > { %v6837_v53 = vpop.f32.mrb[13].mxu1 }
 0x1e7   : > { %v6838_v27 = vadd.f32 %v6837_v53, %v6836_v35  ;;  %v4312_v35 = vld [vmem:[%s10163_s4 + $0x48] sm:$0xff]  ;;  %v9910_v53 = vpack.c.bf16 %v4324_v45, %v4320_v28 }
 0x1e9   : > { %v2397_v2 = vadd.f32 %v6838_v27, %v2165_v6  ;;  %v4326_v6 = vand.u32 4294901760, %v4310_v23  ;;  %v9912_v27 = vsub.f32 %v4304_v36, %v4320_v28 }
 0x1fc   : > { %v6871_v11 = vpop.f32.mrb[14].mxu0 }
 0x1fd   : > { %v6872_v58 = vpop.f32.mrb[15].mxu0 }
 0x1fe   : > { %v6873_v55 = vadd.f32 %v6872_v58, %v6871_v11 }
 0x200   : > { %v2535_v52 = vadd.f32 %v6873_v55, %v2397_v2  ;;  %v9914_v2 = vsub.f32 %v4311_v60, %v4324_v45  ;;  %v9920_v55 = vsub.f32 %v4313_v29, %v4815_v39 }
 0x202   : > { %v7821_v17 = vpack.c.bf16 %v9914_v2, %v9912_v27 }
 0x205   : > { %v6906_v30 = vpop.f32.mrb[14].mxu1 }
 0x206   : > { %v6907_v51 = vpop.f32.mrb[15].mxu1 }
 0x207   : > { %v6908_v0 = vadd.f32 %v6907_v51, %v6906_v30  ;;  %v9927_v51 = vsub.f32 %v4310_v23, %v4326_v6 }
 0x209   : > { %v2643_v48 = vadd.f32 %v6908_v0, %v2535_v52 }
 0x21c   : > { %v6941_v40 = vpop.f32.mrb[16].mxu0 }
 0x21d   : > { %v6942_v32 = vpop.f32.mrb[17].mxu0 }
 0x21e   : > { %v6943_v49 = vadd.f32 %v6942_v32, %v6941_v40  ;;  %v4402_v40 = vand.u32 4294901760, %v9912_v27  ;;  %v4414_v32 = vand.u32 4294901760, %v9914_v2 }
 0x220   : > { %v2811_v57 = vadd.f32 %v6943_v49, %v2643_v48  ;;  %v4817_v48 = vand.u32 4294901760, %v4312_v35 }
 0x225   : > { %v6976_v13 = vpop.f32.mrb[16].mxu1 }
 0x226   : > { %v6977_v14 = vpop.f32.mrb[17].mxu1 }
 0x227   : > { %v6978_v33 = vadd.f32 %v6977_v14, %v6976_v13  ;;  %v4905_v13 = vand.u32 4294901760, %v9920_v55 }
 0x229   : > { %v2915_v54 = vadd.f32 %v6978_v33, %v2811_v57 }
 0x230   : > { %v3373_v62 = vpop.f32.mrb[18].mxu0 }
 0x231   : > { %v7086_v5 = vpop.f32.mrb[19].mxu0 }
 0x232   : > { %v4415_v5 = vsub.f32 %v9914_v2, %v4414_v32  ;;  %v4308_v2 = vld [vmem:[%s10163_s4 + $0x28] sm:$0xff] }
 0x239   : > { %v3148_v8 = vpop.f32.mrb[18].mxu1 }
 0x23a   : > { %v7903_v24 = vadd.f32 %v3148_v8, %v2915_v54  ;;  %v7065_v12 = vpop.f32.mrb[19].mxu1  ;;  %v4910_v54 = vsub.f32 %v4312_v35, %v4817_v48 }
 0x23c   : > { %v7904_v42 = vadd.f32 %v7903_v24, %v3373_v62  ;;  %v4403_v62 = vsub.f32 %v9912_v27, %v4402_v40  ;;  %v4420_v24 = vand.u32 4294901760, %v9927_v51 }
 0x23e   : > { %v3380_v37 = vsel %vm328_vm0, %v7904_v42, 0  ;;  %v4404_v42 = vand.u32 4294901760, %v4403_v62 }
 0x23f   : > { %v3449_v31 = vand.u32 4294901760, %v3380_v37 }
 0x241   : > { %v3450_v41 = vsub.f32 %v3380_v37, %v3449_v31  ;;  %v4906_v37 = vsub.f32 %v9920_v55, %v4905_v13 }
 0x243   : > { %v3451_v25 = vand.u32 4294901760, %v3450_v41  ;;  %v4907_v15 = vand.u32 4294901760, %v4906_v37 }
 0x245   : > { %v3452_v1 = vsub.f32 %v3450_v41, %v3451_v25 }
 0x247   : > { %v3453_v59 = vand.u32 4294901760, %v3452_v1 }
 0x249   : > { %7092 = vmatmul.mubr.f32.vlgmr.msra.gmra.mrb[20].mxu1 %v3453_v59  ;;  %v4421_v59 = vsub.f32 %v9927_v51, %v4420_v24 }
 0x24a   : > { %7800 = vmatpush3.bf16.msra.mxu1 %v7799_v34  ;;  %7098 = vmatprep.mubr.msk.f32.mxu1 %vm8093_vm1, %v8094_v18  ;;  %v4811_v34 = vand.u32 4294901760, %v4306_v19 }
 0x24b   : > { %7801 = vmatprep.subr.bf16.mxu1 %v8092_v43 }
 0x24c   : > { %v9916_v11 = vsub.f32 %v4306_v19, %v4811_v34  ;;  %v9918_v58 = vpack.c.bf16 %v4815_v39, %v4811_v34 }
 0x24e   : > { %v4893_v57 = vand.u32 4294901760, %v9916_v11 }
 0x250   : > { %v4894_v12 = vsub.f32 %v9916_v11, %v4893_v57  ;;  %v7853_v60 = vpack.c.bf16 %v4905_v13, %v4893_v57 }
 0x251   : > { %7099 = vmatmul.mubr.f32.vlgmr.msra.gmra.mrb[20].mxu1 %v3449_v31 }
 0x252   : > { %7803 = vmatpush3.bf16.msra.mxu1 %v7802_v3  ;;  %7105 = vmatprep.mubr.msk.f32.mxu1 %vm8093_vm1, %v8094_v18  ;;  %v4303_v3 = vld [vmem:[%s10163_s4] sm:$0xff]  ;;  %v4895_v46 = vand.u32 4294901760, %v4894_v12 }
 0x253   : > { %7804 = vmatprep.subr.bf16.mxu1 %v8092_v43  ;;  %v4322_v61 = vand.u32 4294901760, %v4303_v3 }
 0x255   : > { %v9922_v52 = vpack.c.bf16 %v4326_v6, %v4322_v61  ;;  %v9924_v30 = vsub.f32 %v4303_v3, %v4322_v61 }
 0x257   : > { %v4408_v49 = vand.u32 4294901760, %v9924_v30 }
 0x259   : > { %7106 = vmatmul.mubr.f32.vlgmr.msra.gmra.mrb[20].mxu1 %v3450_v41  ;;  %v4409_v8 = vsub.f32 %v9924_v30, %v4408_v49  ;;  %v4911_v41 = vand.u32 4294901760, %v4910_v54  ;;  %v7831_v36 = vpack.c.bf16 %v4420_v24, %v4408_v49 }
 0x25a   : > { %7806 = vmatpush3.bf16.msra.mxu1 %v9845_v4  ;;  %7112 = vmatprep.mubr.msk.f32.mxu1 %vm8093_vm1, %v8094_v18 }
 0x25b   : > { %7807 = vmatprep.subr.bf16.mxu1 %v8092_v43  ;;  %v4410_v1 = vand.u32 4294901760, %v4409_v8 }
 0x261   : > { %7113 = vmatmul.mubr.f32.vlgmr.msra.gmra.mrb[20].mxu1 %v3451_v25  ;;  %v4416_v25 = vand.u32 4294901760, %v4415_v5 }
 0x262   : > { %7809 = vmatpush3.bf16.msra.mxu1 %v7808_v47  ;;  %7119 = vmatprep.mubr.msk.f32.mxu1 %vm8093_vm1, %v8094_v18  ;;  %v4305_v47 = vld [vmem:[%s10163_s4 + $0x10] sm:$0xff] }
 0x263   : > { %7810 = vmatprep.subr.bf16.mxu1 %v8092_v43  ;;  %v4813_v0 = vand.u32 4294901760, %v4305_v47 }
 0x265   : > { %v9936_v14 = vpack.c.bf16 %v4817_v48, %v4813_v0  ;;  %v4898_v33 = vsub.f32 %v4305_v47, %v4813_v0  ;;  %v4316_v0 = vld [vmem:[%s10163_s4 + $0x68] sm:$0xff]  ;;  %v5302_v48 = vand.u32 4294901760, %v4308_v2 }
 0x266   : > { %v5797_v13 = vand.u32 4294901760, %v4316_v0 }
 0x268   : > { %v10011_v24 = vsub.f32 %v4316_v0, %v5797_v13 }
 0x269   : > { %7120 = vmatmul.mubr.f32.vlgmr.msra.gmra.mrb[20].mxu1 %v3449_v31 }
 0x26a   : > { %7812 = vmatpush3.bf16.msra.mxu1 %v9845_v4  ;;  %7126 = vmatprep.mubr.msk.f32.mxu1 %vm8093_vm1, %v8094_v18 }
 0x26b   : > { %7814 = vmatprep.subr.bf16.mxu1 %v9910_v53 }
 0x271   : > { %7127 = vmatmul.mubr.f32.vlgmr.msra.gmra.mrb[20].mxu1 %v3449_v31  ;;  %v4899_v31 = vand.u32 4294901760, %v4898_v33 }
 0x272   : > { %4388 = vmatprep.mubr.f32.mxu1 %v8094_v18  ;;  %7816 = vmatpush1.bf16.msra.mxu1 %v9922_v52 }
 0x273   : > { %v7855_v19 = vpack.c.bf16 %v4911_v41, %v4899_v31 }
 0x344   : > { %v3837_v38 = vpop.f32.mrb[20].mxu1 }
 0x345   : > { %v3841_v56 = vmax.f32 %v3837_v38, 0.0  ;;  %v7128_v44 = vpop.f32.mrb[21].mxu1  ;;  %v7817_v38 = vpack.c.bf16 %v4416_v25, %v4404_v42  ;;  %v5880_v25 = vand.u32 4294901760, %v10011_v24 }
 0x346   : > { %v7841_v44 = vpack.c.bf16 %v4907_v15, %v4895_v46 }
 0x347   : > { %v3845_v22 = vsel %vm3843_vm3, %v3841_v56, 0  ;;  %v4422_v56 = vand.u32 4294901760, %v4421_v59  ;;  %7818 = vmatprep.subr.bf16.mxu1 %v7817_v38 }
 0x348   : > { %v3917_v4 = vand.u32 4294901760, %v3845_v22 }
 0x34a   : > { %v3918_v20 = vsub.f32 %v3845_v22, %v3917_v4 }
 0x34c   : > { %v3919_v26 = vand.u32 4294901760, %v3918_v20 }
 0x34e   : > { %v3920_v63 = vsub.f32 %v3918_v20, %v3919_v26 }
 0x350   : > { %v3921_v21 = vand.u32 4294901760, %v3920_v63  ;;  %v7845_v63 = vpack.c.bf16 %v9920_v55, %v9916_v11  ;;  %v4315_v11 = vld [vmem:[%s10163_s4 + $0x60] sm:$0xff] }
 0x351   : > { %v4307_v55 = vld [vmem:[%s10163_s4 + $0x20] sm:$0xff] }
 0x352   : > { %7132 = vmatmul.mubr.f32.vlgmr.msra.gmra.mrb[20].mxu0 %v3921_v21  ;;  %v7829_v21 = vpack.c.bf16 %v4414_v32, %v4402_v40  ;;  %v5306_v40 = vand.u32 4294901760, %v4315_v11  ;;  %v5304_v32 = vand.u32 4294901760, %v4307_v55 }
 0x353   : > { %7135 = vmatpush3.msra.mxu0 %v3932_v7  ;;  %7136 = vmatprep.mubr.msk.f32.mxu0 %vm8093_vm1, %v8094_v18  ;;  %v7847_v7 = vpack.c.bf16 %v4910_v54, %v4898_v33 }
 0x354   : > { %7139 = vmatprep.subr.mxu0 %v8094_v18  ;;  %v10005_v62 = vsub.f32 %v4307_v55, %v5304_v32 }
 0x356   : > { %v5390_v37 = vand.u32 4294901760, %v10005_v62 }
 0x35a   : > { %7137 = vmatmul.mubr.f32.vlgmr.msra.gmra.mrb[20].mxu0 %v3917_v4 }
 0x35b   : > { %7140 = vmatpush3.msra.mxu0 %v3929_v10  ;;  %7141 = vmatprep.mubr.msk.f32.mxu0 %vm8093_vm1, %v8094_v18  ;;  %v4912_v10 = vsub.f32 %v4910_v54, %v4911_v41  ;;  %v10001_v54 = vsub.f32 %v4315_v11, %v5306_v40 }
 0x35c   : > { %7144 = vmatprep.subr.mxu0 %v8094_v18 }
 0x35d   : > { %v5396_v42 = vand.u32 4294901760, %v10001_v54 }
 0x362   : > { %7142 = vmatmul.mubr.f32.vlgmr.msra.gmra.mrb[20].mxu0 %v3918_v20 }
 0x363   : > { %7145 = vmatpush3.msra.mxu0 %v3852_v16  ;;  %7146 = vmatprep.mubr.msk.f32.mxu0 %vm8093_vm1, %v8094_v18 }
 0x364   : > { %7149 = vmatprep.subr.mxu0 %v8094_v18 }
 0x36a   : > { %7147 = vmatmul.mubr.f32.vlgmr.msra.gmra.mrb[20].mxu0 %v3919_v26  ;;  %v7823_v26 = vpack.c.bf16 %v9927_v51, %v9924_v30  ;;  %v4314_v30 = vld [vmem:[%s10163_s4 + $0x58] sm:$0xff]  ;;  %v4309_v51 = vld [vmem:[%s10163_s4 + $0x30] sm:$0xff] }
 0x36b   : > { %7150 = vmatpush3.msra.mxu0 %v3930_v50  ;;  %7151 = vmatprep.mubr.msk.f32.mxu0 %vm8093_vm1, %v8094_v18  ;;  %v4913_v50 = vand.u32 4294901760, %v4912_v10  ;;  %v5308_v49 = vand.u32 4294901760, %v4314_v30  ;;  %v5794_v57 = vand.u32 4294901760, %v4309_v51 }
 0x36c   : > { %7154 = vmatprep.subr.mxu0 %v8094_v18 }
 0x36d   : > { %v10007_v5 = vsub.f32 %v4314_v30, %v5308_v49  ;;  %v10009_v8 = vsub.f32 %v4309_v51, %v5794_v57  ;;  %v7863_v10 = vpack.c.bf16 %v5308_v49, %v5304_v32  ;;  %v7886_v38 = vpack.c.bf16 %v5797_v13, %v5794_v57  ;;  %v8027_v51 = vld [vmem:[%s8455_s9 + $0x28] sm:$0xff] }
 0x36f   : > { %v5873_v41 = vand.u32 4294901760, %v10009_v8 }
 0x371   : > { %v5874_v15 = vsub.f32 %v10009_v8, %v5873_v41 }
 0x372   : > { %7152 = vmatmul.mubr.f32.vlgmr.msra.gmra.mrb[20].mxu0 %v3917_v4 }
 0x373   : > { %7155 = vmatpush3.msra.mxu0 %v3852_v16  ;;  %7156 = vmatprep.mubr.msk.f32.mxu0 %vm8093_vm1, %v8094_v18  ;;  %v4900_v16 = vsub.f32 %v4898_v33, %v4899_v31  ;;  %v9999_v33 = vsub.f32 %v4308_v2, %v5302_v48  ;;  %v5402_v31 = vand.u32 4294901760, %v10007_v5 }
 0x374   : > { %7838 = vmatprep.subr.bf16.mxu0 %v9918_v58 }
 0x375   : > { %v4901_v22 = vand.u32 4294901760, %v4900_v16  ;;  %v5384_v12 = vand.u32 4294901760, %v9999_v33  ;;  %v5403_v46 = vsub.f32 %v10007_v5, %v5402_v31  ;;  %v5881_v16 = vsub.f32 %v10011_v24, %v5880_v25 }
 0x377   : > { %v7843_v20 = vpack.c.bf16 %v4913_v50, %v4901_v22  ;;  %v5385_v59 = vsub.f32 %v9999_v33, %v5384_v12  ;;  %v5875_v22 = vand.u32 4294901760, %v5874_v15  ;;  %v5882_v50 = vand.u32 4294901760, %v5881_v16 }
 0x37a   : > { %7157 = vmatmul.mubr.f32.vlgmr.msra.gmra.mrb[20].mxu0 %v3917_v4  ;;  %v7819_v4 = vpack.c.bf16 %v4422_v56, %v4410_v1  ;;  %v10023_v1 = vpack.c.bf16 %v5306_v40, %v5302_v48 }
 0x37b   : > { %4879 = vmatprep.mubr.f32.mxu0 %v8094_v18  ;;  %7840 = vmatpush1.bf16.msra.mxu0 %v9936_v14 }
 0x37c   : > { %7842 = vmatprep.subr.bf16.mxu0 %v7841_v44  ;;  %v5404_v44 = vand.u32 4294901760, %v5403_v46 }
 0x44d   : > { %v4293_v28 = vpop.f32.mrb[20].mxu0 }
 0x44e   : > { %v6345_v45 = vmul.f32 -1.442695, %v4293_v28  ;;  %v7158_v29 = vpop.f32.mrb[21].mxu0  ;;  %v8022_v28 = vld [vmem:[%s8455_s9] sm:$0xff] }
 0x44f   : > { %v8023_v29 = vld [vmem:[%s8455_s9 + $0x10] sm:$0xff] }
 0x450   : > { %8018 = vpow2.f32 %v6345_v45 }
 0x45a   : > { %v8019_v34 = vpop.eup %8018 }
 0x45b   : > { %v4300_v3 = vadd.f32 1.0, %v8019_v34 }
 0x45d   : > { %8020 = vrcp.f32 %v4300_v3 }
 0x467   : > { %v8021_v23 = vpop.eup %8020 }
 0x468   : > { %v4318_v39 = vsel %vm328_vm0, %v8021_v23, 0 }
 0x469   : > { %v9953_v61 = vand.u32 4294901760, %v4318_v39 }
 0x46b   : > { %v9956_v6 = vsub.f32 %v4318_v39, %v9953_v61  ;;  %v8024_v39 = vld [vmem:[%s8455_s9 + $0x8] sm:$0xff] }
 0x46d   : > { %v9959_v47 = vand.u32 4294901760, %v9956_v6 }
 0x46f   : > { %v4392_v35 = vsub.f32 %v9956_v6, %v9959_v47 }
 0x471   : > { %v9963_v27 = vand.u32 4294901760, %v4392_v35 }
 0x473   : > { %4394 = vmatmul.mubr.f32.vlgmr.msra.gmra.mrb[22].mxu1 %v9963_v27  ;;  %4885 = vmatmul.mubr.f32.vlgmr.msra.gmra.mrb[22].mxu0 %v9963_v27 }
 0x474   : > { %7820 = vmatpush1.bf16.msra.mxu1 %v7819_v4  ;;  %7844 = vmatpush1.bf16.msra.mxu0 %v7843_v20 }
 0x475   : > { %4484 = vmatprep.mubr.f32.mxu1 %v8094_v18  ;;  %4975 = vmatprep.mubr.f32.mxu0 %v8094_v18 }
 0x476   : > { %7822 = vmatprep.subr.bf16.mxu1 %v7821_v17  ;;  %7846 = vmatprep.subr.bf16.mxu0 %v7845_v63  ;;  %v7889_v17 = vpack.c.bf16 %v5882_v50, %v5875_v22  ;;  %v7871_v63 = vpack.c.bf16 %v10007_v5, %v10005_v62 }
 0x47b   : > { %4486 = vmatmul.mubr.f32.vlgmr.msra.gmra.mrb[22].mxu1 %v9953_v61  ;;  %4977 = vmatmul.mubr.f32.vlgmr.msra.gmra.mrb[22].mxu0 %v9953_v61 }
 0x47c   : > { %7824 = vmatpush1.bf16.msra.mxu1 %v7823_v26  ;;  %7848 = vmatpush1.bf16.msra.mxu0 %v7847_v7  ;;  %v7869_v26 = vpack.c.bf16 %v10001_v54, %v9999_v33  ;;  %v7892_v7 = vpack.c.bf16 %v10011_v24, %v10009_v8 }
 0x47d   : > { %4564 = vmatprep.mubr.f32.mxu1 %v8094_v18  ;;  %5055 = vmatprep.mubr.f32.mxu0 %v8094_v18 }
 0x47e   : > { %7826 = vmatprep.subr.bf16.mxu1 %v9910_v53  ;;  %7850 = vmatprep.subr.bf16.mxu0 %v9918_v58 }
 0x483   : > { %4567 = vmatmul.mubr.f32.vlgmr.msra.gmra.mrb[22].mxu1 %v9956_v6  ;;  %5058 = vmatmul.mubr.f32.vlgmr.msra.gmra.mrb[22].mxu0 %v9956_v6 }
 0x484   : > { %7828 = vmatpush1.bf16.msra.mxu1 %v9922_v52  ;;  %7852 = vmatpush1.bf16.msra.mxu0 %v9936_v14 }
 0x485   : > { %4641 = vmatprep.mubr.f32.mxu1 %v8094_v18  ;;  %5132 = vmatprep.mubr.f32.mxu0 %v8094_v18 }
 0x486   : > { %7830 = vmatprep.subr.bf16.mxu1 %v7829_v21  ;;  %7854 = vmatprep.subr.bf16.mxu0 %v7853_v60  ;;  %v7877_v21 = vpack.c.bf16 %v5396_v42, %v5384_v12  ;;  %v7898_v60 = vpack.c.bf16 %v5880_v25, %v5873_v41 }
 0x48b   : > { %4645 = vmatmul.mubr.f32.vlgmr.msra.gmra.mrb[22].mxu1 %v9959_v47  ;;  %5136 = vmatmul.mubr.f32.vlgmr.msra.gmra.mrb[22].mxu0 %v9959_v47 }
 0x48c   : > { %7832 = vmatpush1.bf16.msra.mxu1 %v7831_v36  ;;  %7856 = vmatpush1.bf16.msra.mxu0 %v7855_v19  ;;  %v7879_v36 = vpack.c.bf16 %v5402_v31, %v5390_v37 }
 0x48d   : > { %4727 = vmatprep.mubr.f32.mxu1 %v8094_v18  ;;  %5218 = vmatprep.mubr.f32.mxu0 %v8094_v18 }
 0x48e   : > { %7834 = vmatprep.subr.bf16.mxu1 %v9910_v53  ;;  %7858 = vmatprep.subr.bf16.mxu0 %v9918_v58  ;;  %v5397_v53 = vsub.f32 %v10001_v54, %v5396_v42  ;;  %v5391_v58 = vsub.f32 %v10005_v62, %v5390_v37 }
 0x490   : > { %v5392_v56 = vand.u32 4294901760, %v5391_v58 }
 0x492   : > { %v7867_v20 = vpack.c.bf16 %v5404_v44, %v5392_v56 }
 0x493   : > { %4729 = vmatmul.mubr.f32.vlgmr.msra.gmra.mrb[22].mxu1 %v9953_v61  ;;  %5220 = vmatmul.mubr.f32.vlgmr.msra.gmra.mrb[22].mxu0 %v9953_v61 }
 0x494   : > { %7836 = vmatpush1.bf16.msra.mxu1 %v9922_v52  ;;  %7860 = vmatpush1.bf16.msra.mxu0 %v9936_v14  ;;  %v5386_v52 = vand.u32 4294901760, %v5385_v59  ;;  %v5398_v14 = vand.u32 4294901760, %v5397_v53 }
 0x495   : > { %4803 = vmatprep.mubr.f32.mxu1 %v8094_v18  ;;  %5294 = vmatprep.mubr.f32.mxu0 %v8094_v18 }
 0x496   : > { %7862 = vmatprep.subr.bf16.mxu1 %v10023_v1  ;;  %7885 = vmatprep.subr.bf16.mxu0 %v8092_v43  ;;  %v7865_v4 = vpack.c.bf16 %v5398_v14, %v5386_v52 }
 0x49b   : > { %4805 = vmatmul.mubr.f32.vlgmr.msra.gmra.mrb[22].mxu1 %v9953_v61  ;;  %5296 = vmatmul.mubr.f32.vlgmr.msra.gmra.mrb[22].mxu0 %v9953_v61 }
 0x49c   : > { %7864 = vmatpush1.bf16.msra.mxu1 %v7863_v10  ;;  %7887 = vmatpush3.bf16.msra.mxu0 %v7886_v38 }
 0x49d   : > { %5370 = vmatprep.mubr.f32.mxu1 %v8094_v18  ;;  %7163 = vmatprep.mubr.msk.f32.mxu0 %vm8093_vm1, %v8094_v18 }
 0x49e   : > { %7866 = vmatprep.subr.bf16.mxu1 %v7865_v4  ;;  %7888 = vmatprep.subr.bf16.mxu0 %v8092_v43 }
 0x49f   : > { %5376 = vmatmul.mubr.f32.vlgmr.msra.gmra.mrb[24].mxu1 %v9963_v27  ;;  %7164 = vmatmul.mubr.f32.vlgmr.msra.gmra.mrb[24].mxu0 %v9963_v27  ;;  %v8026_v27 = vld [vmem:[%s8455_s9 + $0x20] sm:$0xff] }
 0x4a0   : > { %7868 = vmatpush1.bf16.msra.mxu1 %v7867_v20  ;;  %7890 = vmatpush3.bf16.msra.mxu0 %v7889_v17 }
 0x4a1   : > { %5466 = vmatprep.mubr.f32.mxu1 %v8094_v18  ;;  %7170 = vmatprep.mubr.msk.f32.mxu0 %vm8093_vm1, %v8094_v18 }
 0x4a2   : > { %7870 = vmatprep.subr.bf16.mxu1 %v7869_v26  ;;  %7891 = vmatprep.subr.bf16.mxu0 %v8092_v43 }
 0x4a7   : > { %5468 = vmatmul.mubr.f32.vlgmr.msra.gmra.mrb[24].mxu1 %v9953_v61  ;;  %7171 = vmatmul.mubr.f32.vlgmr.msra.gmra.mrb[24].mxu0 %v9953_v61 }
 0x4a8   : > { %7872 = vmatpush1.bf16.msra.mxu1 %v7871_v63  ;;  %7893 = vmatpush3.bf16.msra.mxu0 %v7892_v7 }
 0x4a9   : > { %5546 = vmatprep.mubr.f32.mxu1 %v8094_v18  ;;  %7177 = vmatprep.mubr.msk.f32.mxu0 %vm8093_vm1, %v8094_v18 }
 0x4aa   : > { %7874 = vmatprep.subr.bf16.mxu1 %v10023_v1  ;;  %7894 = vmatprep.subr.bf16.mxu0 %v8092_v43 }
 0x4af   : > { %5549 = vmatmul.mubr.f32.vlgmr.msra.gmra.mrb[24].mxu1 %v9956_v6  ;;  %7178 = vmatmul.mubr.f32.vlgmr.msra.gmra.mrb[24].mxu0 %v9956_v6 }
 0x4b0   : > { %7876 = vmatpush1.bf16.msra.mxu1 %v7863_v10  ;;  %7896 = vmatpush3.bf16.msra.mxu0 %v7886_v38 }
 0x4b1   : > { %5623 = vmatprep.mubr.f32.mxu1 %v8094_v18  ;;  %7184 = vmatprep.mubr.msk.f32.mxu0 %vm8093_vm1, %v8094_v18 }
 0x4b2   : > { %7878 = vmatprep.subr.bf16.mxu1 %v7877_v21  ;;  %7897 = vmatprep.subr.bf16.mxu0 %v8092_v43 }
 0x4b7   : > { %5627 = vmatmul.mubr.f32.vlgmr.msra.gmra.mrb[24].mxu1 %v9959_v47  ;;  %7185 = vmatmul.mubr.f32.vlgmr.msra.gmra.mrb[24].mxu0 %v9959_v47 }
 0x4b8   : > { %7880 = vmatpush1.bf16.msra.mxu1 %v7879_v36  ;;  %7899 = vmatpush3.bf16.msra.mxu0 %v7898_v60 }
 0x4b9   : > { %5709 = vmatprep.mubr.f32.mxu1 %v8094_v18  ;;  %7191 = vmatprep.mubr.msk.f32.mxu0 %vm8093_vm1, %v8094_v18 }
 0x4ba   : > { %7882 = vmatprep.subr.bf16.mxu1 %v10023_v1  ;;  %7900 = vmatprep.subr.bf16.mxu0 %v8092_v43 }
 0x4bf   : > { %5711 = vmatmul.mubr.f32.vlgmr.msra.gmra.mrb[24].mxu1 %v9953_v61  ;;  %7192 = vmatmul.mubr.f32.vlgmr.msra.gmra.mrb[24].mxu0 %v9953_v61 }
 0x4c0   : > { %7884 = vmatpush1.bf16.msra.mxu1 %v7863_v10  ;;  %7902 = vmatpush3.bf16.msra.mxu0 %v7886_v38 }
 0x4c1   : > { %5785 = vmatprep.mubr.f32.mxu1 %v8094_v18  ;;  %7198 = vmatprep.mubr.msk.f32.mxu0 %vm8093_vm1, %v8094_v18  ;;  %v8025_v18 = vld [vmem:[%s8455_s9 + $0x18] sm:$0xff]  ;;  %s8095_s9 = smov [#allocation2]  }
 0x4c2   : > { %s8032_s26 = sshll.u32 %s8095_s9, 4  ;;  %s8033_s26 = int_to_ptr.vmem [resolvable:$false] %s8032_s26 }
 0x4c3   : > { %s8034_s30 = scalar_lea.vmem %s8033_s26, 1792  ;;  %p8035_p0 = scmp.lt.s32.totalorder %s10116_s15, %s8033_s26 }
 0x4c4   : > { %p8036_p1 = scmp.lt.s32.totalorder %s8034_s30, %s8028_s25 }
 0x4c6   : > { %p8037_p2 = por %p8036_p1, %p8035_p0 }
 0x4c7   : > { %5787 = vmatmul.mubr.f32.vlgmr.msra.gmra.mrb[24].mxu1 %v9953_v61  ;;  %7199 = vmatmul.mubr.f32.vlgmr.msra.gmra.mrb[24].mxu0 %v9953_v61 }
 0x4c8   : > { %p8038_p3 = pnand %p8037_p2, %p8031_p13 }
 0x56e   : > { %v4806_v43 = vpop.f32.mrb[22].mxu1  ;;  %v5297_v19 = vpop.f32.mrb[22].mxu0 }
 0x56f   : > { %v6252_v45 = vmul.f32 %v8022_v28, %v4806_v43  ;;  %v6254_v34 = vmul.f32 %v8023_v29, %v5297_v19  ;;  %v4808_v3 = vpop.f32.mrb[23].mxu1  ;;  %v5299_v23 = vpop.f32.mrb[23].mxu0 }
 0x570   : > { %v6253_v6 = vmul.f32 %v8024_v39, %v4808_v3  ;;  %v6255_v47 = vmul.f32 %v8025_v18, %v5299_v23 }
 0x571   : > { %6259 = vst [vmem:[%s217_s13] sm:$0xff] %v6252_v45  ;;  %6261 = vst [vmem:[%s217_s13 + $0x10] sm:$0xff] %v6254_v34 }
 0x572   : > { %6260 = vst [vmem:[%s217_s13 + $0x8] sm:$0xff] %v6253_v6  ;;  %6262 = vst [vmem:[%s217_s13 + $0x18] sm:$0xff] %v6255_v47 }
 0x59a   : > { %v5788_v61 = vpop.f32.mrb[24].mxu1  ;;  %v6248_v35 = vpop.f32.mrb[24].mxu0 }
 0x59b   : > { %v6256_v2 = vmul.f32 %v8026_v27, %v5788_v61  ;;  %v6258_v11 = vmul.f32 %v6248_v35, %v9781_v9  ;;  %v5790_v55 = vpop.f32.mrb[25].mxu1  ;;  %v7200_v30 = vpop.f32.mrb[25].mxu0 }
 0x59c   : > { %v6257_v0 = vmul.f32 %v8027_v51, %v5790_v55 }
 0x59d   : > { %6263 = vst [vmem:[%s217_s13 + $0x20] sm:$0xff] %v6256_v2  ;;  %6265 = vst.msk [vmem:[%s217_s13 + $0x30] sm:$0xff] %vm328_vm0, %v6258_v11 }
 0x59e   : > { %6264 = vst [vmem:[%s217_s13 + $0x28] sm:$0xff] %v6257_v0 }
 0x59f   : > { %8041 = shalt.err (!%p8038_p3)
}
 0x5a0   : > { %s8042_s6 = scalar_lea.hbm %s10114_s23, 896  ;;  %s8046_s10 = scalar_lea.hbm %s10164_s5, 2688 }
 0x5a1   : > { %p8043_p4 = scmp.ne.s32.totalorder %s10114_s23, %s8042_s6  ;;  %p8047_p9 = scmp.lt.u32.totalorder %s10114_s23, %s10164_s5 }
 0x5a2   : > { %p8048_p10 = scmp.lt.u32.totalorder %s8046_s10, %s8042_s6  ;;  %p8050_p12 = scmp.lt.u32.totalorder %s8042_s6, %s10114_s23 }
 0x5a3   : > { %p8044_p7 = pnand %p8043_p4, %p8164_p5 }
 0x5a4   : > { %p8049_p11 = por %p8048_p10, %p8047_p9 }
 0x5a5   : > { %p8045_p8 = pneg %p8044_p7 }
 0x5a6   : > { %p8051_p13 = por %p8050_p12, %p8049_p11 }
 0x5a8   : > { %p8052_p0 = pnand %p8051_p13, %p8045_p8 }
 0x5aa   : > { %8055 = shalt.err (!%p8052_p0)
}
 0x5ab   : > { %7976 = dma.vmem_to_hbm [thread:$0]  (%p8164_p5), %s10116_s15, 896, %s10114_s23, %s6267_s22  }
 0x5ac PF: > { %p7982_p1 = scmp.ge.s32.totalorder %s8090_s21, 2  ;;  %s6293_s13 = sand.u32 1, %s8078_s18  }
 0x5ad   : > { %s6294_s14 = scalar_lea.sflag [#allocation3], %s6293_s13 }
 0x5ae   : > { %p7979_p2 = pnand %p7982_p1, %p8168_p6 }
 0x5b0   : > { %8073 = dma.done.wait (!%p7979_p2), %s6294_s14, 896  }
 0x5b1   : > { %8075 = vsyncadd (!%p7979_p2), %s6294_s14, 4294966400  ;;  %p15_p3 = scmp.ge.s32.totalorder %s8151_s24, 5   ;;  %s10481_s18 = smov %s8082_s19 }
 0x5b2   : > { %s10482_s19 = smov %s8086_s20  ;;  %s10483_s20 = smov %s8162_s27 }
 0x5b3   : > { %s10484_s21 = smov %s8151_s24  ;;  %17 = sbr.rel (!%p15_p3) target bundleno = 3 (0x3), region = 75 }
 0x5ba   :  { %6299 = vsyncpa [#allocation3], 1 }
 0x5bb   :  { %6301 = vsyncpa [#allocation3 + $0x1], 1 }

// kernel: tpu_custom_call.1
= control target key start
LH: loop header
LB: loop body
LE: loop exit
PB: predicated region body
PF: predicated region fallthrough
CT: control target
= control target key end

     0   :  { %10 = vsyncpa [#allocation3], 0  ;;  %s2093_s0 = inlined_call_operand.vmem [shape: f32[20,784], index: 0, kind: input, shape index: {}]   ;;  %s2094_s1 = inlined_call_operand.vmem [shape: f32[784,16], index: 1, kind: input, shape index: {}]   ;;  %s2095_s2 = inlined_call_operand.vmem [shape: f32[16,4], index: 2, kind: input, shape index: {}]   ;;  %s2096_s3 = inlined_call_operand.vmem [shape: f32[4,16], index: 3, kind: input, shape index: {}]   ;;  %s2097_s4 = inlined_call_operand.vmem [shape: f32[16,784], index: 4, kind: input, shape index: {}]   ;;  %s2098_s5 = inlined_call_operand.hbm [shape: f32[20,784], index: 5, kind: output, shape index: {}]  }
   0x1   :  { %12 = vsyncpa [#allocation3 + $0x1], 0  ;;  %s1584_s18 = smov 0   ;;  %s1586_s19 = smov 0  }
   0x2   :  { %s1588_s20 = smov 0   ;;  %s1590_s21 = smov 0  }
   0x3 LB: > { %s1605_s22 = sadd.s32 4294967295, %s1548_s21   ;;  %s1161_s23 = sadd.s32 4294967294, %s1548_s21   ;;  %s1548_s21 = sphi %s1590_s21, %s2104_s21   ;;  %s1544_s20 = sphi %s1588_s20, %s2103_s20   ;;  %s1540_s19 = sphi %s1586_s19, %s2102_s19   ;;  %s1536_s18 = sphi %s1584_s18, %s2101_s18  }
   0x4   : > { %s1609_s24 = sadd.s32 1, %s1548_s21   ;;  %s135_s25 = sadd.s32 1, %s1544_s20 }
   0x5   : > { %s132_s26 = ssub.s32 %s1548_s21, %s1609_s24  ;;  %p145_p0 = scmp.ne.s32.totalorder %s1544_s20, %s1540_s19 }
   0x6   : > { %p133_p1 = scmp.eq.s32.totalorder %s132_s26, 0  ;;  %p146_p2 = scmp.eq.s32.totalorder %s1605_s22, 2 }
   0x7   : > { %p151_p3 = scmp.ne.s32.totalorder %s1540_s19, %s1536_s18  ;;  %p152_p4 = scmp.eq.s32.totalorder %s1161_s23, 2 }
   0x8   : > { %s1620_s27 = scalar_select %p133_p1, %s1544_s20, %s135_s25  }
   0x9   : > { %p1622_p5 = por %p146_p2, %p145_p0  ;;  %p1626_p6 = por %p152_p4, %p151_p3 }
   0xa   : > { %p1164_p7 = scmp.ge.s32.totalorder %s1548_s21, 1  ;;  %p190_p8 = scmp.lt.s32.totalorder %s1548_s21, 4 }
   0xc   : > { %p191_p9 = pnand %p1164_p7, %p190_p8 }
   0xd   : > { %v246_v0 = vld [vmem:[%s2094_s1 + $0x80] sm:$0xff] (!%p191_p9)  ;;  %v247_v1 = vld [vmem:[%s2094_s1 + $0x88] sm:$0xff] (!%p191_p9)  ;;  %v248_v11 = vld [vmem:[%s2094_s1 + $0x90] sm:$0xff] (!%p191_p9)  ;;  %p218_p10 = scmp.lt.s32.totalorder (!%p191_p9), %s1605_s22, 2  ;;  %vm1551_vm0 = vmmov (!%p191_p9), 0   ;;  %vm328_vm1 = vcmask (!%p191_p9), 130048  }
   0xe   : > { %194 = sbr.rel (%p191_p9) target bundleno = 992 (0x3e0), region = 40  ;;  %v278_v2 = vld [vmem:[%s2094_s1 + $0x180] sm:$0xff] (!%p191_p9)  ;;  %v1320_v3 = vpack.c.bf16 (!%p191_p9), %v247_v1, %v246_v0  ;;  %v279_v4 = vld [vmem:[%s2094_s1 + $0x188] sm:$0xff] (!%p191_p9)  ;;  %v249_v13 = vld [vmem:[%s2094_s1 + $0x98] sm:$0xff] (!%p191_p9)  ;;  %vm693_vm2 = vcmask (!%p191_p9), 1043456   ;;  %vm689_vm3 = vcmask (!%p191_p9), 31744  }
   0xf   : > { %v230_v5 = vld [vmem:[%s2094_s1] sm:$0xff] (!%p191_p9)  ;;  %v231_v6 = vld [vmem:[%s2094_s1 + $0x8] sm:$0xff] (!%p191_p9)  ;;  %v1352_v7 = vpack.c.bf16 (!%p191_p9), %v279_v4, %v278_v2  ;;  %v280_v14 = vld [vmem:[%s2094_s1 + $0x190] sm:$0xff] (!%p191_p9)  ;;  %v1324_v16 = vpack.c.bf16 (!%p191_p9), %v249_v13, %v248_v11  ;;  %s1439_s9 = smul.u32 (!%p191_p9), 896, %s1605_s22  ;;  %s1553_s17 = smov (!%p191_p9), [#allocation2]  }
  0x10   : > { %v1322_v8 = vpack.c.bf16 (!%p191_p9), %v231_v6, %v230_v5  ;;  %v262_v9 = vld [vmem:[%s2094_s1 + $0x100] sm:$0xff] (!%p191_p9)  ;;  %v263_v10 = vld [vmem:[%s2094_s1 + $0x108] sm:$0xff] (!%p191_p9)  ;;  %1321 = vmatprep.subr.bf16.mxu0 (!%p191_p9), %v1320_v3  ;;  %v281_v15 = vld [vmem:[%s2094_s1 + $0x198] sm:$0xff] (!%p191_p9)  ;;  %s1490_s23 = sshll.u32 (!%p191_p9), %s1553_s17, 4  ;;  %s1491_s23 = int_to_ptr.vmem [resolvable:$false] %s1490_s23 }
  0x11   : > { %v1354_v12 = vpack.c.bf16 (!%p191_p9), %v263_v10, %v262_v9  ;;  %1353 = vmatprep.subr.bf16.mxu1 (!%p191_p9), %v1352_v7  ;;  %v1356_v17 = vpack.c.bf16 (!%p191_p9), %v281_v15, %v280_v14  ;;  %v232_v18 = vld [vmem:[%s2094_s1 + $0x10] sm:$0xff] (!%p191_p9)  ;;  %v233_v19 = vld [vmem:[%s2094_s1 + $0x18] sm:$0xff] (!%p191_p9)  ;;  %v250_v23 = vld [vmem:[%s2094_s1 + $0xa0] sm:$0xff] (!%p191_p9)  ;;  %s2050_s14 = scalar_lea.hbm (!%p191_p9), %s2098_s5, %s1439_s9 }
  0x12   : > { %1323 = vmatpush3.bf16.msra.mxu0 (!%p191_p9), %v1322_v8  ;;  %v264_v20 = vld [vmem:[%s2094_s1 + $0x110] sm:$0xff] (!%p191_p9)  ;;  %v1326_v21 = vpack.c.bf16 (!%p191_p9), %v233_v19, %v232_v18  ;;  %v265_v22 = vld [vmem:[%s2094_s1 + $0x118] sm:$0xff] (!%p191_p9)  ;;  %v251_v24 = vld [vmem:[%s2094_s1 + $0xa8] sm:$0xff] (!%p191_p9) }
  0x13   : > { %1355 = vmatpush3.bf16.msra.mxu1 (!%p191_p9), %v1354_v12  ;;  %1325 = vmatprep.subr.bf16.mxu0 (!%p191_p9), %v1324_v16  ;;  %v1358_v25 = vpack.c.bf16 (!%p191_p9), %v265_v22, %v264_v20  ;;  %v1328_v26 = vpack.c.bf16 (!%p191_p9), %v251_v24, %v250_v23  ;;  %v282_v27 = vld [vmem:[%s2094_s1 + $0x1a0] sm:$0xff] (!%p191_p9)  ;;  %v283_v28 = vld [vmem:[%s2094_s1 + $0x1a8] sm:$0xff] (!%p191_p9)  ;;  %v252_v35 = vld [vmem:[%s2094_s1 + $0xb0] sm:$0xff] (!%p191_p9) }
  0x14   : > { %1357 = vmatprep.subr.bf16.mxu1 (!%p191_p9), %v1356_v17  ;;  %v234_v29 = vld [vmem:[%s2094_s1 + $0x20] sm:$0xff] (!%p191_p9)  ;;  %v1360_v30 = vpack.c.bf16 (!%p191_p9), %v283_v28, %v282_v27  ;;  %v235_v31 = vld [vmem:[%s2094_s1 + $0x28] sm:$0xff] (!%p191_p9)  ;;  %v253_v36 = vld [vmem:[%s2094_s1 + $0xb8] sm:$0xff] (!%p191_p9) }
  0x15   : > { %v266_v32 = vld [vmem:[%s2094_s1 + $0x120] sm:$0xff]  ;;  %v267_v33 = vld [vmem:[%s2094_s1 + $0x128] sm:$0xff]  ;;  %v1330_v34 = vpack.c.bf16 %v235_v31, %v234_v29  ;;  %v284_v37 = vld [vmem:[%s2094_s1 + $0x1b0] sm:$0xff]  ;;  %v1332_v39 = vpack.c.bf16 %v253_v36, %v252_v35  ;;  %s1735_s7 = scalar_select %p218_p10, %s1605_s22, 2 }
  0x16   : > { %1327 = vmatpush3.bf16.msra.mxu0 %v1326_v21  ;;  %v1362_v38 = vpack.c.bf16 %v267_v33, %v266_v32  ;;  %v285_v40 = vld [vmem:[%s2094_s1 + $0x1b8] sm:$0xff]  ;;  %v236_v41 = vld [vmem:[%s2094_s1 + $0x30] sm:$0xff]  ;;  %v254_v46 = vld [vmem:[%s2094_s1 + $0xc0] sm:$0xff] }
  0x17   : > { %1359 = vmatpush3.bf16.msra.mxu1 %v1358_v25  ;;  %1329 = vmatprep.subr.bf16.mxu0 %v1328_v26  ;;  %v237_v42 = vld [vmem:[%s2094_s1 + $0x38] sm:$0xff]  ;;  %v1364_v43 = vpack.c.bf16 %v285_v40, %v284_v37  ;;  %v268_v44 = vld [vmem:[%s2094_s1 + $0x130] sm:$0xff]  ;;  %v255_v47 = vld [vmem:[%s2094_s1 + $0xc8] sm:$0xff]  ;;  %s1438_s11 = smul.u32 56, %s1735_s7  ;;  %s1492_s7 = scalar_lea.vmem %s1491_s23, 1792 }
  0x18   : > { %1361 = vmatprep.subr.bf16.mxu1 %v1360_v30  ;;  %v269_v45 = vld [vmem:[%s2094_s1 + $0x138] sm:$0xff]  ;;  %v286_v48 = vld [vmem:[%s2094_s1 + $0x1c0] sm:$0xff]  ;;  %v287_v49 = vld [vmem:[%s2094_s1 + $0x1c8] sm:$0xff]  ;;  %v1334_v50 = vpack.c.bf16 %v237_v42, %v236_v41  ;;  %v1336_v52 = vpack.c.bf16 %v255_v47, %v254_v46 }
  0x19   : > { %v1366_v51 = vpack.c.bf16 %v269_v45, %v268_v44  ;;  %v238_v53 = vld [vmem:[%s2094_s1 + $0x40] sm:$0xff]  ;;  %v239_v54 = vld [vmem:[%s2094_s1 + $0x48] sm:$0xff]  ;;  %v1368_v56 = vpack.c.bf16 %v287_v49, %v286_v48  ;;  %v256_v58 = vld [vmem:[%s2094_s1 + $0xd0] sm:$0xff]  ;;  %s1792_s15 = scalar_lea.vmem %s2093_s0, %s1438_s11  ;;  %s215_s11 = sand.u32 1, %s1540_s19  }
  0x1a   : > { %1331 = vmatpush3.bf16.msra.mxu0 %v1330_v34  ;;  %v270_v55 = vld [vmem:[%s2094_s1 + $0x140] sm:$0xff]  ;;  %v271_v57 = vld [vmem:[%s2094_s1 + $0x148] sm:$0xff]  ;;  %v257_v59 = vld [vmem:[%s2094_s1 + $0xd8] sm:$0xff]  ;;  %v1338_v62 = vpack.c.bf16 %v239_v54, %v238_v53  ;;  %s1437_s8 = smul.u32 56, %s215_s11  ;;  %s1088_s22 = scalar_lea.sflag [#allocation3], %s215_s11 }
  0x1b   : > { %1363 = vmatpush3.bf16.msra.mxu1 %v1362_v38  ;;  %1333 = vmatprep.subr.bf16.mxu0 %v1332_v39  ;;  %v288_v60 = vld [vmem:[%s2094_s1 + $0x1d0] sm:$0xff]  ;;  %v289_v61 = vld [vmem:[%s2094_s1 + $0x1d8] sm:$0xff]  ;;  %v1370_v63 = vpack.c.bf16 %v271_v57, %v270_v55  ;;  %v1340_v0 = vpack.c.bf16 %v257_v59, %v256_v58  ;;  %v258_v6 = vld [vmem:[%s2094_s1 + $0xe0] sm:$0xff] }
  0x1c   : > { %1365 = vmatprep.subr.bf16.mxu1 %v1364_v43  ;;  %v240_v1 = vld [vmem:[%s2094_s1 + $0x50] sm:$0xff]  ;;  %v241_v2 = vld [vmem:[%s2094_s1 + $0x58] sm:$0xff]  ;;  %v1372_v4 = vpack.c.bf16 %v289_v61, %v288_v60  ;;  %v259_v7 = vld [vmem:[%s2094_s1 + $0xe8] sm:$0xff]  ;;  %v1552_v60 = vmov 0.0  }
  0x1d   : > { %v272_v3 = vld [vmem:[%s2094_s1 + $0x150] sm:$0xff]  ;;  %v273_v5 = vld [vmem:[%s2094_s1 + $0x158] sm:$0xff]  ;;  %v290_v8 = vld [vmem:[%s2094_s1 + $0x1e0] sm:$0xff]  ;;  %v1342_v10 = vpack.c.bf16 %v241_v2, %v240_v1  ;;  %v1344_v14 = vpack.c.bf16 %v259_v7, %v258_v6 }
  0x1e   : > { %1335 = vmatpush3.bf16.msra.mxu0 %v1334_v50  ;;  %v291_v9 = vld [vmem:[%s2094_s1 + $0x1e8] sm:$0xff]  ;;  %v242_v11 = vld [vmem:[%s2094_s1 + $0x60] sm:$0xff]  ;;  %v1374_v13 = vpack.c.bf16 %v273_v5, %v272_v3  ;;  %v1813_v17 = vld [vmem:[%s1792_s15 + $0x18] sm:$0xff]  ;;  %v1550_v50 = vmov 0.0|0.0  }
  0x1f   : > { %1367 = vmatpush3.bf16.msra.mxu1 %v1366_v51  ;;  %1337 = vmatprep.subr.bf16.mxu0 %v1336_v52  ;;  %v243_v12 = vld [vmem:[%s2094_s1 + $0x68] sm:$0xff]  ;;  %v274_v15 = vld [vmem:[%s2094_s1 + $0x160] sm:$0xff]  ;;  %v1376_v18 = vpack.c.bf16 %v291_v9, %v290_v8  ;;  %v260_v20 = vld [vmem:[%s2094_s1 + $0xf0] sm:$0xff] }
  0x20   : > { %1369 = vmatprep.subr.bf16.mxu1 %v1368_v56  ;;  %v1810_v16 = vld [vmem:[%s1792_s15 + $0x8] sm:$0xff]  ;;  %v261_v21 = vld [vmem:[%s2094_s1 + $0xf8] sm:$0xff]  ;;  %v292_v22 = vld [vmem:[%s2094_s1 + $0x1f0] sm:$0xff]  ;;  %466 = vmatprep.mubr.f32.mxu1 %v1813_v17  ;;  %v1346_v24 = vpack.c.bf16 %v243_v12, %v242_v11 }
  0x21   : > { %v275_v19 = vld [vmem:[%s2094_s1 + $0x168] sm:$0xff]  ;;  %396 = vmatprep.mubr.f32.mxu0 %v1810_v16  ;;  %v293_v23 = vld [vmem:[%s2094_s1 + $0x1f8] sm:$0xff]  ;;  %v1348_v26 = vpack.c.bf16 %v261_v21, %v260_v20  ;;  %v244_v27 = vld [vmem:[%s2094_s1 + $0x70] sm:$0xff] }
  0x22   : > { %1339 = vmatpush3.bf16.msra.mxu0 %v1338_v62  ;;  %v1378_v25 = vpack.c.bf16 %v275_v19, %v274_v15  ;;  %v245_v28 = vld [vmem:[%s2094_s1 + $0x78] sm:$0xff]  ;;  %v276_v29 = vld [vmem:[%s2094_s1 + $0x170] sm:$0xff]  ;;  %v1380_v30 = vpack.c.bf16 %v293_v23, %v292_v22  ;;  %v310_v32 = vld [vmem:[%s2094_s1 + $0x280] sm:$0xff] }
  0x23   : > { %1371 = vmatpush3.bf16.msra.mxu1 %v1370_v63  ;;  %1341 = vmatprep.subr.bf16.mxu0 %v1340_v0  ;;  %v277_v31 = vld [vmem:[%s2094_s1 + $0x178] sm:$0xff]  ;;  %v311_v33 = vld [vmem:[%s2094_s1 + $0x288] sm:$0xff]  ;;  %v1350_v34 = vpack.c.bf16 %v245_v28, %v244_v27  ;;  %v294_v37 = vld [vmem:[%s2094_s1 + $0x200] sm:$0xff] }
  0x24   : > { %1373 = vmatprep.subr.bf16.mxu1 %v1372_v4  ;;  %v1382_v35 = vpack.c.bf16 %v277_v31, %v276_v29  ;;  %v1384_v36 = vpack.c.bf16 %v311_v33, %v310_v32  ;;  %v295_v38 = vld [vmem:[%s2094_s1 + $0x208] sm:$0xff]  ;;  %v312_v39 = vld [vmem:[%s2094_s1 + $0x290] sm:$0xff]  ;;  %v313_v40 = vld [vmem:[%s2094_s1 + $0x298] sm:$0xff] }
  0x25   : > { %v1863_v41 = vld [vmem:[%s1792_s15] sm:$0xff]  ;;  %v1866_v42 = vld [vmem:[%s1792_s15 + $0x10] sm:$0xff]  ;;  %v1386_v43 = vpack.c.bf16 %v295_v38, %v294_v37  ;;  %v1388_v45 = vpack.c.bf16 %v313_v40, %v312_v39  ;;  %v297_v46 = vld [vmem:[%s2094_s1 + $0x218] sm:$0xff] }
  0x26   : > { %1343 = vmatpush3.bf16.msra.mxu0 %v1342_v10  ;;  %v296_v44 = vld [vmem:[%s2094_s1 + $0x210] sm:$0xff]  ;;  %v314_v47 = vld [vmem:[%s2094_s1 + $0x2a0] sm:$0xff]  ;;  %v315_v48 = vld [vmem:[%s2094_s1 + $0x2a8] sm:$0xff] }
  0x27   : > { %1375 = vmatpush3.bf16.msra.mxu1 %v1374_v13  ;;  %1345 = vmatprep.subr.bf16.mxu0 %v1344_v14  ;;  %v1881_v49 = vld [vmem:[%s1792_s15 + $0x28] sm:$0xff]  ;;  %v326_v51 = vld [vmem:[%s2094_s1 + $0x300] sm:$0xff]  ;;  %v1390_v54 = vpack.c.bf16 %v297_v46, %v296_v44  ;;  %v1392_v55 = vpack.c.bf16 %v315_v48, %v314_v47  ;;  %v316_v58 = vld [vmem:[%s2094_s1 + $0x2b0] sm:$0xff] }
  0x28   : > { %1377 = vmatprep.subr.bf16.mxu1 %v1376_v18  ;;  %v327_v52 = vld [vmem:[%s2094_s1 + $0x308] sm:$0xff]  ;;  %v298_v56 = vld [vmem:[%s2094_s1 + $0x220] sm:$0xff]  ;;  %v317_v59 = vld [vmem:[%s2094_s1 + $0x2b8] sm:$0xff] }
  0x29   : > { %v1417_v53 = vpack.c.bf16 %v327_v52, %v326_v51  ;;  %v299_v57 = vld [vmem:[%s2094_s1 + $0x228] sm:$0xff]  ;;  %v1908_v61 = vld [vmem:[%s1792_s15 + $0x30] sm:$0xff]  ;;  %v1396_v63 = vpack.c.bf16 %v317_v59, %v316_v58  ;;  %v301_v1 = vld [vmem:[%s2094_s1 + $0x238] sm:$0xff] }
  0x2a   : > { %1347 = vmatpush3.bf16.msra.mxu0 %v1346_v24  ;;  %v1394_v62 = vpack.c.bf16 %v299_v57, %v298_v56  ;;  %v300_v0 = vld [vmem:[%s2094_s1 + $0x230] sm:$0xff]  ;;  %v318_v2 = vld [vmem:[%s2094_s1 + $0x2c0] sm:$0xff]  ;;  %v319_v3 = vld [vmem:[%s2094_s1 + $0x2c8] sm:$0xff] }
  0x2b   : > { %1379 = vmatpush3.bf16.msra.mxu1 %v1378_v25  ;;  %1349 = vmatprep.subr.bf16.mxu0 %v1348_v26  ;;  %v1398_v4 = vpack.c.bf16 %v301_v1, %v300_v0  ;;  %v1400_v5 = vpack.c.bf16 %v319_v3, %v318_v2  ;;  %v302_v6 = vld [vmem:[%s2094_s1 + $0x240] sm:$0xff]  ;;  %v303_v7 = vld [vmem:[%s2094_s1 + $0x248] sm:$0xff]  ;;  %v320_v8 = vld [vmem:[%s2094_s1 + $0x2d0] sm:$0xff] }
  0x2c   : > { %1381 = vmatprep.subr.bf16.mxu1 %v1380_v30  ;;  %v321_v9 = vld [vmem:[%s2094_s1 + $0x2d8] sm:$0xff]  ;;  %v1402_v10 = vpack.c.bf16 %v303_v7, %v302_v6  ;;  %v304_v12 = vld [vmem:[%s2094_s1 + $0x250] sm:$0xff]  ;;  %v322_v14 = vld [vmem:[%s2094_s1 + $0x2e0] sm:$0xff] }
  0x2d   : > { %v1404_v11 = vpack.c.bf16 %v321_v9, %v320_v8  ;;  %v305_v13 = vld [vmem:[%s2094_s1 + $0x258] sm:$0xff]  ;;  %v323_v15 = vld [vmem:[%s2094_s1 + $0x2e8] sm:$0xff]  ;;  %v306_v20 = vld [vmem:[%s2094_s1 + $0x260] sm:$0xff] }
  0x2e   : > { %1351 = vmatpush3.bf16.msra.mxu0 %v1350_v34  ;;  %v1406_v18 = vpack.c.bf16 %v305_v13, %v304_v12  ;;  %v1408_v19 = vpack.c.bf16 %v323_v15, %v322_v14  ;;  %v307_v21 = vld [vmem:[%s2094_s1 + $0x268] sm:$0xff]  ;;  %v324_v22 = vld [vmem:[%s2094_s1 + $0x2f0] sm:$0xff]  ;;  %v325_v23 = vld [vmem:[%s2094_s1 + $0x2f8] sm:$0xff] }
  0x2f   : > { %1383 = vmatpush3.bf16.msra.mxu1 %v1382_v35  ;;  %1385 = vmatprep.subr.bf16.mxu0 %v1384_v36  ;;  %v1410_v24 = vpack.c.bf16 %v307_v21, %v306_v20  ;;  %v1412_v25 = vpack.c.bf16 %v325_v23, %v324_v22  ;;  %v308_v26 = vld [vmem:[%s2094_s1 + $0x270] sm:$0xff]  ;;  %v309_v27 = vld [vmem:[%s2094_s1 + $0x278] sm:$0xff]  ;;  %v1970_v29 = vld [vmem:[%s1792_s15 + $0x20] sm:$0xff]  ;;  %s217_s15 = scalar_lea.vmem [#allocation2], %s1437_s8 }
  0x30   : > { %1416 = vmatprep.subr.bf16.mxu1 %v1550_v50  ;;  %v1414_v28 = vpack.c.bf16 %v309_v27, %v308_v26  ;;  %v612_v30 = vld [vmem:[%s2095_s2] sm:$0xff]  ;;  %v613_v31 = vld [vmem:[%s2095_s2 + $0x8] sm:$0xff]  ;;  %v780_v59 = vld [vmem:[%s2097_s4 + $0x38] sm:$0xff]  ;;  %s1102_s10 = sshll.u32 %s217_s15, 4  ;;  %s2052_s10 = int_to_ptr.vmem [resolvable:$true] %s1102_s10 }
  0x31   : > { %397 = vmatmul.mubr.f32.vlgmr.msra.gmra.mrb[0].mxu0 %v1863_v41  ;;  %v1420_v32 = vpack.c.bf16 %v613_v31, %v612_v30  ;;  %v688_v51 = vld [vmem:[%s2096_s3] sm:$0xf]  ;;  %v775_v7 = vld [vmem:[%s2097_s4 + $0x10] sm:$0xff]  ;;  %v782_v8 = vld [vmem:[%s2097_s4 + $0x48] sm:$0xff]  ;;  %s1486_s16 = scalar_lea.vmem %s2052_s10, 896  ;;  %p1493_p0 = scmp.lt.s32.totalorder %s2052_s10, %s1491_s23 }
  0x32   : > { %467 = vmatmul.mubr.f32.vlgmr.msra.gmra.mrb[0].mxu1 %v1866_v42  ;;  %1387 = vmatpush3.bf16.msra.mxu0 %v1386_v43  ;;  %v781_v56 = vld [vmem:[%s2097_s4 + $0x40] sm:$0xff]  ;;  %v778_v9 = vld [vmem:[%s2097_s4 + $0x28] sm:$0xff]  ;;  %v784_v14 = vld [vmem:[%s2097_s4 + $0x58] sm:$0xff]  ;;  %p1487_p11 = scmp.ne.s32.totalorder %s2052_s10, %s1486_s16  ;;  %p1494_p1 = scmp.lt.s32.totalorder %s1492_s7, %s1486_s16 }
  0x33   : > { %1389 = vmatprep.subr.bf16.mxu0 %v1388_v45  ;;  %536 = vmatprep.mubr.f32.mxu0 %v1881_v49  ;;  %v773_v57 = vld [vmem:[%s2097_s4] sm:$0xff]  ;;  %v786_v20 = vld [vmem:[%s2097_s4 + $0x68] sm:$0xff] }
  0x34   : > { %1418 = vmatpush3.bf16.msra.mxu1 %v1417_v53  ;;  %1298 = vmatprep.mubr.msk.f32.mxu1 %vm1551_vm0, %v1552_v60  ;;  %v1424_v0 = vpack.c.bf16 %v780_v59, %v773_v57  ;;  %v777_v13 = vld [vmem:[%s2097_s4 + $0x20] sm:$0xff]  ;;  %p1488_p12 = pnand %p1487_p11, %p1622_p5  ;;  %p1495_p2 = por %p1494_p1, %p1493_p0 }
  0x35   : > { %1419 = vmatprep.subr.bf16.mxu1 %v1550_v50 }
  0x36   : > { %1391 = vmatpush3.bf16.msra.mxu0 %v1390_v54  ;;  %p1489_p13 = pneg %p1488_p12 }
  0x37   : > { %1393 = vmatprep.subr.bf16.mxu0 %v1392_v55  ;;  %1299 = vmatmul.mubr.msk.f32.vlgmr.msra.gmra.mrb[2].mxu1 %vm328_vm1, %v1908_v61  ;;  %v774_v55 = vld [vmem:[%s2097_s4 + $0x8] sm:$0xff] }
  0x38   : > { %1305 = vmatprep.mubr.msk.f32.mxu1 %vm1551_vm0, %v1552_v60  ;;  %1421 = vmatpush3.bf16.msra.mxu1 %v1420_v32  ;;  %v1422_v58 = vpack.c.bf16 %v781_v56, %v774_v55  ;;  %p1496_p3 = pnand %p1495_p2, %p1489_p13 }
  0x39   : > { %1308 = vmatprep.subr.mxu1 %v1552_v60 }
  0x3a   : > { %1395 = vmatpush3.bf16.msra.mxu0 %v1394_v62  ;;  %v776_v62 = vld [vmem:[%s2097_s4 + $0x18] sm:$0xff] }
  0x3b   : > { %1397 = vmatprep.subr.bf16.mxu0 %v1396_v63  ;;  %v783_v63 = vld [vmem:[%s2097_s4 + $0x50] sm:$0xff] }
  0x3c   : > { %v1426_v1 = vpack.c.bf16 %v783_v63, %v776_v62 }
  0x3e   : > { %1399 = vmatpush3.bf16.msra.mxu0 %v1398_v4 }
  0x3f   : > { %1401 = vmatprep.subr.bf16.mxu0 %v1400_v5 }
  0x42   : > { %1403 = vmatpush3.bf16.msra.mxu0 %v1402_v10  ;;  %v785_v10 = vld [vmem:[%s2097_s4 + $0x60] sm:$0xff] }
  0x43   : > { %1405 = vmatprep.subr.bf16.mxu0 %v1404_v11  ;;  %v1428_v11 = vpack.c.bf16 %v782_v8, %v775_v7  ;;  %v1430_v12 = vpack.c.bf16 %v785_v10, %v778_v9 }
  0x46   : > { %1407 = vmatpush3.bf16.msra.mxu0 %v1406_v18  ;;  %v1432_v18 = vpack.c.bf16 %v784_v14, %v777_v13 }
  0x47   : > { %1409 = vmatprep.subr.bf16.mxu0 %v1408_v19  ;;  %v779_v19 = vld [vmem:[%s2097_s4 + $0x30] sm:$0xff] }
  0x48   : > { %v1435_v21 = vpack.c.bf16 %v786_v20, %v779_v19 }
  0x4a   : > { %1411 = vmatpush3.bf16.msra.mxu0 %v1410_v24 }
  0x4b   : > { %1413 = vmatprep.subr.bf16.mxu0 %v1412_v25 }
  0x4e   : > { %1415 = vmatpush3.bf16.msra.mxu0 %v1414_v28 }
  0x51   : > { %537 = vmatmul.mubr.f32.vlgmr.msra.gmra.mrb[2].mxu0 %v1970_v29 }
 0x104   : > { %v1210_v33 = vpop.f32.mrb[0].mxu0 }
 0x105   : > { %v1245_v34 = vpop.f32.mrb[0].mxu1  ;;  %v1211_v35 = vpop.f32.mrb[1].mxu0 }
 0x106   : > { %v1212_v36 = vadd.f32 %v1211_v35, %v1210_v33  ;;  %v1246_v37 = vpop.f32.mrb[1].mxu1 }
 0x107   : > { %v1247_v38 = vadd.f32 %v1246_v37, %v1245_v34 }
 0x109   : > { %v469_v39 = vadd.f32 %v1247_v38, %v1212_v36 }
 0x10a   : > { %v608_v40 = vpop.f32.mrb[2].mxu1 }
 0x10b   : > { %v1300_v43 = vpop.f32.mrb[3].mxu1 }
 0x124   : > { %v1280_v44 = vpop.f32.mrb[2].mxu0 }
 0x125   : > { %v1281_v45 = vpop.f32.mrb[3].mxu0 }
 0x126   : > { %v1282_v46 = vadd.f32 %v1281_v45, %v1280_v44 }
 0x128   : > { %v539_v47 = vadd.f32 %v1282_v46, %v469_v39 }
 0x12a   : > { %v609_v48 = vadd.f32 %v608_v40, %v539_v47 }
 0x12c   : > { %1306 = vmatmul.mubr.msk.f32.vlgmr.msra.gmra.mrb[4].mxu1 %vm328_vm1, %v609_v48 }
 0x12d   : > { %1309 = vmatpush3.msk.msra.mxu1 %vm693_vm2, %v688_v51  ;;  %1310 = vmatprep.mubr.msk.f32.mxu1 %vm1551_vm0, %v1552_v60 }
 0x12e   : > { %1423 = vmatprep.subr.bf16.mxu1 %v1422_v58 }
 0x1ff   : > { %v683_v52 = vpop.f32.mrb[4].mxu1 }
 0x200   : > { %v687_v53 = vmax.f32 %v683_v52, 0.0  ;;  %v1307_v54 = vpop.f32.mrb[5].mxu1 }
 0x202   : > { %1311 = vmatmul.mubr.msk.f32.vlgmr.msra.gmra.mrb[6].mxu1 %vm689_vm3, %v687_v53 }
 0x203   : > { %854 = vmatprep.mubr.f32.mxu1 %v1552_v60  ;;  %1425 = vmatpush1.bf16.msra.mxu1 %v1424_v0 }
 0x204   : > { %1427 = vmatprep.subr.bf16.mxu1 %v1426_v1 }
 0x2d5   : > { %v763_v2 = vpop.f32.mrb[6].mxu1 }
 0x2d6   : > { %v1170_v3 = vmul.f32 -1.442695, %v763_v2  ;;  %v1312_v4 = vpop.f32.mrb[7].mxu1 }
 0x2d8   : > { %1482 = vpow2.f32 %v1170_v3 }
 0x2e2   : > { %v1483_v5 = vpop.eup %1482 }
 0x2e3   : > { %v770_v6 = vadd.f32 1.0, %v1483_v5 }
 0x2e5   : > { %1484 = vrcp.f32 %v770_v6 }
 0x2ef   : > { %v1485_v15 = vpop.eup %1484 }
 0x2f0   : > { %1171 = vmatmul.mubr.msk.f32.vlgmr.msra.gmra.mrb[8].mxu1 %vm328_vm1, %v1485_v15 }
 0x2f1   : > { %1429 = vmatpush1.bf16.msra.mxu1 %v1428_v11  ;;  %925 = vmatprep.mubr.f32.mxu1 %v1552_v60 }
 0x2f2   : > { %1431 = vmatprep.subr.bf16.mxu1 %v1430_v12 }
 0x2f4   : > { %1172 = vmatmul.mubr.msk.f32.vlgmr.msra.gmra.mrb[10].mxu1 %vm328_vm1, %v1485_v15 }
 0x2f5   : > { %1433 = vmatpush1.bf16.msra.mxu1 %v1432_v18  ;;  %996 = vmatprep.mubr.f32.mxu1 %v1552_v60 }
 0x2f6   : > { %1434 = vmatprep.subr.bf16.mxu1 %v1550_v50 }
 0x2f8   : > { %1173 = vmatmul.mubr.msk.f32.vlgmr.msra.gmra.mrb[12].mxu1 %vm328_vm1, %v1485_v15 }
 0x2f9   : > { %1436 = vmatpush3.bf16.msra.mxu1 %v1435_v21  ;;  %1317 = vmatprep.mubr.msk.f32.mxu1 %vm1551_vm0, %v1552_v60 }
 0x2fc   : > { %1318 = vmatmul.mubr.msk.f32.vlgmr.msra.gmra.mrb[14].mxu1 %vm328_vm1, %v1485_v15 }
 0x3c3   : > { %v856_v22 = vpop.f32.mrb[8].mxu1 }
 0x3c4   : > { %v1073_v23 = vmul.f32 %v856_v22, %v1863_v41  ;;  %v858_v24 = vpop.f32.mrb[9].mxu1 }
 0x3c5   : > { %v1074_v25 = vmul.f32 %v858_v24, %v1810_v16 }
 0x3c6   : > { %1080 = vst [vmem:[%s217_s15] sm:$0xff] %v1073_v23 }
 0x3c7   : > { %1081 = vst [vmem:[%s217_s15 + $0x8] sm:$0xff] %v1074_v25  ;;  %v927_v50 = vpop.f32.mrb[10].mxu1 }
 0x3c8   : > { %v1075_v26 = vmul.f32 %v927_v50, %v1866_v42  ;;  %v929_v27 = vpop.f32.mrb[11].mxu1 }
 0x3c9   : > { %v1076_v60 = vmul.f32 %v929_v27, %v1813_v17 }
 0x3ca   : > { %1082 = vst [vmem:[%s217_s15 + $0x10] sm:$0xff] %v1075_v26 }
 0x3cb   : > { %1083 = vst [vmem:[%s217_s15 + $0x18] sm:$0xff] %v1076_v60  ;;  %v998_v28 = vpop.f32.mrb[12].mxu1 }
 0x3cc   : > { %v1077_v30 = vmul.f32 %v998_v28, %v1970_v29  ;;  %v1000_v31 = vpop.f32.mrb[13].mxu1 }
 0x3cd   : > { %v1078_v41 = vmul.f32 %v1000_v31, %v1881_v49 }
 0x3ce   : > { %1084 = vst [vmem:[%s217_s15 + $0x20] sm:$0xff] %v1077_v30 }
 0x3cf   : > { %1085 = vst [vmem:[%s217_s15 + $0x28] sm:$0xff] %v1078_v41  ;;  %v1069_v16 = vpop.f32.mrb[14].mxu1 }
 0x3d0   : > { %v1079_v32 = vmul.f32 %v1069_v16, %v1908_v61  ;;  %v1319_v42 = vpop.f32.mrb[15].mxu1 }
 0x3d2   : > { %1086 = vst.msk [vmem:[%s217_s15 + $0x30] sm:$0xff] %vm328_vm1, %v1079_v32 }
 0x3d3   : > { %1499 = shalt.err (!%p1496_p3)
}
 0x3d4   : > { %s1500_s25 = scalar_lea.hbm %s2050_s14, 896  ;;  %s1504_s6 = scalar_lea.hbm %s2098_s5, 2688 }
 0x3d5   : > { %p1501_p4 = scmp.ne.s32.totalorder %s2050_s14, %s1500_s25  ;;  %p1505_p9 = scmp.lt.u32.totalorder %s2050_s14, %s2098_s5 }
 0x3d6   : > { %p1506_p10 = scmp.lt.u32.totalorder %s1504_s6, %s1500_s25  ;;  %p1508_p12 = scmp.lt.u32.totalorder %s1500_s25, %s2050_s14 }
 0x3d7   : > { %p1502_p7 = pnand %p1501_p4, %p1622_p5 }
 0x3d8   : > { %p1507_p11 = por %p1506_p10, %p1505_p9 }
 0x3d9   : > { %p1503_p8 = pneg %p1502_p7 }
 0x3da   : > { %p1509_p13 = por %p1508_p12, %p1507_p11 }
 0x3dc   : > { %p1510_p0 = pnand %p1509_p13, %p1503_p8 }
 0x3de   : > { %1513 = shalt.err (!%p1510_p0)
}
 0x3df   : > { %1440 = dma.vmem_to_hbm [thread:$0]  (%p1622_p5), %s2052_s10, 896, %s2050_s14, %s1088_s22  }
 0x3e0 PF: > { %p1446_p1 = scmp.ge.s32.totalorder %s1548_s21, 2  ;;  %s1114_s15 = sand.u32 1, %s1536_s18  }
 0x3e1   : > { %s1115_s9 = scalar_lea.sflag [#allocation3], %s1114_s15 }
 0x3e2   : > { %p1443_p2 = pnand %p1446_p1, %p1626_p6 }
 0x3e4   : > { %1531 = dma.done.wait (!%p1443_p2), %s1115_s9, 896  }
 0x3e5   : > { %1533 = vsyncadd (!%p1443_p2), %s1115_s9, 4294966400  ;;  %p15_p3 = scmp.ge.s32.totalorder %s1609_s24, 5   ;;  %s2101_s18 = smov %s1540_s19 }
 0x3e6   : > { %s2102_s19 = smov %s1544_s20  ;;  %s2103_s20 = smov %s1620_s27 }
 0x3e7   : > { %s2104_s21 = smov %s1609_s24  ;;  %17 = sbr.rel (!%p15_p3) target bundleno = 3 (0x3), region = 75 }
 0x3ee   :  { %1120 = vsyncpa [#allocation3], 1 }
 0x3ef   :  { %1122 = vsyncpa [#allocation3 + $0x1], 1 }

</bundles_post_ra>
